<compile_context>
chip_gen: v7x
topology: tpu7x:2x2x1
jax: 0.10.0
libtpu: 0.0.40
codegen_flags: <defaults>
</compile_context>

<pallas_src>
import jax
import jax.numpy as jnp
import numpy as np
from jax import lax
from jax.experimental import pallas as pl
from jax.experimental.pallas import tpu as pltpu

L_IN = 10            # length of the `a2` segment (split sections [4,4,1,4,1,10])
L3 = 11              # length after conv3 (kernel=2, pad=1)
HID = 128            # LSTM hidden size
GATES = 4 * HID      # LSTMCell gate width (512)
DIM4 = 32 * L3       # 352 = flattened conv4 output (torch flatten order c*11+l)
DIM4_PAD = 384       # lane-padded conv4 width
SLABW = 384          # input slab width: hx(128) | cx(128) | a2(40 in a 128 slot)

_SINGLE_BUFFER_OK = None   # lazily probed: does this JAX accept pl.Buffered(1)?


def _round_up(n, m):
    return ((n + m - 1) // m) * m


# ----------------------------------------------------------------------------- kernel
def net_kernel(in_ref,
               w1_ref, b1_ref, w2_ref, b2_ref, w3_ref, b3_ref, w4_ref, b4_ref,
               wl_ref, bl_ref, wh_ref, bh_ref, out_ref):
    bf16 = jnp.bfloat16

    def mm(x, w_ref):
        # bf16 multiplies, f32 accumulation on the MXU.
        return jnp.dot(x.astype(bf16), w_ref[...], preferred_element_type=jnp.float32)

    lrelu = lambda v: jnp.maximum(v, 0.1 * v)   # LeakyReLU(0.1)

    # Lane-aligned static slices of the packed input slab.
    hx = in_ref[:, 0:HID]
    cx = in_ref[:, HID:2 * HID]
    a2 = in_ref[:, 2 * HID:2 * HID + 128]       # first 40 lanes are real, rest zero

    # Conv stack as dense matmuls on the channel-major flattened activation.
    y = lrelu(mm(a2, w1_ref) + b1_ref[...])     # (TB, 384)
    y = lrelu(mm(y, w2_ref) + b2_ref[...])      # (TB, 384)
    y = lrelu(mm(y, w3_ref) + b3_ref[...])      # (TB, 768)
    y = lrelu(mm(y, w4_ref) + b4_ref[...])      # (TB, 384); cols 352:384 are exactly 0

    # Fused LSTMCell input projection: [conv4_flat | hx] @ [W_ih^T ; 0 ; W_hh^T].
    xh = jnp.concatenate([y.astype(bf16), hx.astype(bf16)], axis=1)   # (TB, 512) bf16
    gates = jnp.dot(xh, wl_ref[...], preferred_element_type=jnp.float32) + bl_ref[...]

    i = jax.nn.sigmoid(gates[:, 0 * HID:1 * HID])
    f = jax.nn.sigmoid(gates[:, 1 * HID:2 * HID])
    g = jnp.tanh(gates[:, 2 * HID:3 * HID])
    o = jax.nn.sigmoid(gates[:, 3 * HID:4 * HID])
    c_new = f * cx + i * g
    h_new = o * jnp.tanh(c_new)

    # Combined critic/actor head (critic in col 0, actor in cols 1..D).
    head = mm(h_new, wh_ref) + bh_ref[...]      # (TB, HEADW)

    hw = wh_ref.shape[1]
    out_ref[:, 0:hw] = head
    out_ref[:, hw:hw + HID] = h_new
    out_ref[:, hw + HID:hw + 2 * HID] = c_new


# ----------------------------------------------------------------------- weight folding
def _conv_as_dense(w, l_in, l_out, pad, k_rows, n_cols):
    """Fold a Conv1d (torch weight layout (Cout, Cin, K)) into a dense matrix that maps
    a channel-major flattened input (Cin*l_in,) to a channel-major flattened output
    (Cout*l_out,), then zero-pad to (k_rows, n_cols) for lane-dense MXU tiles."""
    c_out, c_in, k = w.shape
    mat = jnp.zeros((c_in * l_in, c_out * l_out), jnp.float32)
    for kk in range(k):
        # out[co, lo] += w[co, ci, kk] * in[ci, lo + kk - pad]
        d = np.eye(l_in, l_out, k=pad - kk, dtype=np.float32)
        mat = mat + jnp.kron(w[:, :, kk].T, jnp.asarray(d))
    return jnp.pad(mat, ((0, k_rows - c_in * l_in), (0, n_cols - c_out * l_out)))


def prepare_params(params, discrete_number):
    """One-time folding/casting of weights (hoisted out of the per-call forward)."""
    bf16 = jnp.bfloat16
    D = discrete_number

    w1d = _conv_as_dense(params['w1'], L_IN, L_IN, 1, 128, 384).astype(bf16)
    w2d = _conv_as_dense(params['w2'], L_IN, L_IN, 1, 384, 384).astype(bf16)
    w3d = _conv_as_dense(params['w3'], L_IN, L3, 1, 384, 768).astype(bf16)
    w4d = _conv_as_dense(params['w4'], L3, L3, 0, 768, 384).astype(bf16)

    def bias_flat(b, reps, n_pad):
        v = jnp.repeat(b, reps)
        return jnp.pad(v, (0, n_pad - v.shape[0])).reshape(1, n_pad)

    b1f = bias_flat(params['b1'], L_IN, 384)
    b2f = bias_flat(params['b2'], L_IN, 384)
    b3f = bias_flat(params['b3'], L3, 768)
    b4f = bias_flat(params['b4'], L3, 384)

    # Fused LSTM input projection: rows 0:352 = W_ih^T (conv4 flatten order),
    # rows 352:384 zero (padded conv4 cols are exactly zero), rows 384:512 = W_hh^T.
    wl = jnp.zeros((DIM4_PAD + HID, GATES), jnp.float32)
    wl = wl.at[:DIM4, :].set(params['w_ih'].T)
    wl = wl.at[DIM4_PAD:, :].set(params['w_hh'].T)
    wl = wl.astype(bf16)
    bl = (params['b_ih'] + params['b_hh']).reshape(1, GATES)

    headw = _round_up(1 + D, 128)
    w_head = jnp.zeros((HID, headw), jnp.float32)
    w_head = w_head.at[:, 0:1].set(params['w_critic'].T)
    w_head = w_head.at[:, 1:1 + D].set(params['w_actor'].T)
    w_head = w_head.astype(bf16)
    b_head = jnp.zeros((1, headw), jnp.float32)
    b_head = b_head.at[0, 0].set(params['b_critic'][0])
    b_head = b_head.at[0, 1:1 + D].set(params['b_actor'])

    return {
        'w1': w1d, 'b1': b1f, 'w2': w2d, 'b2': b2f,
        'w3': w3d, 'b3': b3f, 'w4': w4d, 'b4': b4f,
        'w_lstm': wl, 'b_lstm': bl, 'w_head': w_head, 'b_head': b_head,
        'headw': headw,
    }


# ---------------------------------------------------------------------------- wrapper
def _device_max_tb():
    """Max batch tile: 256 on v5e (single vst slot / 128-wide MXU), 512 otherwise."""
    try:
        kind = jax.devices()[0].device_kind.lower()
        if 'v5 lite' in kind or 'v5e' in kind or 'v5litepod' in kind:
            return 256
    except Exception:
        pass
    return 512


def _pick_tb(B, max_tb):
    """Batch tile: tiny batches = one small tile; otherwise a multiple of 128 with
    at least 2 grid steps so both v7x TensorCores get work."""
    b8 = _round_up(B, 8)
    if b8 <= 128:
        return b8
    n_steps = max(2, -(-b8 // max_tb))
    tb = _round_up(-(-b8 // n_steps), 128)
    return min(tb, max_tb)


def _const_spec(arr, single_buffer):
    n = arr.ndim
    if single_buffer:
        # Constant index_map -> never re-DMA'd; single-buffer to save VMEM/bookkeeping.
        return pl.BlockSpec(arr.shape, lambda b, n=n: (0,) * n,
                            pipeline_mode=pl.Buffered(1))
    return pl.BlockSpec(arr.shape, lambda b, n=n: (0,) * n)


def conv_choice1_forward(x, hx, cx, prep, discrete_number):
    """x: (B, 4, 24) NCL like PyTorch; hx/cx: (B, 128); prep: prepare_params output."""
    global _SINGLE_BUFFER_OK
    B = x.shape[0]
    D = discrete_number
    HEADW = prep['headw']
    OUTW = HEADW + 2 * HID

    # torch.split(x, [4,4,1,4,1,10], dim=2) -> a2 is the last 10 columns.
    a2_flat = x[:, :, 14:24].reshape(B, 4 * L_IN)            # channel-major (ci*10 + li)

    TB = _pick_tb(B, _device_max_tb())
    Bp = _round_up(B, TB)

    # One lane-padded input slab per batch row: [hx | cx | a2 | zeros].
    slab = jnp.concatenate([hx, cx, a2_flat], axis=1)        # (B, 296)
    slab = jnp.pad(slab, ((0, Bp - B), (0, SLABW - slab.shape[1])))

    consts = (prep['w1'], prep['b1'], prep['w2'], prep['b2'],
              prep['w3'], prep['b3'], prep['w4'], prep['b4'],
              prep['w_lstm'], prep['b_lstm'], prep['w_head'], prep['b_head'])

    def run(single_buffer):
        grid_spec = pltpu.PrefetchScalarGridSpec(
            num_scalar_prefetch=0,
            grid=(Bp // TB,),
            in_specs=[pl.BlockSpec((TB, SLABW), lambda b: (b, 0))]
                     + [_const_spec(c, single_buffer) for c in consts],
            out_specs=pl.BlockSpec((TB, OUTW), lambda b: (b, 0)),
        )
        return pl.pallas_call(
            net_kernel,
            out_shape=jax.ShapeDtypeStruct((Bp, OUTW), jnp.float32),
            grid_spec=grid_spec,
            compiler_params=pltpu.CompilerParams(
                dimension_semantics=("parallel",)),
        )(slab, *consts)

    if _SINGLE_BUFFER_OK is None:
        try:
            out = jax.block_until_ready(run(True))
            _SINGLE_BUFFER_OK = True
        except Exception:
            _SINGLE_BUFFER_OK = False
            out = run(False)
    else:
        out = run(_SINGLE_BUFFER_OK)

    critic = out[:B, 0:1]
    actor = out[:B, 1:1 + D]
    h_new = out[:B, HEADW:HEADW + HID]
    c_new = out[:B, HEADW + HID:HEADW + 2 * HID]
    return critic, actor, (h_new, c_new)


# ------------------------------------------------------------------------------ params
def init_params(key, discrete_number):
    ks = jax.random.split(key, 12)
    w = lambda k, shape, s: jax.random.normal(k, shape, jnp.float32) * s
    return {
        'w1': w(ks[0], (32, 4, 3), 0.3),  'b1': w(ks[1], (32,), 0.1),
        'w2': w(ks[2], (32, 32, 3), 0.1), 'b2': w(ks[3], (32,), 0.1),
        'w3': w(ks[4], (64, 32, 2), 0.1), 'b3': w(ks[5], (64,), 0.1),
        'w4': w(ks[6], (32, 64, 1), 0.1), 'b4': w(ks[7], (32,), 0.1),
        'w_ih': w(ks[8], (GATES, DIM4), 0.05),
        'w_hh': w(ks[9], (GATES, HID), 0.05),
        'b_ih': jnp.zeros((GATES,), jnp.float32),          # lstm2.bias_ih.fill_(0)
        'b_hh': w(ks[10], (GATES,), 0.05),
        'w_critic': w(ks[11], (1, HID), 0.1),
        'b_critic': jnp.zeros((1,), jnp.float32),
        'w_actor': w(jax.random.fold_in(key, 99), (discrete_number, HID), 0.01),
        'b_actor': jnp.zeros((discrete_number,), jnp.float32),
    }


def reference_forward(x, hx, cx, params, discrete_number):
    """Pure-JAX reference matching the PyTorch forward (observation_num=24)."""
    hp = jax.lax.Precision.HIGHEST
    a2 = x[:, :, 14:24]

    def conv1d(z, w, b, pad):
        y = lax.conv_general_dilated(z, w, window_strides=(1,), padding=[(pad, pad)],
                                     dimension_numbers=('NCH', 'OIH', 'NCH'),
                                     precision=hp)
        return y + b[None, :, None]

    lrelu = lambda v: jnp.where(v > 0, v, 0.1 * v)
    y = lrelu(conv1d(a2, params['w1'], params['b1'], 1))
    y = lrelu(conv1d(y, params['w2'], params['b2'], 1))
    y = lrelu(conv1d(y, params['w3'], params['b3'], 1))
    y = lrelu(conv1d(y, params['w4'], params['b4'], 0))
    flat = y.reshape(y.shape[0], -1)                       # (B, 352), NCL flatten order
    gates = (jnp.dot(flat, params['w_ih'].T, precision=hp) + params['b_ih']
             + jnp.dot(hx, params['w_hh'].T, precision=hp) + params['b_hh'])
    i, f, g, o = jnp.split(gates, 4, axis=1)
    i, f, o = jax.nn.sigmoid(i), jax.nn.sigmoid(f), jax.nn.sigmoid(o)
    g = jnp.tanh(g)
    c_new = f * cx + i * g
    h_new = o * jnp.tanh(c_new)
    critic = jnp.dot(h_new, params['w_critic'].T, precision=hp) + params['b_critic']
    actor = jnp.dot(h_new, params['w_actor'].T, precision=hp) + params['b_actor']
    return critic, actor, (h_new, c_new)


if __name__ == "__main__":
    discrete_number = 6
    observation_num = 24

    key = jax.random.PRNGKey(0)
    kx, kh, kc, kp = jax.random.split(key, 4)
    params = init_params(kp, discrete_number)
    prep = prepare_params(params, discrete_number)   # one-time weight folding

    def check(B, seed):
        kk = jax.random.fold_in(key, seed)
        k1, k2, k3 = jax.random.split(kk, 3)
        x = jax.random.normal(k1, (B, 4, observation_num), jnp.float32)
        hx = jax.random.normal(k2, (B, HID), jnp.float32) * 0.1
        cx = jax.random.normal(k3, (B, HID), jnp.float32) * 0.1

        critic, actor, (hx_n, cx_n) = conv_choice1_forward(x, hx, cx, prep,
                                                           discrete_number)
        jax.block_until_ready((critic, actor, hx_n, cx_n))

        rc, ra, (rh, rcx) = reference_forward(x, hx, cx, params, discrete_number)
        # Kernel uses bf16 multiplies with f32 accumulation; reference is full f32.
        np.testing.assert_allclose(np.asarray(critic), np.asarray(rc), rtol=2e-2, atol=5e-3)
        np.testing.assert_allclose(np.asarray(actor), np.asarray(ra), rtol=2e-2, atol=5e-3)
        np.testing.assert_allclose(np.asarray(hx_n), np.asarray(rh), rtol=2e-2, atol=5e-3)
        np.testing.assert_allclose(np.asarray(cx_n), np.asarray(rcx), rtol=2e-2, atol=5e-3)

    check(2, 1)      # tiny batch: single (8, 384) tile
    check(192, 2)    # multi-step grid path (2 parallel batch tiles of 128)

    # TODO(synk): the observation_num==28 / self.test_flag branch is dead code in the
    # reference forward (test_flag is forced False), so it is intentionally not modeled.
    print("KERNEL_OK")
</pallas_src>

<mosaic_0001>
module attributes {stable_mosaic.version = 11 : i64} {
  func.func @net_kernel(%arg0: i32, %arg1: memref<8x384xf32, #tpu.memory_space<vmem>>, %arg2: memref<128x384xbf16, #tpu.memory_space<vmem>>, %arg3: memref<1x384xf32, #tpu.memory_space<vmem>>, %arg4: memref<384x384xbf16, #tpu.memory_space<vmem>>, %arg5: memref<1x384xf32, #tpu.memory_space<vmem>>, %arg6: memref<384x768xbf16, #tpu.memory_space<vmem>>, %arg7: memref<1x768xf32, #tpu.memory_space<vmem>>, %arg8: memref<768x384xbf16, #tpu.memory_space<vmem>>, %arg9: memref<1x384xf32, #tpu.memory_space<vmem>>, %arg10: memref<512x512xbf16, #tpu.memory_space<vmem>>, %arg11: memref<1x512xf32, #tpu.memory_space<vmem>>, %arg12: memref<128x128xbf16, #tpu.memory_space<vmem>>, %arg13: memref<1x128xf32, #tpu.memory_space<vmem>>, %arg14: memref<8x384xf32, #tpu.memory_space<vmem>>) attributes {dimension_semantics = [#tpu.dimension_semantics<parallel>], iteration_bounds = array<i64: 1>, scalar_prefetch = 0 : i64, scratch_operands = 0 : i64, tpu.core_type = #tpu.core_type<tc>, window_params = [{transform_indices = @transform_0, window_bounds = array<i64: 8, 384>}, {pipeline_mode = #tpu.pipeline_mode<synchronous>, transform_indices = @transform_1, window_bounds = array<i64: 128, 384>}, {pipeline_mode = #tpu.pipeline_mode<synchronous>, transform_indices = @transform_2, window_bounds = array<i64: 1, 384>}, {pipeline_mode = #tpu.pipeline_mode<synchronous>, transform_indices = @transform_3, window_bounds = array<i64: 384, 384>}, {pipeline_mode = #tpu.pipeline_mode<synchronous>, transform_indices = @transform_4, window_bounds = array<i64: 1, 384>}, {pipeline_mode = #tpu.pipeline_mode<synchronous>, transform_indices = @transform_5, window_bounds = array<i64: 384, 768>}, {pipeline_mode = #tpu.pipeline_mode<synchronous>, transform_indices = @transform_6, window_bounds = array<i64: 1, 768>}, {pipeline_mode = #tpu.pipeline_mode<synchronous>, transform_indices = @transform_7, window_bounds = array<i64: 768, 384>}, {pipeline_mode = #tpu.pipeline_mode<synchronous>, transform_indices = @transform_8, window_bounds = array<i64: 1, 384>}, {pipeline_mode = #tpu.pipeline_mode<synchronous>, transform_indices = @transform_9, window_bounds = array<i64: 512, 512>}, {pipeline_mode = #tpu.pipeline_mode<synchronous>, transform_indices = @transform_10, window_bounds = array<i64: 1, 512>}, {pipeline_mode = #tpu.pipeline_mode<synchronous>, transform_indices = @transform_11, window_bounds = array<i64: 128, 128>}, {pipeline_mode = #tpu.pipeline_mode<synchronous>, transform_indices = @transform_12, window_bounds = array<i64: 1, 128>}, {transform_indices = @transform_13, window_bounds = array<i64: 8, 384>}]} {
    %c0 = arith.constant 0 : index
    %c0_0 = arith.constant 0 : index
    %0 = vector.load %arg1[%c0, %c0_0] : memref<8x384xf32, #tpu.memory_space<vmem>>, vector<8x128xf32>
    %c0_1 = arith.constant 0 : index
    %c128 = arith.constant 128 : index
    %1 = vector.load %arg1[%c0_1, %c128] : memref<8x384xf32, #tpu.memory_space<vmem>>, vector<8x128xf32>
    %c0_2 = arith.constant 0 : index
    %c256 = arith.constant 256 : index
    %2 = vector.load %arg1[%c0_2, %c256] : memref<8x384xf32, #tpu.memory_space<vmem>>, vector<8x128xf32>
    %3 = arith.truncf %2 : vector<8x128xf32> to vector<8x128xbf16>
    %c0_3 = arith.constant 0 : index
    %c0_4 = arith.constant 0 : index
    %4 = vector.load %arg2[%c0_3, %c0_4] : memref<128x384xbf16, #tpu.memory_space<vmem>>, vector<128x384xbf16>
    %cst = arith.constant dense<0.000000e+00> : vector<8x384xf32>
    %5 = tpu.matmul %3, %4, %cst {dimension_numbers = #tpu.dot_dimension_numbers<[1], [0], [0], [1], [0, 0, 1, 1], [], []>} : vector<8x128xbf16>, vector<128x384xbf16>, vector<8x384xf32> -> vector<8x384xf32>
    %c0_5 = arith.constant 0 : index
    %c0_6 = arith.constant 0 : index
    %6 = vector.load %arg3[%c0_5, %c0_6] : memref<1x384xf32, #tpu.memory_space<vmem>>, vector<1x384xf32>
    %7 = vector.broadcast %6 : vector<1x384xf32> to vector<8x384xf32>
    %8 = arith.addf %5, %7 : vector<8x384xf32>
    %cst_7 = arith.constant 1.000000e-01 : f32
    %9 = vector.broadcast %cst_7 : f32 to vector<8x384xf32>
    %10 = arith.mulf %9, %8 : vector<8x384xf32>
    %11 = arith.maximumf %8, %10 : vector<8x384xf32>
    %12 = arith.truncf %11 : vector<8x384xf32> to vector<8x384xbf16>
    %c0_8 = arith.constant 0 : index
    %c0_9 = arith.constant 0 : index
    %13 = vector.load %arg4[%c0_8, %c0_9] : memref<384x384xbf16, #tpu.memory_space<vmem>>, vector<384x384xbf16>
    %cst_10 = arith.constant dense<0.000000e+00> : vector<8x384xf32>
    %14 = tpu.matmul %12, %13, %cst_10 {dimension_numbers = #tpu.dot_dimension_numbers<[1], [0], [0], [1], [0, 0, 1, 1], [], []>} : vector<8x384xbf16>, vector<384x384xbf16>, vector<8x384xf32> -> vector<8x384xf32>
    %c0_11 = arith.constant 0 : index
    %c0_12 = arith.constant 0 : index
    %15 = vector.load %arg5[%c0_11, %c0_12] : memref<1x384xf32, #tpu.memory_space<vmem>>, vector<1x384xf32>
    %16 = vector.broadcast %15 : vector<1x384xf32> to vector<8x384xf32>
    %17 = arith.addf %14, %16 : vector<8x384xf32>
    %cst_13 = arith.constant 1.000000e-01 : f32
    %18 = vector.broadcast %cst_13 : f32 to vector<8x384xf32>
    %19 = arith.mulf %18, %17 : vector<8x384xf32>
    %20 = arith.maximumf %17, %19 : vector<8x384xf32>
    %21 = arith.truncf %20 : vector<8x384xf32> to vector<8x384xbf16>
    %c0_14 = arith.constant 0 : index
    %c0_15 = arith.constant 0 : index
    %22 = vector.load %arg6[%c0_14, %c0_15] : memref<384x768xbf16, #tpu.memory_space<vmem>>, vector<384x768xbf16>
    %cst_16 = arith.constant dense<0.000000e+00> : vector<8x768xf32>
    %23 = tpu.matmul %21, %22, %cst_16 {dimension_numbers = #tpu.dot_dimension_numbers<[1], [0], [0], [1], [0, 0, 1, 1], [], []>} : vector<8x384xbf16>, vector<384x768xbf16>, vector<8x768xf32> -> vector<8x768xf32>
    %c0_17 = arith.constant 0 : index
    %c0_18 = arith.constant 0 : index
    %24 = vector.load %arg7[%c0_17, %c0_18] : memref<1x768xf32, #tpu.memory_space<vmem>>, vector<1x768xf32>
    %25 = vector.broadcast %24 : vector<1x768xf32> to vector<8x768xf32>
    %26 = arith.addf %23, %25 : vector<8x768xf32>
    %cst_19 = arith.constant 1.000000e-01 : f32
    %27 = vector.broadcast %cst_19 : f32 to vector<8x768xf32>
    %28 = arith.mulf %27, %26 : vector<8x768xf32>
    %29 = arith.maximumf %26, %28 : vector<8x768xf32>
    %30 = arith.truncf %29 : vector<8x768xf32> to vector<8x768xbf16>
    %c0_20 = arith.constant 0 : index
    %c0_21 = arith.constant 0 : index
    %31 = vector.load %arg8[%c0_20, %c0_21] : memref<768x384xbf16, #tpu.memory_space<vmem>>, vector<768x384xbf16>
    %cst_22 = arith.constant dense<0.000000e+00> : vector<8x384xf32>
    %32 = tpu.matmul %30, %31, %cst_22 {dimension_numbers = #tpu.dot_dimension_numbers<[1], [0], [0], [1], [0, 0, 1, 1], [], []>} : vector<8x768xbf16>, vector<768x384xbf16>, vector<8x384xf32> -> vector<8x384xf32>
    %c0_23 = arith.constant 0 : index
    %c0_24 = arith.constant 0 : index
    %33 = vector.load %arg9[%c0_23, %c0_24] : memref<1x384xf32, #tpu.memory_space<vmem>>, vector<1x384xf32>
    %34 = vector.broadcast %33 : vector<1x384xf32> to vector<8x384xf32>
    %35 = arith.addf %32, %34 : vector<8x384xf32>
    %cst_25 = arith.constant 1.000000e-01 : f32
    %36 = vector.broadcast %cst_25 : f32 to vector<8x384xf32>
    %37 = arith.mulf %36, %35 : vector<8x384xf32>
    %38 = arith.maximumf %35, %37 : vector<8x384xf32>
    %39 = arith.truncf %38 : vector<8x384xf32> to vector<8x384xbf16>
    %40 = arith.truncf %0 : vector<8x128xf32> to vector<8x128xbf16>
    %41 = tpu.concatenate %39, %40 in 1 : vector<8x384xbf16>, vector<8x128xbf16> -> vector<8x512xbf16>
    %c0_26 = arith.constant 0 : index
    %c0_27 = arith.constant 0 : index
    %42 = vector.load %arg10[%c0_26, %c0_27] : memref<512x512xbf16, #tpu.memory_space<vmem>>, vector<512x512xbf16>
    %cst_28 = arith.constant dense<0.000000e+00> : vector<8x512xf32>
    %43 = tpu.matmul %41, %42, %cst_28 {dimension_numbers = #tpu.dot_dimension_numbers<[1], [0], [0], [1], [0, 0, 1, 1], [], []>} : vector<8x512xbf16>, vector<512x512xbf16>, vector<8x512xf32> -> vector<8x512xf32>
    %c0_29 = arith.constant 0 : index
    %c0_30 = arith.constant 0 : index
    %44 = vector.load %arg11[%c0_29, %c0_30] : memref<1x512xf32, #tpu.memory_space<vmem>>, vector<1x512xf32>
    %45 = vector.broadcast %44 : vector<1x512xf32> to vector<8x512xf32>
    %46 = arith.addf %43, %45 : vector<8x512xf32>
    %47 = vector.extract_strided_slice %46 {offsets = [0, 0], sizes = [8, 128], strides = [1, 1]} : vector<8x512xf32> to vector<8x128xf32>
    %48 = arith.negf %47 : vector<8x128xf32>
    %49 = math.exp %48 : vector<8x128xf32>
    %cst_31 = arith.constant 1.000000e+00 : f32
    %50 = vector.broadcast %cst_31 : f32 to vector<8x128xf32>
    %51 = arith.addf %50, %49 : vector<8x128xf32>
    %52 = arith.divf %50, %51 : vector<8x128xf32>
    %53 = vector.extract_strided_slice %46 {offsets = [0, 128], sizes = [8, 128], strides = [1, 1]} : vector<8x512xf32> to vector<8x128xf32>
    %54 = arith.negf %53 : vector<8x128xf32>
    %55 = math.exp %54 : vector<8x128xf32>
    %cst_32 = arith.constant 1.000000e+00 : f32
    %56 = vector.broadcast %cst_32 : f32 to vector<8x128xf32>
    %57 = arith.addf %56, %55 : vector<8x128xf32>
    %58 = arith.divf %56, %57 : vector<8x128xf32>
    %59 = vector.extract_strided_slice %46 {offsets = [0, 256], sizes = [8, 128], strides = [1, 1]} : vector<8x512xf32> to vector<8x128xf32>
    %60 = math.tanh %59 : vector<8x128xf32>
    %61 = vector.extract_strided_slice %46 {offsets = [0, 384], sizes = [8, 128], strides = [1, 1]} : vector<8x512xf32> to vector<8x128xf32>
    %62 = arith.negf %61 : vector<8x128xf32>
    %63 = math.exp %62 : vector<8x128xf32>
    %cst_33 = arith.constant 1.000000e+00 : f32
    %64 = vector.broadcast %cst_33 : f32 to vector<8x128xf32>
    %65 = arith.addf %64, %63 : vector<8x128xf32>
    %66 = arith.divf %64, %65 : vector<8x128xf32>
    %67 = arith.mulf %58, %1 : vector<8x128xf32>
    %68 = arith.mulf %52, %60 : vector<8x128xf32>
    %69 = arith.addf %67, %68 : vector<8x128xf32>
    %70 = math.tanh %69 : vector<8x128xf32>
    %71 = arith.mulf %66, %70 : vector<8x128xf32>
    %72 = arith.truncf %71 : vector<8x128xf32> to vector<8x128xbf16>
    %c0_34 = arith.constant 0 : index
    %c0_35 = arith.constant 0 : index
    %73 = vector.load %arg12[%c0_34, %c0_35] : memref<128x128xbf16, #tpu.memory_space<vmem>>, vector<128x128xbf16>
    %cst_36 = arith.constant dense<0.000000e+00> : vector<8x128xf32>
    %74 = tpu.matmul %72, %73, %cst_36 {dimension_numbers = #tpu.dot_dimension_numbers<[1], [0], [0], [1], [0, 0, 1, 1], [], []>} : vector<8x128xbf16>, vector<128x128xbf16>, vector<8x128xf32> -> vector<8x128xf32>
    %c0_37 = arith.constant 0 : index
    %c0_38 = arith.constant 0 : index
    %75 = vector.load %arg13[%c0_37, %c0_38] : memref<1x128xf32, #tpu.memory_space<vmem>>, vector<1x128xf32>
    %76 = vector.broadcast %75 : vector<1x128xf32> to vector<8x128xf32>
    %77 = arith.addf %74, %76 : vector<8x128xf32>
    %c0_39 = arith.constant 0 : index
    %c0_40 = arith.constant 0 : index
    %78 = vector.load %arg14[%c0_39, %c0_40] : memref<8x384xf32, #tpu.memory_space<vmem>>, vector<8x128xf32>
    tpu.vector_store %arg14[%c0_39, %c0_40], %77 {strides = array<i32>} : memref<8x384xf32, #tpu.memory_space<vmem>>, vector<8x128xf32>,
    %c0_41 = arith.constant 0 : index
    %c128_42 = arith.constant 128 : index
    %79 = vector.load %arg14[%c0_41, %c128_42] : memref<8x384xf32, #tpu.memory_space<vmem>>, vector<8x128xf32>
    tpu.vector_store %arg14[%c0_41, %c128_42], %71 {strides = array<i32>} : memref<8x384xf32, #tpu.memory_space<vmem>>, vector<8x128xf32>,
    %c0_43 = arith.constant 0 : index
    %c256_44 = arith.constant 256 : index
    %80 = vector.load %arg14[%c0_43, %c256_44] : memref<8x384xf32, #tpu.memory_space<vmem>>, vector<8x128xf32>
    tpu.vector_store %arg14[%c0_43, %c256_44], %69 {strides = array<i32>} : memref<8x384xf32, #tpu.memory_space<vmem>>, vector<8x128xf32>,
    return
  }
  func.func @transform_0(%arg0: i32) -> (i32, i32) {
    %c0_i32 = arith.constant 0 : i32
    %c0_i32_0 = arith.constant 0 : i32
    return %arg0, %c0_i32 : i32, i32
  }
  func.func @transform_1(%arg0: i32) -> (i32, i32) {
    %c0_i32 = arith.constant 0 : i32
    %c0_i32_0 = arith.constant 0 : i32
    %c0_i32_1 = arith.constant 0 : i32
    return %c0_i32, %c0_i32_0 : i32, i32
  }
  func.func @transform_2(%arg0: i32) -> (i32, i32) {
    %c0_i32 = arith.constant 0 : i32
    %c0_i32_0 = arith.constant 0 : i32
    %c0_i32_1 = arith.constant 0 : i32
    return %c0_i32, %c0_i32_0 : i32, i32
  }
  func.func @transform_3(%arg0: i32) -> (i32, i32) {
    %c0_i32 = arith.constant 0 : i32
    %c0_i32_0 = arith.constant 0 : i32
    %c0_i32_1 = arith.constant 0 : i32
    return %c0_i32, %c0_i32_0 : i32, i32
  }
  func.func @transform_4(%arg0: i32) -> (i32, i32) {
    %c0_i32 = arith.constant 0 : i32
    %c0_i32_0 = arith.constant 0 : i32
    %c0_i32_1 = arith.constant 0 : i32
    return %c0_i32, %c0_i32_0 : i32, i32
  }
  func.func @transform_5(%arg0: i32) -> (i32, i32) {
    %c0_i32 = arith.constant 0 : i32
    %c0_i32_0 = arith.constant 0 : i32
    %c0_i32_1 = arith.constant 0 : i32
    return %c0_i32, %c0_i32_0 : i32, i32
  }
  func.func @transform_6(%arg0: i32) -> (i32, i32) {
    %c0_i32 = arith.constant 0 : i32
    %c0_i32_0 = arith.constant 0 : i32
    %c0_i32_1 = arith.constant 0 : i32
    return %c0_i32, %c0_i32_0 : i32, i32
  }
  func.func @transform_7(%arg0: i32) -> (i32, i32) {
    %c0_i32 = arith.constant 0 : i32
    %c0_i32_0 = arith.constant 0 : i32
    %c0_i32_1 = arith.constant 0 : i32
    return %c0_i32, %c0_i32_0 : i32, i32
  }
  func.func @transform_8(%arg0: i32) -> (i32, i32) {
    %c0_i32 = arith.constant 0 : i32
    %c0_i32_0 = arith.constant 0 : i32
    %c0_i32_1 = arith.constant 0 : i32
    return %c0_i32, %c0_i32_0 : i32, i32
  }
  func.func @transform_9(%arg0: i32) -> (i32, i32) {
    %c0_i32 = arith.constant 0 : i32
    %c0_i32_0 = arith.constant 0 : i32
    %c0_i32_1 = arith.constant 0 : i32
    return %c0_i32, %c0_i32_0 : i32, i32
  }
  func.func @transform_10(%arg0: i32) -> (i32, i32) {
    %c0_i32 = arith.constant 0 : i32
    %c0_i32_0 = arith.constant 0 : i32
    %c0_i32_1 = arith.constant 0 : i32
    return %c0_i32, %c0_i32_0 : i32, i32
  }
  func.func @transform_11(%arg0: i32) -> (i32, i32) {
    %c0_i32 = arith.constant 0 : i32
    %c0_i32_0 = arith.constant 0 : i32
    %c0_i32_1 = arith.constant 0 : i32
    return %c0_i32, %c0_i32_0 : i32, i32
  }
  func.func @transform_12(%arg0: i32) -> (i32, i32) {
    %c0_i32 = arith.constant 0 : i32
    %c0_i32_0 = arith.constant 0 : i32
    %c0_i32_1 = arith.constant 0 : i32
    return %c0_i32, %c0_i32_0 : i32, i32
  }
  func.func @transform_13(%arg0: i32) -> (i32, i32) {
    %c0_i32 = arith.constant 0 : i32
    %c0_i32_0 = arith.constant 0 : i32
    return %arg0, %c0_i32 : i32, i32
  }
}

module attributes {stable_mosaic.version = 11 : i64} {
  func.func @net_kernel(%arg0: i32, %arg1: memref<8x384xf32, #tpu.memory_space<vmem>>, %arg2: memref<128x384xbf16, #tpu.memory_space<vmem>>, %arg3: memref<1x384xf32, #tpu.memory_space<vmem>>, %arg4: memref<384x384xbf16, #tpu.memory_space<vmem>>, %arg5: memref<1x384xf32, #tpu.memory_space<vmem>>, %arg6: memref<384x768xbf16, #tpu.memory_space<vmem>>, %arg7: memref<1x768xf32, #tpu.memory_space<vmem>>, %arg8: memref<768x384xbf16, #tpu.memory_space<vmem>>, %arg9: memref<1x384xf32, #tpu.memory_space<vmem>>, %arg10: memref<512x512xbf16, #tpu.memory_space<vmem>>, %arg11: memref<1x512xf32, #tpu.memory_space<vmem>>, %arg12: memref<128x128xbf16, #tpu.memory_space<vmem>>, %arg13: memref<1x128xf32, #tpu.memory_space<vmem>>, %arg14: memref<8x384xf32, #tpu.memory_space<vmem>>) attributes {dimension_semantics = [#tpu.dimension_semantics<parallel>], iteration_bounds = array<i64: 1>, scalar_prefetch = 0 : i64, scratch_operands = 0 : i64, tpu.core_type = #tpu.core_type<tc>, window_params = [{transform_indices = @transform_0, window_bounds = array<i64: 8, 384>}, {pipeline_mode = #tpu.pipeline_mode<synchronous>, transform_indices = @transform_1, window_bounds = array<i64: 128, 384>}, {pipeline_mode = #tpu.pipeline_mode<synchronous>, transform_indices = @transform_2, window_bounds = array<i64: 1, 384>}, {pipeline_mode = #tpu.pipeline_mode<synchronous>, transform_indices = @transform_3, window_bounds = array<i64: 384, 384>}, {pipeline_mode = #tpu.pipeline_mode<synchronous>, transform_indices = @transform_4, window_bounds = array<i64: 1, 384>}, {pipeline_mode = #tpu.pipeline_mode<synchronous>, transform_indices = @transform_5, window_bounds = array<i64: 384, 768>}, {pipeline_mode = #tpu.pipeline_mode<synchronous>, transform_indices = @transform_6, window_bounds = array<i64: 1, 768>}, {pipeline_mode = #tpu.pipeline_mode<synchronous>, transform_indices = @transform_7, window_bounds = array<i64: 768, 384>}, {pipeline_mode = #tpu.pipeline_mode<synchronous>, transform_indices = @transform_8, window_bounds = array<i64: 1, 384>}, {pipeline_mode = #tpu.pipeline_mode<synchronous>, transform_indices = @transform_9, window_bounds = array<i64: 512, 512>}, {pipeline_mode = #tpu.pipeline_mode<synchronous>, transform_indices = @transform_10, window_bounds = array<i64: 1, 512>}, {pipeline_mode = #tpu.pipeline_mode<synchronous>, transform_indices = @transform_11, window_bounds = array<i64: 128, 128>}, {pipeline_mode = #tpu.pipeline_mode<synchronous>, transform_indices = @transform_12, window_bounds = array<i64: 1, 128>}, {transform_indices = @transform_13, window_bounds = array<i64: 8, 384>}]} {
    %c0 = arith.constant 0 : index
    %c0_0 = arith.constant 0 : index
    %0 = vector.load %arg1[%c0, %c0_0] : memref<8x384xf32, #tpu.memory_space<vmem>>, vector<8x128xf32>
    %c0_1 = arith.constant 0 : index
    %c128 = arith.constant 128 : index
    %1 = vector.load %arg1[%c0_1, %c128] : memref<8x384xf32, #tpu.memory_space<vmem>>, vector<8x128xf32>
    %c0_2 = arith.constant 0 : index
    %c256 = arith.constant 256 : index
    %2 = vector.load %arg1[%c0_2, %c256] : memref<8x384xf32, #tpu.memory_space<vmem>>, vector<8x128xf32>
    %3 = arith.truncf %2 : vector<8x128xf32> to vector<8x128xbf16>
    %c0_3 = arith.constant 0 : index
    %c0_4 = arith.constant 0 : index
    %4 = vector.load %arg2[%c0_3, %c0_4] : memref<128x384xbf16, #tpu.memory_space<vmem>>, vector<128x384xbf16>
    %cst = arith.constant dense<0.000000e+00> : vector<8x384xf32>
    %5 = tpu.matmul %3, %4, %cst {dimension_numbers = #tpu.dot_dimension_numbers<[1], [0], [0], [1], [0, 0, 1, 1], [], []>} : vector<8x128xbf16>, vector<128x384xbf16>, vector<8x384xf32> -> vector<8x384xf32>
    %c0_5 = arith.constant 0 : index
    %c0_6 = arith.constant 0 : index
    %6 = vector.load %arg3[%c0_5, %c0_6] : memref<1x384xf32, #tpu.memory_space<vmem>>, vector<1x384xf32>
    %7 = vector.broadcast %6 : vector<1x384xf32> to vector<8x384xf32>
    %8 = arith.addf %5, %7 : vector<8x384xf32>
    %cst_7 = arith.constant 1.000000e-01 : f32
    %9 = vector.broadcast %cst_7 : f32 to vector<8x384xf32>
    %10 = arith.mulf %9, %8 : vector<8x384xf32>
    %11 = arith.maximumf %8, %10 : vector<8x384xf32>
    %12 = arith.truncf %11 : vector<8x384xf32> to vector<8x384xbf16>
    %c0_8 = arith.constant 0 : index
    %c0_9 = arith.constant 0 : index
    %13 = vector.load %arg4[%c0_8, %c0_9] : memref<384x384xbf16, #tpu.memory_space<vmem>>, vector<384x384xbf16>
    %cst_10 = arith.constant dense<0.000000e+00> : vector<8x384xf32>
    %14 = tpu.matmul %12, %13, %cst_10 {dimension_numbers = #tpu.dot_dimension_numbers<[1], [0], [0], [1], [0, 0, 1, 1], [], []>} : vector<8x384xbf16>, vector<384x384xbf16>, vector<8x384xf32> -> vector<8x384xf32>
    %c0_11 = arith.constant 0 : index
    %c0_12 = arith.constant 0 : index
    %15 = vector.load %arg5[%c0_11, %c0_12] : memref<1x384xf32, #tpu.memory_space<vmem>>, vector<1x384xf32>
    %16 = vector.broadcast %15 : vector<1x384xf32> to vector<8x384xf32>
    %17 = arith.addf %14, %16 : vector<8x384xf32>
    %cst_13 = arith.constant 1.000000e-01 : f32
    %18 = vector.broadcast %cst_13 : f32 to vector<8x384xf32>
    %19 = arith.mulf %18, %17 : vector<8x384xf32>
    %20 = arith.maximumf %17, %19 : vector<8x384xf32>
    %21 = arith.truncf %20 : vector<8x384xf32> to vector<8x384xbf16>
    %c0_14 = arith.constant 0 : index
    %c0_15 = arith.constant 0 : index
    %22 = vector.load %arg6[%c0_14, %c0_15] : memref<384x768xbf16, #tpu.memory_space<vmem>>, vector<384x768xbf16>
    %cst_16 = arith.constant dense<0.000000e+00> : vector<8x768xf32>
    %23 = tpu.matmul %21, %22, %cst_16 {dimension_numbers = #tpu.dot_dimension_numbers<[1], [0], [0], [1], [0, 0, 1, 1], [], []>} : vector<8x384xbf16>, vector<384x768xbf16>, vector<8x768xf32> -> vector<8x768xf32>
    %c0_17 = arith.constant 0 : index
    %c0_18 = arith.constant 0 : index
    %24 = vector.load %arg7[%c0_17, %c0_18] : memref<1x768xf32, #tpu.memory_space<vmem>>, vector<1x768xf32>
    %25 = vector.broadcast %24 : vector<1x768xf32> to vector<8x768xf32>
    %26 = arith.addf %23, %25 : vector<8x768xf32>
    %cst_19 = arith.constant 1.000000e-01 : f32
    %27 = vector.broadcast %cst_19 : f32 to vector<8x768xf32>
    %28 = arith.mulf %27, %26 : vector<8x768xf32>
    %29 = arith.maximumf %26, %28 : vector<8x768xf32>
    %30 = arith.truncf %29 : vector<8x768xf32> to vector<8x768xbf16>
    %c0_20 = arith.constant 0 : index
    %c0_21 = arith.constant 0 : index
    %31 = vector.load %arg8[%c0_20, %c0_21] : memref<768x384xbf16, #tpu.memory_space<vmem>>, vector<768x384xbf16>
    %cst_22 = arith.constant dense<0.000000e+00> : vector<8x384xf32>
    %32 = tpu.matmul %30, %31, %cst_22 {dimension_numbers = #tpu.dot_dimension_numbers<[1], [0], [0], [1], [0, 0, 1, 1], [], []>} : vector<8x768xbf16>, vector<768x384xbf16>, vector<8x384xf32> -> vector<8x384xf32>
    %c0_23 = arith.constant 0 : index
    %c0_24 = arith.constant 0 : index
    %33 = vector.load %arg9[%c0_23, %c0_24] : memref<1x384xf32, #tpu.memory_space<vmem>>, vector<1x384xf32>
    %34 = vector.broadcast %33 : vector<1x384xf32> to vector<8x384xf32>
    %35 = arith.addf %32, %34 : vector<8x384xf32>
    %cst_25 = arith.constant 1.000000e-01 : f32
    %36 = vector.broadcast %cst_25 : f32 to vector<8x384xf32>
    %37 = arith.mulf %36, %35 : vector<8x384xf32>
    %38 = arith.maximumf %35, %37 : vector<8x384xf32>
    %39 = arith.truncf %38 : vector<8x384xf32> to vector<8x384xbf16>
    %40 = arith.truncf %0 : vector<8x128xf32> to vector<8x128xbf16>
    %41 = tpu.concatenate %39, %40 in 1 : vector<8x384xbf16>, vector<8x128xbf16> -> vector<8x512xbf16>
    %c0_26 = arith.constant 0 : index
    %c0_27 = arith.constant 0 : index
    %42 = vector.load %arg10[%c0_26, %c0_27] : memref<512x512xbf16, #tpu.memory_space<vmem>>, vector<512x512xbf16>
    %cst_28 = arith.constant dense<0.000000e+00> : vector<8x512xf32>
    %43 = tpu.matmul %41, %42, %cst_28 {dimension_numbers = #tpu.dot_dimension_numbers<[1], [0], [0], [1], [0, 0, 1, 1], [], []>} : vector<8x512xbf16>, vector<512x512xbf16>, vector<8x512xf32> -> vector<8x512xf32>
    %c0_29 = arith.constant 0 : index
    %c0_30 = arith.constant 0 : index
    %44 = vector.load %arg11[%c0_29, %c0_30] : memref<1x512xf32, #tpu.memory_space<vmem>>, vector<1x512xf32>
    %45 = vector.broadcast %44 : vector<1x512xf32> to vector<8x512xf32>
    %46 = arith.addf %43, %45 : vector<8x512xf32>
    %47 = vector.extract_strided_slice %46 {offsets = [0, 0], sizes = [8, 128], strides = [1, 1]} : vector<8x512xf32> to vector<8x128xf32>
    %48 = arith.negf %47 : vector<8x128xf32>
    %49 = math.exp %48 : vector<8x128xf32>
    %cst_31 = arith.constant 1.000000e+00 : f32
    %50 = vector.broadcast %cst_31 : f32 to vector<8x128xf32>
    %51 = arith.addf %50, %49 : vector<8x128xf32>
    %52 = arith.divf %50, %51 : vector<8x128xf32>
    %53 = vector.extract_strided_slice %46 {offsets = [0, 128], sizes = [8, 128], strides = [1, 1]} : vector<8x512xf32> to vector<8x128xf32>
    %54 = arith.negf %53 : vector<8x128xf32>
    %55 = math.exp %54 : vector<8x128xf32>
    %cst_32 = arith.constant 1.000000e+00 : f32
    %56 = vector.broadcast %cst_32 : f32 to vector<8x128xf32>
    %57 = arith.addf %56, %55 : vector<8x128xf32>
    %58 = arith.divf %56, %57 : vector<8x128xf32>
    %59 = vector.extract_strided_slice %46 {offsets = [0, 256], sizes = [8, 128], strides = [1, 1]} : vector<8x512xf32> to vector<8x128xf32>
    %60 = math.tanh %59 : vector<8x128xf32>
    %61 = vector.extract_strided_slice %46 {offsets = [0, 384], sizes = [8, 128], strides = [1, 1]} : vector<8x512xf32> to vector<8x128xf32>
    %62 = arith.negf %61 : vector<8x128xf32>
    %63 = math.exp %62 : vector<8x128xf32>
    %cst_33 = arith.constant 1.000000e+00 : f32
    %64 = vector.broadcast %cst_33 : f32 to vector<8x128xf32>
    %65 = arith.addf %64, %63 : vector<8x128xf32>
    %66 = arith.divf %64, %65 : vector<8x128xf32>
    %67 = arith.mulf %58, %1 : vector<8x128xf32>
    %68 = arith.mulf %52, %60 : vector<8x128xf32>
    %69 = arith.addf %67, %68 : vector<8x128xf32>
    %70 = math.tanh %69 : vector<8x128xf32>
    %71 = arith.mulf %66, %70 : vector<8x128xf32>
    %72 = arith.truncf %71 : vector<8x128xf32> to vector<8x128xbf16>
    %c0_34 = arith.constant 0 : index
    %c0_35 = arith.constant 0 : index
    %73 = vector.load %arg12[%c0_34, %c0_35] : memref<128x128xbf16, #tpu.memory_space<vmem>>, vector<128x128xbf16>
    %cst_36 = arith.constant dense<0.000000e+00> : vector<8x128xf32>
    %74 = tpu.matmul %72, %73, %cst_36 {dimension_numbers = #tpu.dot_dimension_numbers<[1], [0], [0], [1], [0, 0, 1, 1], [], []>} : vector<8x128xbf16>, vector<128x128xbf16>, vector<8x128xf32> -> vector<8x128xf32>
    %c0_37 = arith.constant 0 : index
    %c0_38 = arith.constant 0 : index
    %75 = vector.load %arg13[%c0_37, %c0_38] : memref<1x128xf32, #tpu.memory_space<vmem>>, vector<1x128xf32>
    %76 = vector.broadcast %75 : vector<1x128xf32> to vector<8x128xf32>
    %77 = arith.addf %74, %76 : vector<8x128xf32>
    %c0_39 = arith.constant 0 : index
    %c0_40 = arith.constant 0 : index
    %78 = vector.load %arg14[%c0_39, %c0_40] : memref<8x384xf32, #tpu.memory_space<vmem>>, vector<8x128xf32>
    tpu.vector_store %arg14[%c0_39, %c0_40], %77 {strides = array<i32>} : memref<8x384xf32, #tpu.memory_space<vmem>>, vector<8x128xf32>,
    %c0_41 = arith.constant 0 : index
    %c128_42 = arith.constant 128 : index
    %79 = vector.load %arg14[%c0_41, %c128_42] : memref<8x384xf32, #tpu.memory_space<vmem>>, vector<8x128xf32>
    tpu.vector_store %arg14[%c0_41, %c128_42], %71 {strides = array<i32>} : memref<8x384xf32, #tpu.memory_space<vmem>>, vector<8x128xf32>,
    %c0_43 = arith.constant 0 : index
    %c256_44 = arith.constant 256 : index
    %80 = vector.load %arg14[%c0_43, %c256_44] : memref<8x384xf32, #tpu.memory_space<vmem>>, vector<8x128xf32>
    tpu.vector_store %arg14[%c0_43, %c256_44], %69 {strides = array<i32>} : memref<8x384xf32, #tpu.memory_space<vmem>>, vector<8x128xf32>,
    return
  }
  func.func @transform_0(%arg0: i32) -> (i32, i32) {
    %c0_i32 = arith.constant 0 : i32
    %c0_i32_0 = arith.constant 0 : i32
    return %arg0, %c0_i32 : i32, i32
  }
  func.func @transform_1(%arg0: i32) -> (i32, i32) {
    %c0_i32 = arith.constant 0 : i32
    %c0_i32_0 = arith.constant 0 : i32
    %c0_i32_1 = arith.constant 0 : i32
    return %c0_i32, %c0_i32_0 : i32, i32
  }
  func.func @transform_2(%arg0: i32) -> (i32, i32) {
    %c0_i32 = arith.constant 0 : i32
    %c0_i32_0 = arith.constant 0 : i32
    %c0_i32_1 = arith.constant 0 : i32
    return %c0_i32, %c0_i32_0 : i32, i32
  }
  func.func @transform_3(%arg0: i32) -> (i32, i32) {
    %c0_i32 = arith.constant 0 : i32
    %c0_i32_0 = arith.constant 0 : i32
    %c0_i32_1 = arith.constant 0 : i32
    return %c0_i32, %c0_i32_0 : i32, i32
  }
  func.func @transform_4(%arg0: i32) -> (i32, i32) {
    %c0_i32 = arith.constant 0 : i32
    %c0_i32_0 = arith.constant 0 : i32
    %c0_i32_1 = arith.constant 0 : i32
    return %c0_i32, %c0_i32_0 : i32, i32
  }
  func.func @transform_5(%arg0: i32) -> (i32, i32) {
    %c0_i32 = arith.constant 0 : i32
    %c0_i32_0 = arith.constant 0 : i32
    %c0_i32_1 = arith.constant 0 : i32
    return %c0_i32, %c0_i32_0 : i32, i32
  }
  func.func @transform_6(%arg0: i32) -> (i32, i32) {
    %c0_i32 = arith.constant 0 : i32
    %c0_i32_0 = arith.constant 0 : i32
    %c0_i32_1 = arith.constant 0 : i32
    return %c0_i32, %c0_i32_0 : i32, i32
  }
  func.func @transform_7(%arg0: i32) -> (i32, i32) {
    %c0_i32 = arith.constant 0 : i32
    %c0_i32_0 = arith.constant 0 : i32
    %c0_i32_1 = arith.constant 0 : i32
    return %c0_i32, %c0_i32_0 : i32, i32
  }
  func.func @transform_8(%arg0: i32) -> (i32, i32) {
    %c0_i32 = arith.constant 0 : i32
    %c0_i32_0 = arith.constant 0 : i32
    %c0_i32_1 = arith.constant 0 : i32
    return %c0_i32, %c0_i32_0 : i32, i32
  }
  func.func @transform_9(%arg0: i32) -> (i32, i32) {
    %c0_i32 = arith.constant 0 : i32
    %c0_i32_0 = arith.constant 0 : i32
    %c0_i32_1 = arith.constant 0 : i32
    return %c0_i32, %c0_i32_0 : i32, i32
  }
  func.func @transform_10(%arg0: i32) -> (i32, i32) {
    %c0_i32 = arith.constant 0 : i32
    %c0_i32_0 = arith.constant 0 : i32
    %c0_i32_1 = arith.constant 0 : i32
    return %c0_i32, %c0_i32_0 : i32, i32
  }
  func.func @transform_11(%arg0: i32) -> (i32, i32) {
    %c0_i32 = arith.constant 0 : i32
    %c0_i32_0 = arith.constant 0 : i32
    %c0_i32_1 = arith.constant 0 : i32
    return %c0_i32, %c0_i32_0 : i32, i32
  }
  func.func @transform_12(%arg0: i32) -> (i32, i32) {
    %c0_i32 = arith.constant 0 : i32
    %c0_i32_0 = arith.constant 0 : i32
    %c0_i32_1 = arith.constant 0 : i32
    return %c0_i32, %c0_i32_0 : i32, i32
  }
  func.func @transform_13(%arg0: i32) -> (i32, i32) {
    %c0_i32 = arith.constant 0 : i32
    %c0_i32_0 = arith.constant 0 : i32
    return %arg0, %c0_i32 : i32, i32
  }
}

</mosaic_0001>

<bundles_post_ra>
// kernel: tpu_custom_call.1
= control target key start
LH: loop header
LB: loop body
LE: loop exit
PB: predicated region body
PF: predicated region fallthrough
CT: control target
= control target key end

     0   :  { %18 = vsyncpa [#allocation3], 0  ;;  %s6652_s0 = inlined_call_operand.hbm [shape: f32[8,384], index: 0, kind: input, shape index: {}]   ;;  %s6653_s1 = inlined_call_operand.hbm [shape: bf16[128,384], index: 1, kind: input, shape index: {}]   ;;  %s6654_s2 = inlined_call_operand.hbm [shape: f32[1,384], index: 2, kind: input, shape index: {}]   ;;  %s6655_s3 = inlined_call_operand.hbm [shape: bf16[384,384], index: 3, kind: input, shape index: {}]   ;;  %s6656_s4 = inlined_call_operand.vmem [shape: f32[1,384], index: 4, kind: input, shape index: {}]   ;;  %s6657_s5 = inlined_call_operand.hbm [shape: bf16[384,768], index: 5, kind: input, shape index: {}]   ;;  %s6658_s6 = inlined_call_operand.vmem [shape: f32[1,768], index: 6, kind: input, shape index: {}]   ;;  %s6659_s7 = inlined_call_operand.hbm [shape: bf16[768,384], index: 7, kind: input, shape index: {}]   ;;  %s6660_s8 = inlined_call_operand.vmem [shape: f32[1,384], index: 8, kind: input, shape index: {}]   ;;  %s6661_s9 = inlined_call_operand.hbm [shape: bf16[512,512], index: 9, kind: input, shape index: {}]   ;;  %s6662_s10 = inlined_call_operand.vmem [shape: f32[1,512], index: 10, kind: input, shape index: {}]   ;;  %s6663_s11 = inlined_call_operand.hbm [shape: bf16[128,128], index: 11, kind: input, shape index: {}]   ;;  %s6664_s12 = inlined_call_operand.vmem [shape: f32[1,128], index: 12, kind: input, shape index: {}]   ;;  %s6665_s13 = inlined_call_operand.hbm [shape: f32[8,384], index: 13, kind: output, shape index: {}]  }
   0x1   :  { %19 = vsyncpa [#allocation6], 0 }
   0x2   :  { %20 = vsyncpa [#allocation9], 0 }
   0x3   :  { %21 = vsyncpa [#allocation12], 0 }
   0x4   :  { %22 = vsyncpa [#allocation15], 0 }
   0x5   :  { %23 = vsyncpa [#allocation4], 0  ;;  %s6319_s25 = smov [#allocation5]   ;;  %s6109_s29 = scalar_lea.hbm %s6653_s1, 3072 }
   0x6   :  { %s39_s26 = sshll.u32 %s6319_s25, 4  ;;  %p6110_p0 = scmp.ne.s32.totalorder %s6653_s1, %s6109_s29  ;;  %s40_s26 = int_to_ptr.vmem [resolvable:$true] %s39_s26 }
   0x7   :  { %p6113_p1 = scmp.lt.u32.totalorder %s6109_s29, %s6653_s1 }
   0x9   :  { %p6115_p2 = pnand %p6113_p1, %p6110_p0 }
   0xb   :  { %6118 = shalt.err (!%p6115_p2)
}
   0xc   :  { %s6119_s17 = scalar_lea.vmem %s40_s26, 3072  ;;  %p6124_p4 = scmp.lt.s32.totalorder %s40_s26, %s40_s26 }
   0xd   :  { %p6120_p3 = scmp.ne.s32.totalorder %s40_s26, %s6119_s17  ;;  %p6125_p5 = scmp.lt.s32.totalorder %s6119_s17, %s6119_s17 }
   0xf   :  { %p6126_p6 = por %p6125_p5, %p6124_p4 }
  0x11   :  { %p6127_p7 = pnand %p6126_p6, %p6120_p3 }
  0x13   :  { %6130 = shalt.err (!%p6127_p7)
}
  0x14   :  { %s6320_s18 = smov 192   ;;  %s6321_s19 = smov 12  }
  0x15   :  { %45 = dma.hbm_to_vmem [thread:$0]  %s6653_s1, 3072, %s40_s26, [#allocation6], %s6320_s18, %s6320_s18, %s6321_s19  }
  0x16   :  { %s6322_s22 = smov [#allocation8]   ;;  %s6323_s24 = smov [#allocation11]  }
  0x17   :  { %s61_s23 = sshll.u32 %s6322_s22, 4  ;;  %s89_s25 = sshll.u32 %s6323_s24, 4  ;;  %s62_s23 = int_to_ptr.vmem [resolvable:$true] %s61_s23  ;;  %s90_s25 = int_to_ptr.vmem [resolvable:$true] %s89_s25 }
  0x18   :  { %s6131_s29 = scalar_lea.hbm %s6655_s3, 9216 }
  0x19   :  { %p6132_p8 = scmp.ne.s32.totalorder %s6655_s3, %s6131_s29  ;;  %p6135_p9 = scmp.lt.u32.totalorder %s6131_s29, %s6655_s3 }
  0x1b   :  { %p6137_p10 = pnand %p6135_p9, %p6132_p8 }
  0x1d   :  { %6140 = shalt.err (!%p6137_p10)
}
  0x1e   :  { %s6141_s1 = scalar_lea.vmem %s62_s23, 9216  ;;  %p6146_p12 = scmp.lt.s32.totalorder %s62_s23, %s62_s23 }
  0x1f   :  { %p6142_p11 = scmp.ne.s32.totalorder %s62_s23, %s6141_s1  ;;  %p6147_p13 = scmp.lt.s32.totalorder %s6141_s1, %s6141_s1 }
  0x21   :  { %p6148_p0 = por %p6147_p13, %p6146_p12 }
  0x23   :  { %p6149_p1 = pnand %p6148_p0, %p6142_p11 }
  0x25   :  { %6152 = shalt.err (!%p6149_p1)
}
  0x26   :  { %67 = dma.hbm_to_vmem [thread:$0]  %s6655_s3, 9216, %s62_s23, [#allocation9], %s6320_s18, %s6320_s18, %s6321_s19  }
  0x27   :  { %s6153_s22 = scalar_lea.hbm %s6659_s7, 18432 }
  0x28   :  { %p6154_p2 = scmp.ne.s32.totalorder %s6659_s7, %s6153_s22  ;;  %p6157_p3 = scmp.lt.u32.totalorder %s6153_s22, %s6659_s7 }
  0x2a   :  { %p6159_p4 = pnand %p6157_p3, %p6154_p2 }
  0x2c   :  { %6162 = shalt.err (!%p6159_p4)
}
  0x2d   :  { %s6163_s30 = scalar_lea.vmem %s90_s25, 18432  ;;  %p6168_p6 = scmp.lt.s32.totalorder %s90_s25, %s90_s25 }
  0x2e   :  { %p6164_p5 = scmp.ne.s32.totalorder %s90_s25, %s6163_s30  ;;  %p6169_p7 = scmp.lt.s32.totalorder %s6163_s30, %s6163_s30 }
  0x30   :  { %p6170_p8 = por %p6169_p7, %p6168_p6 }
  0x32   :  { %p6171_p9 = pnand %p6170_p8, %p6164_p5 }
  0x34   :  { %6174 = shalt.err (!%p6171_p9)
}
  0x35   :  { %95 = dma.hbm_to_vmem [thread:$0]  %s6659_s7, 18432, %s90_s25, [#allocation12], %s6320_s18, %s6320_s18, %s6321_s19  }
  0x36   :  { %s6324_s14 = smov [#allocation2]   ;;  %s6325_s16 = smov [#allocation7]  }
  0x37   :  { %s30_s15 = sshll.u32 %s6324_s14, 4  ;;  %s52_s1 = sshll.u32 %s6325_s16, 4  ;;  %s31_s15 = int_to_ptr.vmem [resolvable:$true] %s30_s15  ;;  %s53_s1 = int_to_ptr.vmem [resolvable:$true] %s52_s1 }
  0x38   :  { %s6175_s20 = scalar_lea.hbm %s6652_s0, 384 }
  0x39   :  { %p6176_p10 = scmp.ne.s32.totalorder %s6652_s0, %s6175_s20  ;;  %p6179_p11 = scmp.lt.u32.totalorder %s6175_s20, %s6652_s0 }
  0x3b   :  { %p6181_p12 = pnand %p6179_p11, %p6176_p10 }
  0x3d   :  { %6184 = shalt.err (!%p6181_p12)
}
  0x3e   :  { %s6185_s7 = scalar_lea.vmem %s31_s15, 384  ;;  %p6190_p0 = scmp.lt.s32.totalorder %s31_s15, %s31_s15 }
  0x3f   :  { %p6186_p13 = scmp.ne.s32.totalorder %s31_s15, %s6185_s7  ;;  %p6191_p1 = scmp.lt.s32.totalorder %s6185_s7, %s6185_s7 }
  0x41   :  { %p6192_p2 = por %p6191_p1, %p6190_p0 }
  0x43   :  { %p6193_p3 = pnand %p6192_p2, %p6186_p13 }
  0x45   :  { %6196 = shalt.err (!%p6193_p3)
}
  0x46   :  { %33 = dma.hbm_to_vmem [thread:$0]  %s6652_s0, 384, %s31_s15, [#allocation3]  }
  0x47   :  { %s6197_s29 = scalar_lea.hbm %s6654_s2, 48 }
  0x48   :  { %p6198_p4 = scmp.ne.s32.totalorder %s6654_s2, %s6197_s29  ;;  %p6201_p5 = scmp.lt.u32.totalorder %s6197_s29, %s6654_s2 }
  0x4a   :  { %p6203_p6 = pnand %p6201_p5, %p6198_p4 }
  0x4c   :  { %6206 = shalt.err (!%p6203_p6)
}
  0x4d   :  { %s6207_s16 = scalar_lea.vmem %s53_s1, 48  ;;  %s6211_s26 = scalar_lea.vmem %s53_s1, 64 }
  0x4e   :  { %p6208_p7 = scmp.ne.s32.totalorder %s53_s1, %s6207_s16  ;;  %p6212_p8 = scmp.lt.s32.totalorder %s53_s1, %s53_s1 }
  0x4f   :  { %p6213_p9 = scmp.lt.s32.totalorder %s6211_s26, %s6207_s16 }
  0x51   :  { %p6214_p10 = por %p6213_p9, %p6212_p8 }
  0x53   :  { %p6215_p11 = pnand %p6214_p10, %p6208_p7 }
  0x55   :  { %6218 = shalt.err (!%p6215_p11)
}
  0x56   :  { %55 = dma.hbm_to_vmem [thread:$0]  %s6654_s2, 48, %s53_s1, [#allocation6]  }
  0x57   :  { %s6326_s17 = smov [#allocation10]   ;;  %s6219_s24 = scalar_lea.hbm %s6657_s5, 18432 }
  0x58   :  { %s75_s20 = sshll.u32 %s6326_s17, 4  ;;  %p6220_p12 = scmp.ne.s32.totalorder %s6657_s5, %s6219_s24  ;;  %s76_s20 = int_to_ptr.vmem [resolvable:$true] %s75_s20 }
  0x59   :  { %p6223_p13 = scmp.lt.u32.totalorder %s6219_s24, %s6657_s5 }
  0x5b   :  { %p6225_p0 = pnand %p6223_p13, %p6220_p12 }
  0x5d   :  { %6228 = shalt.err (!%p6225_p0)
}
  0x5e   :  { %s6229_s25 = scalar_lea.vmem %s76_s20, 18432  ;;  %p6234_p2 = scmp.lt.s32.totalorder %s76_s20, %s76_s20 }
  0x5f   :  { %p6230_p1 = scmp.ne.s32.totalorder %s76_s20, %s6229_s25  ;;  %p6235_p3 = scmp.lt.s32.totalorder %s6229_s25, %s6229_s25 }
  0x61   :  { %p6236_p4 = por %p6235_p3, %p6234_p2 }
  0x63   :  { %p6237_p5 = pnand %p6236_p4, %p6230_p1 }
  0x65   :  { %6240 = shalt.err (!%p6237_p5)
}
  0x66   :  { %s6327_s2 = smov 384   ;;  %s6328_s1 = smov 24  }
  0x67   :  { %81 = dma.hbm_to_vmem [thread:$0]  %s6657_s5, 18432, %s76_s20, [#allocation9], %s6327_s2, %s6327_s2, %s6328_s1  }
  0x68   :  { %s6329_s30 = smov [#allocation13]   ;;  %s6241_s16 = scalar_lea.hbm %s6661_s9, 16384 }
  0x69   :  { %s103_s3 = sshll.u32 %s6329_s30, 4  ;;  %p6242_p6 = scmp.ne.s32.totalorder %s6661_s9, %s6241_s16  ;;  %s104_s3 = int_to_ptr.vmem [resolvable:$true] %s103_s3 }
  0x6a   :  { %p6245_p7 = scmp.lt.u32.totalorder %s6241_s16, %s6661_s9 }
  0x6c   :  { %p6247_p8 = pnand %p6245_p7, %p6242_p6 }
  0x6e   :  { %6250 = shalt.err (!%p6247_p8)
}
  0x6f   :  { %s6251_s21 = scalar_lea.vmem %s104_s3, 16384  ;;  %p6256_p10 = scmp.lt.s32.totalorder %s104_s3, %s104_s3 }
  0x70   :  { %p6252_p9 = scmp.ne.s32.totalorder %s104_s3, %s6251_s21  ;;  %p6257_p11 = scmp.lt.s32.totalorder %s6251_s21, %s6251_s21 }
  0x72   :  { %p6258_p12 = por %p6257_p11, %p6256_p10 }
  0x74   :  { %p6259_p13 = pnand %p6258_p12, %p6252_p9 }
  0x76   :  { %6262 = shalt.err (!%p6259_p13)
}
  0x77   :  { %s6330_s5 = smov 256   ;;  %s6331_s20 = smov 16  }
  0x78   :  { %109 = dma.hbm_to_vmem [thread:$0]  %s6661_s9, 16384, %s104_s3, [#allocation12], %s6330_s5, %s6330_s5, %s6331_s20  }
  0x79   :  { %s6332_s27 = smov [#allocation14]   ;;  %s6263_s25 = scalar_lea.hbm %s6663_s11, 1024 }
  0x7a   :  { %s117_s7 = sshll.u32 %s6332_s27, 4  ;;  %p6264_p0 = scmp.ne.s32.totalorder %s6663_s11, %s6263_s25  ;;  %s118_s7 = int_to_ptr.vmem [resolvable:$true] %s117_s7 }
  0x7b   :  { %p6267_p1 = scmp.lt.u32.totalorder %s6263_s25, %s6663_s11 }
  0x7d   :  { %p6269_p2 = pnand %p6267_p1, %p6264_p0 }
  0x7f   :  { %6272 = shalt.err (!%p6269_p2)
}
  0x80   :  { %s6273_s30 = scalar_lea.vmem %s118_s7, 1024  ;;  %p6278_p4 = scmp.lt.s32.totalorder %s118_s7, %s118_s7 }
  0x81   :  { %p6274_p3 = scmp.ne.s32.totalorder %s118_s7, %s6273_s30  ;;  %p6279_p5 = scmp.lt.s32.totalorder %s6273_s30, %s6273_s30 }
  0x83   :  { %p6280_p6 = por %p6279_p5, %p6278_p4 }
  0x85   :  { %p6281_p7 = pnand %p6280_p6, %p6274_p3 }
  0x87   :  { %6284 = shalt.err (!%p6281_p7)
}
  0x88   :  { %s6333_s9 = smov 64   ;;  %s6334_s3 = smov 4  }
  0x89   :  { %123 = dma.hbm_to_vmem [thread:$0]  %s6663_s11, 1024, %s118_s7, [#allocation15], %s6333_s9, %s6333_s9, %s6334_s3  }
  0x8a   :  { %6307 = dma.done.wait [#allocation3], 384  }
  0x8b   :  { %6308 = vsyncadd [#allocation3], 4294966912 }
  0x8c   :  { %6309 = dma.done.wait [#allocation6], 3120  }
  0x8d   :  { %6310 = vsyncadd [#allocation6], 4294964176 }
  0x8e   :  { %6311 = dma.done.wait [#allocation9], 27648  }
  0x8f   :  { %6312 = vsyncadd [#allocation9], 4294939648 }
  0x90   :  { %6313 = dma.done.wait [#allocation12], 34816  }
  0x91   :  { %6314 = vsyncadd [#allocation12], 4294932480 }
  0x92   :  { %6315 = dma.done.wait [#allocation15], 1024  }
  0x93   :  { %6316 = vsyncadd [#allocation15], 4294966272  ;;  %v6335_v0 = vmov 0.0   ;;  %v6336_v1 = vmov 0   ;;  %vm6337_vm0 = vmmov 0   ;;  %v153_v23 = vld [vmem:[#allocation2 + $0x10] sm:$0xff] }
  0x94   :  { %5231 = vmatprep.subr.bf16.mxu1 %v6335_v0  ;;  %364 = vmatprep.mubr.bf16.mxu0 %v6336_v1  ;;  %v5357_v2 = vld [vmem:[#allocation5 + $0x4] ss:$12 sps:$4 sm:$0xff]   ;;  %v5359_v3 = vld [vmem:[#allocation5] ss:$12 sps:$4 sm:$0xff]   ;;  %v5360_v4 = vld [vmem:[#allocation5 + $0x1c] ss:$12 sps:$4 sm:$0xff]   ;;  %v154_v26 = vpack.c.bf16 %v153_v23, %v153_v23 }
  0x95   :  { %5247 = vmatprep.mubr.msk.bf16.mxu1 %vm6337_vm0, %v6335_v0  ;;  %332 = vmatprep.subr.bf16.mxu0 %v5357_v2  ;;  %v5362_v5 = vld [vmem:[#allocation5 + $0x18] ss:$12 sps:$4 sm:$0xff]   ;;  %v5363_v6 = vld [vmem:[#allocation5 + $0x34] ss:$12 sps:$4 sm:$0xff]   ;;  %v5365_v7 = vld [vmem:[#allocation5 + $0x30] ss:$12 sps:$4 sm:$0xff]  }
  0x96   :  { %333 = vmatpush1.bf16.msra.mxu0 %v5359_v3  ;;  %v5366_v8 = vld [vmem:[#allocation5 + $0x4c] ss:$12 sps:$4 sm:$0xff]   ;;  %v5368_v9 = vld [vmem:[#allocation5 + $0x48] ss:$12 sps:$4 sm:$0xff]   ;;  %v5369_v11 = vld [vmem:[#allocation5 + $0x64] ss:$12 sps:$4 sm:$0xff]  }
  0x97   :  { %334 = vmatprep.subr.bf16.mxu0 %v5360_v4  ;;  %v5381_v10 = vld [vmem:[#allocation5 + $0x8] ss:$12 sps:$4 sm:$0xff]   ;;  %v5382_v12 = vld [vmem:[#allocation5 + $0x20] ss:$12 sps:$4 sm:$0xff]   ;;  %v5383_v15 = vld [vmem:[#allocation5 + $0x38] ss:$12 sps:$4 sm:$0xff]  }
  0x98   :  { %5232 = vmatpush3.bf16.msra.mxu1 %v5381_v10  ;;  %v5371_v13 = vld [vmem:[#allocation5 + $0x60] ss:$12 sps:$4 sm:$0xff]   ;;  %v5372_v14 = vld [vmem:[#allocation5 + $0x7c] ss:$12 sps:$4 sm:$0xff]   ;;  %v5374_v16 = vld [vmem:[#allocation5 + $0x78] ss:$12 sps:$4 sm:$0xff]  }
  0x99   :  { %5233 = vmatprep.subr.bf16.mxu1 %v6335_v0  ;;  %v5375_v17 = vld [vmem:[#allocation5 + $0x94] ss:$12 sps:$4 sm:$0xff]   ;;  %v5384_v18 = vld [vmem:[#allocation5 + $0x50] ss:$12 sps:$4 sm:$0xff]   ;;  %v5378_v20 = vld [vmem:[#allocation5 + $0xac] ss:$12 sps:$4 sm:$0xff]  }
  0x9a   :  { %335 = vmatpush1.bf16.msra.mxu0 %v5362_v5  ;;  %v5377_v19 = vld [vmem:[#allocation5 + $0x90] ss:$12 sps:$4 sm:$0xff]   ;;  %v5385_v21 = vld [vmem:[#allocation5 + $0x68] ss:$12 sps:$4 sm:$0xff]   ;;  %v5386_v25 = vld [vmem:[#allocation5 + $0x80] ss:$12 sps:$4 sm:$0xff]  }
  0x9b   :  { %336 = vmatprep.subr.bf16.mxu0 %v5363_v6  ;;  %v5380_v22 = vld [vmem:[#allocation5 + $0xa8] ss:$12 sps:$4 sm:$0xff]   ;;  %v5389_v27 = vld [vmem:[#allocation8] ss:$12 sps:$4 sm:$0xff]   ;;  %v5394_v28 = vld [vmem:[#allocation8 + $0x1c] ss:$12 sps:$4 sm:$0xff]  }
  0x9c   :  { %5234 = vmatpush3.bf16.msra.mxu1 %v5382_v12  ;;  %v5391_v24 = vld [vmem:[#allocation8 + $0x4] ss:$12 sps:$4 sm:$0xff]   ;;  %v5387_v29 = vld [vmem:[#allocation5 + $0x98] ss:$12 sps:$4 sm:$0xff]   ;;  %v5388_v32 = vld [vmem:[#allocation5 + $0xb0] ss:$12 sps:$4 sm:$0xff]  }
  0x9d   :  { %5235 = vmatprep.subr.bf16.mxu1 %v6335_v0  ;;  %v5392_v30 = vld [vmem:[#allocation8 + $0x18] ss:$12 sps:$4 sm:$0xff]   ;;  %v5397_v31 = vld [vmem:[#allocation8 + $0x34] ss:$12 sps:$4 sm:$0xff]   ;;  %v5395_v34 = vld [vmem:[#allocation8 + $0x30] ss:$12 sps:$4 sm:$0xff]  }
  0x9e   :  { %337 = vmatpush1.bf16.msra.mxu0 %v5365_v7  ;;  %v5416_v33 = vld [vmem:[#allocation8 + $0xc8] ss:$12 sps:$4 sm:$0xff]   ;;  %v5400_v35 = vld [vmem:[#allocation8 + $0x4c] ss:$12 sps:$4 sm:$0xff]   ;;  %v5403_v39 = vld [vmem:[#allocation8 + $0x64] ss:$12 sps:$4 sm:$0xff]  }
  0x9f   :  { %338 = vmatprep.subr.bf16.mxu0 %v5366_v8  ;;  %v5417_v36 = vld [vmem:[#allocation8 + $0x8] ss:$12 sps:$4 sm:$0xff]   ;;  %v5421_v37 = vld [vmem:[#allocation8 + $0xe0] ss:$12 sps:$4 sm:$0xff]   ;;  %v5426_v41 = vld [vmem:[#allocation8 + $0xf8] ss:$12 sps:$4 sm:$0xff]  }
  0xa0   :  { %5236 = vmatpush3.bf16.msra.mxu1 %v5383_v15  ;;  %v5398_v38 = vld [vmem:[#allocation8 + $0x48] ss:$12 sps:$4 sm:$0xff]   ;;  %v5422_v40 = vld [vmem:[#allocation8 + $0x20] ss:$12 sps:$4 sm:$0xff]   ;;  %v5404_v44 = vld [vmem:[#allocation8 + $0x78] ss:$12 sps:$4 sm:$0xff]   ;;  %v189_v15 = vlaneseq }
  0xa1   :  { %5237 = vmatprep.subr.bf16.mxu1 %v6335_v0  ;;  %v5401_v42 = vld [vmem:[#allocation8 + $0x60] ss:$12 sps:$4 sm:$0xff]   ;;  %v5406_v43 = vld [vmem:[#allocation8 + $0x7c] ss:$12 sps:$4 sm:$0xff]   ;;  %v5427_v45 = vld [vmem:[#allocation8 + $0x38] ss:$12 sps:$4 sm:$0xff]  }
  0xa2   :  { %339 = vmatpush1.bf16.msra.mxu0 %v5368_v9  ;;  %v5431_v46 = vld [vmem:[#allocation8 + $0x110] ss:$12 sps:$4 sm:$0xff]   ;;  %v5409_v47 = vld [vmem:[#allocation8 + $0x94] ss:$12 sps:$4 sm:$0xff]   ;;  %v5412_v51 = vld [vmem:[#allocation8 + $0xac] ss:$12 sps:$4 sm:$0xff]  }
  0xa3   :  { %340 = vmatprep.subr.bf16.mxu0 %v5369_v11  ;;  %v5432_v48 = vld [vmem:[#allocation8 + $0x50] ss:$12 sps:$4 sm:$0xff]   ;;  %v5436_v49 = vld [vmem:[#allocation8 + $0x128] ss:$12 sps:$4 sm:$0xff]   ;;  %v5441_v53 = vld [vmem:[#allocation8 + $0x140] ss:$12 sps:$4 sm:$0xff]  }
  0xa4   :  { %5238 = vmatpush3.bf16.msra.mxu1 %v5384_v18  ;;  %v5407_v50 = vld [vmem:[#allocation8 + $0x90] ss:$12 sps:$4 sm:$0xff]   ;;  %v5437_v52 = vld [vmem:[#allocation8 + $0x68] ss:$12 sps:$4 sm:$0xff]   ;;  %v5442_v56 = vld [vmem:[#allocation8 + $0x80] ss:$12 sps:$4 sm:$0xff]  }
  0xa5   :  { %5239 = vmatprep.subr.bf16.mxu1 %v6335_v0  ;;  %v5410_v54 = vld [vmem:[#allocation8 + $0xa8] ss:$12 sps:$4 sm:$0xff]   ;;  %v5415_v55 = vld [vmem:[#allocation8 + $0xc4] ss:$12 sps:$4 sm:$0xff]   ;;  %v5413_v57 = vld [vmem:[#allocation8 + $0xc0] ss:$12 sps:$4 sm:$0xff]  }
  0xa6   :  { %341 = vmatpush1.bf16.msra.mxu0 %v5371_v13  ;;  %v5420_v58 = vld [vmem:[#allocation8 + $0xdc] ss:$12 sps:$4 sm:$0xff]   ;;  %v5418_v59 = vld [vmem:[#allocation8 + $0xd8] ss:$12 sps:$4 sm:$0xff]   ;;  %v5425_v60 = vld [vmem:[#allocation8 + $0xf4] ss:$12 sps:$4 sm:$0xff]  }
  0xa7   :  { %342 = vmatprep.subr.bf16.mxu0 %v5372_v14  ;;  %v5423_v61 = vld [vmem:[#allocation8 + $0xf0] ss:$12 sps:$4 sm:$0xff]   ;;  %v5430_v62 = vld [vmem:[#allocation8 + $0x10c] ss:$12 sps:$4 sm:$0xff]   ;;  %v5428_v63 = vld [vmem:[#allocation8 + $0x108] ss:$12 sps:$4 sm:$0xff]  }
  0xa8   :  { %5240 = vmatpush3.bf16.msra.mxu1 %v5385_v21  ;;  %v5435_v2 = vld [vmem:[#allocation8 + $0x124] ss:$12 sps:$4 sm:$0xff]   ;;  %v5433_v3 = vld [vmem:[#allocation8 + $0x120] ss:$12 sps:$4 sm:$0xff]   ;;  %v5440_v4 = vld [vmem:[#allocation8 + $0x13c] ss:$12 sps:$4 sm:$0xff]  }
  0xa9   :  { %5241 = vmatprep.subr.bf16.mxu1 %v6335_v0  ;;  %v5438_v5 = vld [vmem:[#allocation8 + $0x138] ss:$12 sps:$4 sm:$0xff]   ;;  %v5445_v6 = vld [vmem:[#allocation8 + $0x154] ss:$12 sps:$4 sm:$0xff]   ;;  %v5443_v8 = vld [vmem:[#allocation8 + $0x150] ss:$12 sps:$4 sm:$0xff]  }
  0xaa   :  { %343 = vmatpush1.bf16.msra.mxu0 %v5374_v16  ;;  %v5446_v7 = vld [vmem:[#allocation8 + $0x158] ss:$12 sps:$4 sm:$0xff]   ;;  %v5451_v11 = vld [vmem:[#allocation8 + $0x170] ss:$12 sps:$4 sm:$0xff]   ;;  %v5448_v12 = vld [vmem:[#allocation8 + $0x168] ss:$12 sps:$4 sm:$0xff]  }
  0xab   :  { %344 = vmatprep.subr.bf16.mxu0 %v5375_v17  ;;  %v5447_v9 = vld [vmem:[#allocation8 + $0x98] ss:$12 sps:$4 sm:$0xff]   ;;  %v5452_v13 = vld [vmem:[#allocation8 + $0xb0] ss:$12 sps:$4 sm:$0xff]   ;;  %v6526_v16 = vshrl.u32 %v189_v15, 7  ;;  %s6338_s21 = smov [#allocation16]  }
  0xac   :  { %5242 = vmatpush3.bf16.msra.mxu1 %v5386_v25  ;;  %v5450_v10 = vld [vmem:[#allocation8 + $0x16c] ss:$12 sps:$4 sm:$0xff]   ;;  %v5455_v14 = vld [vmem:[#allocation8 + $0x184] ss:$12 sps:$4 sm:$0xff]   ;;  %v6528_v17 = vld [vmem:[#allocation7] sm:$0x7] }
  0xad   :  { %5243 = vmatprep.subr.bf16.mxu1 %v6335_v0  ;;  %v6531_v18 = vsub.s32 0, %v6526_v16  ;;  %v5497_v15 = vld [vmem:[#allocation10 + $0x60] ss:$24 sps:$4 sm:$0xff]   ;;  %s4579_s5 = sshll.u32 %s6338_s21, 4  ;;  %s4580_s5 = int_to_ptr.vmem [resolvable:$true] %s4579_s5 }
  0xae   :  { %345 = vmatpush1.bf16.msra.mxu0 %v5377_v19  ;;  %v6534_v19 = vsub.s32 1, %v6526_v16  ;;  %s6285_s20 = scalar_lea.vmem %s4580_s5, 384  ;;  %p6290_p9 = scmp.lt.s32.totalorder %s4580_s5, %s4580_s5 }
  0xaf   :  { %346 = vmatprep.subr.bf16.mxu0 %v5378_v20  ;;  %v192_v20 = vrot.slane %v6528_v17, %v6531_v18  ;;  %p6286_p8 = scmp.ne.s32.totalorder %s4580_s5, %s6285_s20  ;;  %p6291_p10 = scmp.lt.s32.totalorder %s6285_s20, %s6285_s20 }
  0xb0   :  { %5244 = vmatpush3.bf16.msra.mxu1 %v5387_v29  ;;  %v196_v21 = vrot.slane %v6528_v17, %v6534_v19 }
  0xb1   :  { %5245 = vmatprep.subr.bf16.mxu1 %v6335_v0  ;;  %p6292_p11 = por %p6291_p10, %p6290_p9 }
  0xb2   :  { %347 = vmatpush1.bf16.msra.mxu0 %v5380_v22 }
  0xb3   :  { %919 = vmatprep.subr.bf16.mxu0 %v5391_v24  ;;  %p6293_p12 = pnand %p6292_p11, %p6286_p8 }
  0xb4   :  { %5246 = vmatpush3.bf16.msra.mxu1 %v5388_v32 }
  0xb5   :  { %365 = vmatmul.mubr.bf16.vlgmr.msra.gmra.mrb[0].mxu0 %v154_v26  ;;  %5125 = vmatprep.subr.bf16.mxu1 %v5416_v33  ;;  %v5453_v33 = vld [vmem:[#allocation8 + $0x180] ss:$12 sps:$4 sm:$0xff]  }
  0xb6   :  { %920 = vmatpush1.bf16.msra.mxu0 %v5389_v27 }
  0xb7   :  { %921 = vmatprep.subr.bf16.mxu0 %v5394_v28  ;;  %5248 = vmatmul.mubr.bf16.vlgmr.msra.gmra.mrb[0].mxu1 %v154_v26 }
  0xb8   :  { %5126 = vmatpush3.bf16.msra.mxu1 %v5417_v36  ;;  %v5459_v36 = vld [vmem:[#allocation8 + $0x19c] ss:$12 sps:$4 sm:$0xff]  }
  0xb9   :  { %5127 = vmatprep.subr.bf16.mxu1 %v5421_v37 }
  0xba   :  { %922 = vmatpush1.bf16.msra.mxu0 %v5392_v30 }
  0xbb   :  { %923 = vmatprep.subr.bf16.mxu0 %v5397_v31 }
  0xbc   :  { %5128 = vmatpush3.bf16.msra.mxu1 %v5422_v40  ;;  %v5460_v40 = vld [vmem:[#allocation8 + $0x1a0] ss:$12 sps:$4 sm:$0xff]  }
  0xbd   :  { %5129 = vmatprep.subr.bf16.mxu1 %v5426_v41 }
  0xbe   :  { %924 = vmatpush1.bf16.msra.mxu0 %v5395_v34  ;;  %v5456_v34 = vld [vmem:[#allocation8 + $0x188] ss:$12 sps:$4 sm:$0xff]  }
  0xbf   :  { %925 = vmatprep.subr.bf16.mxu0 %v5400_v35 }
  0xc0   :  { %5130 = vmatpush3.bf16.msra.mxu1 %v5427_v45  ;;  %v5464_v45 = vld [vmem:[#allocation8 + $0x1b8] ss:$12 sps:$4 sm:$0xff]  }
  0xc1   :  { %5131 = vmatprep.subr.bf16.mxu1 %v5431_v46  ;;  %v5467_v46 = vld [vmem:[#allocation8 + $0x1cc] ss:$12 sps:$4 sm:$0xff]  }
  0xc2   :  { %926 = vmatpush1.bf16.msra.mxu0 %v5398_v38 }
  0xc3   :  { %927 = vmatprep.subr.bf16.mxu0 %v5403_v39  ;;  %v5457_v39 = vld [vmem:[#allocation8 + $0x198] ss:$12 sps:$4 sm:$0xff]  }
  0xc4   :  { %5132 = vmatpush3.bf16.msra.mxu1 %v5432_v48  ;;  %v5468_v48 = vld [vmem:[#allocation8 + $0x1d0] ss:$12 sps:$4 sm:$0xff]  }
  0xc5   :  { %5133 = vmatprep.subr.bf16.mxu1 %v5436_v49  ;;  %v5471_v49 = vld [vmem:[#allocation8 + $0x1e4] ss:$12 sps:$4 sm:$0xff]  }
  0xc6   :  { %928 = vmatpush1.bf16.msra.mxu0 %v5401_v42  ;;  %v5463_v42 = vld [vmem:[#allocation8 + $0x1b4] ss:$12 sps:$4 sm:$0xff]  }
  0xc7   :  { %929 = vmatprep.subr.bf16.mxu0 %v5406_v43 }
  0xc8   :  { %5134 = vmatpush3.bf16.msra.mxu1 %v5437_v52  ;;  %v5472_v52 = vld [vmem:[#allocation8 + $0x1e8] ss:$12 sps:$4 sm:$0xff]  }
  0xc9   :  { %5135 = vmatprep.subr.bf16.mxu1 %v5441_v53 }
  0xca   :  { %930 = vmatpush1.bf16.msra.mxu0 %v5404_v44  ;;  %v5461_v44 = vld [vmem:[#allocation8 + $0x1b0] ss:$12 sps:$4 sm:$0xff]  }
  0xcb   :  { %931 = vmatprep.subr.bf16.mxu0 %v5409_v47  ;;  %v5465_v47 = vld [vmem:[#allocation8 + $0x1c8] ss:$12 sps:$4 sm:$0xff]  }
  0xcc   :  { %5136 = vmatpush3.bf16.msra.mxu1 %v5442_v56  ;;  %v5476_v56 = vld [vmem:[#allocation8 + $0x200] ss:$12 sps:$4 sm:$0xff]  }
  0xcd   :  { %5137 = vmatprep.subr.bf16.mxu1 %v5446_v7  ;;  %v5488_v7 = vld [vmem:[#allocation10 + $0x8] ss:$24 sps:$4 sm:$0xff]  }
  0xce   :  { %932 = vmatpush1.bf16.msra.mxu0 %v5407_v50  ;;  %v6547_v50 = vsub.s32 2, %v6526_v16 }
  0xcf   :  { %933 = vmatprep.subr.bf16.mxu0 %v5412_v51  ;;  %v5469_v51 = vld [vmem:[#allocation8 + $0x1e0] ss:$12 sps:$4 sm:$0xff]  }
  0xd0   :  { %5138 = vmatpush3.bf16.msra.mxu1 %v5447_v9  ;;  %v200_v53 = vrot.slane %v6528_v17, %v6547_v50  ;;  %v5493_v9 = vld [vmem:[#allocation10 + $0x34] ss:$24 sps:$4 sm:$0xff]   ;;  %v5500_v17 = vld [vmem:[#allocation10 + $0x68] ss:$24 sps:$4 sm:$0xff]  }
  0xd1   :  { %5139 = vmatprep.subr.bf16.mxu1 %v5451_v11  ;;  %v5491_v11 = vld [vmem:[#allocation10 + $0x30] ss:$24 sps:$4 sm:$0xff]  }
  0xd2   :  { %934 = vmatpush1.bf16.msra.mxu0 %v5410_v54  ;;  %v5475_v54 = vld [vmem:[#allocation8 + $0x1fc] ss:$12 sps:$4 sm:$0xff]  }
  0xd3   :  { %935 = vmatprep.subr.bf16.mxu0 %v5415_v55  ;;  %v5473_v55 = vld [vmem:[#allocation8 + $0x1f8] ss:$12 sps:$4 sm:$0xff]  }
  0xd4   :  { %5140 = vmatpush3.bf16.msra.mxu1 %v5452_v13  ;;  %v5499_v13 = vld [vmem:[#allocation10 + $0x64] ss:$24 sps:$4 sm:$0xff]  }
  0xd5   :  { %5251 = vmatprep.subr.bf16.mxu1 %v6335_v0 }
  0xd6   :  { %936 = vmatpush1.bf16.msra.mxu0 %v5413_v57 }
  0xd7   :  { %937 = vmatprep.subr.bf16.mxu0 %v5420_v58  ;;  %v5479_v58 = vld [vmem:[#allocation8 + $0x214] ss:$12 sps:$4 sm:$0xff]  }
  0xda   :  { %938 = vmatpush1.bf16.msra.mxu0 %v5418_v59  ;;  %v5477_v59 = vld [vmem:[#allocation8 + $0x210] ss:$12 sps:$4 sm:$0xff]  }
  0xdb   :  { %939 = vmatprep.subr.bf16.mxu0 %v5425_v60  ;;  %v5480_v60 = vld [vmem:[#allocation8 + $0x218] ss:$12 sps:$4 sm:$0xff]  }
  0xde   :  { %940 = vmatpush1.bf16.msra.mxu0 %v5423_v61 }
  0xdf   :  { %941 = vmatprep.subr.bf16.mxu0 %v5430_v62  ;;  %v5483_v62 = vld [vmem:[#allocation8 + $0x22c] ss:$12 sps:$4 sm:$0xff]  }
  0xe2   :  { %942 = vmatpush1.bf16.msra.mxu0 %v5428_v63  ;;  %v5481_v63 = vld [vmem:[#allocation8 + $0x228] ss:$12 sps:$4 sm:$0xff]  }
  0xe3   :  { %943 = vmatprep.subr.bf16.mxu0 %v5435_v2  ;;  %v5484_v2 = vld [vmem:[#allocation8 + $0x230] ss:$12 sps:$4 sm:$0xff]  }
  0xe6   :  { %944 = vmatpush1.bf16.msra.mxu0 %v5433_v3 }
  0xe7   :  { %945 = vmatprep.subr.bf16.mxu0 %v5440_v4  ;;  %v5487_v4 = vld [vmem:[#allocation10 + $0x4] ss:$24 sps:$4 sm:$0xff]  }
  0xea   :  { %946 = vmatpush1.bf16.msra.mxu0 %v5438_v5  ;;  %v5490_v5 = vld [vmem:[#allocation10 + $0xc] ss:$24 sps:$4 sm:$0xff]  }
  0xeb   :  { %947 = vmatprep.subr.bf16.mxu0 %v5445_v6  ;;  %v5485_v6 = vld [vmem:[#allocation10] ss:$24 sps:$4 sm:$0xff]  }
  0xee   :  { %948 = vmatpush1.bf16.msra.mxu0 %v5443_v8 }
  0xef   :  { %949 = vmatprep.subr.bf16.mxu0 %v5450_v10  ;;  %v5496_v10 = vld [vmem:[#allocation10 + $0x3c] ss:$24 sps:$4 sm:$0xff]  }
  0xf2   :  { %950 = vmatpush1.bf16.msra.mxu0 %v5448_v12  ;;  %v5494_v12 = vld [vmem:[#allocation10 + $0x38] ss:$24 sps:$4 sm:$0xff]  }
  0xf3   :  { %960 = vmatprep.subr.bf16.mxu0 %v5455_v14  ;;  %v5502_v14 = vld [vmem:[#allocation10 + $0x6c] ss:$24 sps:$4 sm:$0xff]  }
 0x188   :  { %v366_v22 = vpop.f32.mrb[0].mxu0 }
 0x189   :  { %v367_v23 = vadd.f32 %v366_v22, %v192_v20  ;;  %v368_v24 = vpop.f32.mrb[1].mxu0  ;;  %v5505_v20 = vld [vmem:[#allocation10 + $0x94] ss:$24 sps:$4 sm:$0xff]   ;;  %v5503_v22 = vld [vmem:[#allocation10 + $0x90] ss:$24 sps:$4 sm:$0xff]  }
 0x18a   :  { %v369_v25 = vadd.f32 %v368_v24, %v196_v21  ;;  %v370_v26 = vpop.f32.mrb[2].mxu0  ;;  %v407_v37 = vpop.f32.mrb[0].mxu1  ;;  %v5508_v21 = vld [vmem:[#allocation10 + $0x9c] ss:$24 sps:$4 sm:$0xff]  }
 0x18b   :  { %v413_v27 = vmul.f32 0.1, %v367_v23  ;;  %v371_v28 = vpop.f32.mrb[3].mxu0  ;;  %v5249_v38 = vpop.f32.mrb[1].mxu1  ;;  %v408_v57 = vadd.f32 %v407_v37, %v200_v53  ;;  %v5511_v24 = vld [vmem:[#allocation10 + $0xc4] ss:$24 sps:$4 sm:$0xff]  }
 0x18c   :  { %v414_v29 = vmul.f32 0.1, %v369_v25  ;;  %v410_v41 = vpop.f32.mrb[2].mxu1  ;;  %v5509_v26 = vld [vmem:[#allocation10 + $0xc0] ss:$24 sps:$4 sm:$0xff]  }
 0x18d   :  { %v416_v30 = vmax.f32 %v367_v23, %v413_v27  ;;  %v5250_v43 = vpop.f32.mrb[3].mxu1  ;;  %v415_v61 = vmul.f32 0.1, %v408_v57  ;;  %v5506_v23 = vld [vmem:[#allocation10 + $0x98] ss:$24 sps:$4 sm:$0xff]  }
 0x18e   :  { %v417_v31 = vmax.f32 %v369_v25, %v414_v29  ;;  %v5514_v25 = vld [vmem:[#allocation10 + $0xcc] ss:$24 sps:$4 sm:$0xff]   ;;  %v5512_v27 = vld [vmem:[#allocation10 + $0xc8] ss:$24 sps:$4 sm:$0xff]   ;;  %v5520_v29 = vld [vmem:[#allocation10 + $0xfc] ss:$24 sps:$4 sm:$0xff]  }
 0x18f   :  { %v419_v35 = vpack.c.bf16 %v416_v30, %v416_v30  ;;  %v418_v3 = vmax.f32 %v408_v57, %v415_v61  ;;  %v5517_v28 = vld [vmem:[#allocation10 + $0xf4] ss:$24 sps:$4 sm:$0xff]   ;;  %v5515_v30 = vld [vmem:[#allocation10 + $0xf0] ss:$24 sps:$4 sm:$0xff]   ;;  %v5559_v57 = vld [vmem:[#allocation10 + $0x244] ss:$24 sps:$4 sm:$0xff]  }
 0x190   :  { %v420_v32 = vpack.c.bf16 %v417_v31, %v417_v31  ;;  %v5518_v31 = vld [vmem:[#allocation10 + $0xf8] ss:$24 sps:$4 sm:$0xff]   ;;  %v5529_v37 = vld [vmem:[#allocation10 + $0x154] ss:$24 sps:$4 sm:$0xff]   ;;  %v5536_v43 = vld [vmem:[#allocation10 + $0x188] ss:$24 sps:$4 sm:$0xff]  }
 0x191   :  { %v421_v8 = vpack.c.bf16 %v418_v3, %v418_v3  ;;  %v5530_v38 = vld [vmem:[#allocation10 + $0x158] ss:$24 sps:$4 sm:$0xff]   ;;  %v5538_v41 = vld [vmem:[#allocation10 + $0x18c] ss:$24 sps:$4 sm:$0xff]  }
 0x192   :  { %951 = vmatprep.mubr.bf16.mxu0 %v420_v32  ;;  %1033 = vmatprep.mubr.bf16.mxu1 %v420_v32  ;;  %v5523_v32 = vld [vmem:[#allocation10 + $0x124] ss:$24 sps:$4 sm:$0xff]   ;;  %v5553_v53 = vld [vmem:[#allocation10 + $0x214] ss:$24 sps:$4 sm:$0xff]  }
 0x193   :  { %952 = vmatmul.mubr.bf16.vlgmr.msra.gmra.mrb[4].mxu0 %v419_v35  ;;  %1034 = vmatmul.mubr.bf16.vlgmr.msra.gmra.mrb[4].mxu1 %v419_v35  ;;  %v5524_v35 = vld [vmem:[#allocation10 + $0x128] ss:$24 sps:$4 sm:$0xff]   ;;  %v5565_v61 = vld [vmem:[#allocation10 + $0x274] ss:$24 sps:$4 sm:$0xff]   ;;  %v5571_v3 = vld [vmem:[#allocation10 + $0x2a4] ss:$24 sps:$4 sm:$0xff]  }
 0x194   :  { %961 = vmatpush1.bf16.msra.mxu0 %v5453_v33  ;;  %5252 = vmatpush3.bf16.msra.mxu1 %v5456_v34  ;;  %v5526_v33 = vld [vmem:[#allocation10 + $0x12c] ss:$24 sps:$4 sm:$0xff]   ;;  %v5521_v34 = vld [vmem:[#allocation10 + $0x120] ss:$24 sps:$4 sm:$0xff]  }
 0x195   :  { %962 = vmatprep.subr.bf16.mxu0 %v5459_v36  ;;  %5253 = vmatprep.subr.bf16.mxu1 %v6335_v0  ;;  %v5527_v36 = vld [vmem:[#allocation10 + $0x150] ss:$24 sps:$4 sm:$0xff]  }
 0x196   :  { %992 = vmatprep.mubr.bf16.mxu0 %v6336_v1  ;;  %5267 = vmatprep.mubr.msk.bf16.mxu1 %vm6337_vm0, %v6335_v0 }
 0x198   :  { %963 = vmatpush1.bf16.msra.mxu0 %v5457_v39  ;;  %5254 = vmatpush3.bf16.msra.mxu1 %v5460_v40  ;;  %v5532_v39 = vld [vmem:[#allocation10 + $0x15c] ss:$24 sps:$4 sm:$0xff]  }
 0x199   :  { %964 = vmatprep.subr.bf16.mxu0 %v5463_v42  ;;  %5255 = vmatprep.subr.bf16.mxu1 %v6335_v0  ;;  %v5535_v40 = vld [vmem:[#allocation10 + $0x184] ss:$24 sps:$4 sm:$0xff]   ;;  %v5533_v42 = vld [vmem:[#allocation10 + $0x180] ss:$24 sps:$4 sm:$0xff]  }
 0x19c   :  { %965 = vmatpush1.bf16.msra.mxu0 %v5461_v44  ;;  %5256 = vmatpush3.bf16.msra.mxu1 %v5464_v45  ;;  %v5541_v44 = vld [vmem:[#allocation10 + $0x1b4] ss:$24 sps:$4 sm:$0xff]  }
 0x19d   :  { %966 = vmatprep.subr.bf16.mxu0 %v5467_v46  ;;  %5257 = vmatprep.subr.bf16.mxu1 %v6335_v0  ;;  %v5544_v45 = vld [vmem:[#allocation10 + $0x1bc] ss:$24 sps:$4 sm:$0xff]   ;;  %v5539_v46 = vld [vmem:[#allocation10 + $0x1b0] ss:$24 sps:$4 sm:$0xff]  }
 0x1a0   :  { %967 = vmatpush1.bf16.msra.mxu0 %v5465_v47  ;;  %5258 = vmatpush3.bf16.msra.mxu1 %v5468_v48  ;;  %v5542_v47 = vld [vmem:[#allocation10 + $0x1b8] ss:$24 sps:$4 sm:$0xff]   ;;  %v5547_v48 = vld [vmem:[#allocation10 + $0x1e4] ss:$24 sps:$4 sm:$0xff]  }
 0x1a1   :  { %968 = vmatprep.subr.bf16.mxu0 %v5471_v49  ;;  %5259 = vmatprep.subr.bf16.mxu1 %v6335_v0  ;;  %v5550_v49 = vld [vmem:[#allocation10 + $0x1ec] ss:$24 sps:$4 sm:$0xff]  }
 0x1a4   :  { %969 = vmatpush1.bf16.msra.mxu0 %v5469_v51  ;;  %5260 = vmatpush3.bf16.msra.mxu1 %v5472_v52  ;;  %v5545_v51 = vld [vmem:[#allocation10 + $0x1e0] ss:$24 sps:$4 sm:$0xff]  }
 0x1a5   :  { %970 = vmatprep.subr.bf16.mxu0 %v5475_v54  ;;  %5261 = vmatprep.subr.bf16.mxu1 %v6335_v0  ;;  %v5548_v52 = vld [vmem:[#allocation10 + $0x1e8] ss:$24 sps:$4 sm:$0xff]   ;;  %v5556_v54 = vld [vmem:[#allocation10 + $0x21c] ss:$24 sps:$4 sm:$0xff]  }
 0x1a8   :  { %971 = vmatpush1.bf16.msra.mxu0 %v5473_v55  ;;  %5262 = vmatpush3.bf16.msra.mxu1 %v5476_v56  ;;  %v5551_v55 = vld [vmem:[#allocation10 + $0x210] ss:$24 sps:$4 sm:$0xff]  }
 0x1a9   :  { %972 = vmatprep.subr.bf16.mxu0 %v5479_v58  ;;  %5263 = vmatprep.subr.bf16.mxu1 %v6335_v0  ;;  %v5554_v56 = vld [vmem:[#allocation10 + $0x218] ss:$24 sps:$4 sm:$0xff]   ;;  %v5562_v58 = vld [vmem:[#allocation10 + $0x24c] ss:$24 sps:$4 sm:$0xff]  }
 0x1ac   :  { %973 = vmatpush1.bf16.msra.mxu0 %v5477_v59  ;;  %5264 = vmatpush3.bf16.msra.mxu1 %v5480_v60  ;;  %v5557_v59 = vld [vmem:[#allocation10 + $0x240] ss:$24 sps:$4 sm:$0xff]  }
 0x1ad   :  { %974 = vmatprep.subr.bf16.mxu0 %v5483_v62  ;;  %5265 = vmatprep.subr.bf16.mxu1 %v6335_v0  ;;  %v5560_v60 = vld [vmem:[#allocation10 + $0x248] ss:$24 sps:$4 sm:$0xff]   ;;  %v5568_v62 = vld [vmem:[#allocation10 + $0x27c] ss:$24 sps:$4 sm:$0xff]  }
 0x1b0   :  { %975 = vmatpush1.bf16.msra.mxu0 %v5481_v63  ;;  %5266 = vmatpush3.bf16.msra.mxu1 %v5484_v2  ;;  %v5563_v63 = vld [vmem:[#allocation10 + $0x270] ss:$24 sps:$4 sm:$0xff]  }
 0x1b1   :  { %1986 = vmatprep.subr.bf16.mxu1 %v5487_v4  ;;  %2068 = vmatprep.subr.bf16.mxu0 %v5490_v5  ;;  %v5566_v2 = vld [vmem:[#allocation10 + $0x278] ss:$24 sps:$4 sm:$0xff]   ;;  %v5574_v4 = vld [vmem:[#allocation10 + $0x2ac] ss:$24 sps:$4 sm:$0xff]  }
 0x1b2   :  { %v5569_v5 = vld [vmem:[#allocation10 + $0x2a0] ss:$24 sps:$4 sm:$0xff]  }
 0x1b3   :  { %993 = vmatmul.mubr.bf16.vlgmr.msra.gmra.mrb[4].mxu0 %v421_v8  ;;  %5268 = vmatmul.mubr.bf16.vlgmr.msra.gmra.mrb[8].mxu1 %v421_v8  ;;  %v5580_v8 = vld [vmem:[#allocation10 + $0x2dc] ss:$24 sps:$4 sm:$0xff]  }
 0x1b4   :  { %1987 = vmatpush1.bf16.msra.mxu1 %v5485_v6  ;;  %2069 = vmatpush1.bf16.msra.mxu0 %v5488_v7  ;;  %v5572_v6 = vld [vmem:[#allocation10 + $0x2a8] ss:$24 sps:$4 sm:$0xff]   ;;  %v5577_v7 = vld [vmem:[#allocation10 + $0x2d4] ss:$24 sps:$4 sm:$0xff]  }
 0x1b5   :  { %1988 = vmatprep.subr.bf16.mxu1 %v5493_v9  ;;  %2070 = vmatprep.subr.bf16.mxu0 %v5496_v10  ;;  %v5575_v9 = vld [vmem:[#allocation10 + $0x2d0] ss:$24 sps:$4 sm:$0xff]  }
 0x1b6   :  { %v5578_v10 = vld [vmem:[#allocation10 + $0x2d8] ss:$24 sps:$4 sm:$0xff]  }
 0x1b8   :  { %1989 = vmatpush1.bf16.msra.mxu1 %v5491_v11  ;;  %2071 = vmatpush1.bf16.msra.mxu0 %v5494_v12  ;;  %v5583_v11 = vld [vmem:[#allocation10 + $0x304] ss:$24 sps:$4 sm:$0xff]  }
 0x1b9   :  { %1990 = vmatprep.subr.bf16.mxu1 %v5499_v13  ;;  %2072 = vmatprep.subr.bf16.mxu0 %v5502_v14  ;;  %v5586_v12 = vld [vmem:[#allocation10 + $0x30c] ss:$24 sps:$4 sm:$0xff]  }
 0x1bc   :  { %1991 = vmatpush1.bf16.msra.mxu1 %v5497_v15  ;;  %2073 = vmatpush1.bf16.msra.mxu0 %v5500_v17 }
 0x1bd   :  { %1992 = vmatprep.subr.bf16.mxu1 %v5505_v20  ;;  %2074 = vmatprep.subr.bf16.mxu0 %v5508_v21  ;;  %v518_v21 = vld [vmem:[%s6656_s4] sm:$0x7] }
 0x1c0   :  { %1993 = vmatpush1.bf16.msra.mxu1 %v5503_v22  ;;  %2075 = vmatpush1.bf16.msra.mxu0 %v5506_v23  ;;  %v531_v22 = vrot.slane %v518_v21, %v6547_v50  ;;  %v523_v23 = vrot.slane %v518_v21, %v6531_v18 }
 0x1c1   :  { %1994 = vmatprep.subr.bf16.mxu1 %v5511_v24  ;;  %2076 = vmatprep.subr.bf16.mxu0 %v5514_v25  ;;  %v527_v24 = vrot.slane %v518_v21, %v6534_v19  ;;  %v5634_v21 = vld [vmem:[#allocation10 + $0x44] ss:$24 sps:$4 sm:$0xff]  }
 0x1c4   :  { %1995 = vmatpush1.bf16.msra.mxu1 %v5509_v26  ;;  %2077 = vmatpush1.bf16.msra.mxu0 %v5512_v27 }
 0x1c5   :  { %1996 = vmatprep.subr.bf16.mxu1 %v5517_v28  ;;  %2078 = vmatprep.subr.bf16.mxu0 %v5520_v29 }
 0x1c8   :  { %1997 = vmatpush1.bf16.msra.mxu1 %v5515_v30  ;;  %2079 = vmatpush1.bf16.msra.mxu0 %v5518_v31 }
 0x1c9   :  { %1998 = vmatprep.subr.bf16.mxu1 %v5523_v32  ;;  %2080 = vmatprep.subr.bf16.mxu0 %v5526_v33 }
 0x1cc   :  { %1999 = vmatpush1.bf16.msra.mxu1 %v5521_v34  ;;  %2081 = vmatpush1.bf16.msra.mxu0 %v5524_v35 }
 0x1cd   :  { %2000 = vmatprep.subr.bf16.mxu1 %v5529_v37  ;;  %2082 = vmatprep.subr.bf16.mxu0 %v5532_v39 }
 0x1d0   :  { %2001 = vmatpush1.bf16.msra.mxu1 %v5527_v36  ;;  %2083 = vmatpush1.bf16.msra.mxu0 %v5530_v38 }
 0x1d1   :  { %2002 = vmatprep.subr.bf16.mxu1 %v5535_v40  ;;  %2084 = vmatprep.subr.bf16.mxu0 %v5538_v41 }
 0x1d4   :  { %2003 = vmatpush1.bf16.msra.mxu1 %v5533_v42  ;;  %2085 = vmatpush1.bf16.msra.mxu0 %v5536_v43  ;;  %v5581_v42 = vld [vmem:[#allocation10 + $0x300] ss:$24 sps:$4 sm:$0xff]  }
 0x1d5   :  { %2004 = vmatprep.subr.bf16.mxu1 %v5541_v44  ;;  %2086 = vmatprep.subr.bf16.mxu0 %v5544_v45  ;;  %v5584_v43 = vld [vmem:[#allocation10 + $0x308] ss:$24 sps:$4 sm:$0xff]   ;;  %v5589_v45 = vld [vmem:[#allocation10 + $0x334] ss:$24 sps:$4 sm:$0xff]  }
 0x1d8   :  { %2005 = vmatpush1.bf16.msra.mxu1 %v5539_v46  ;;  %2087 = vmatpush1.bf16.msra.mxu0 %v5542_v47  ;;  %v5592_v46 = vld [vmem:[#allocation10 + $0x33c] ss:$24 sps:$4 sm:$0xff]   ;;  %v5587_v47 = vld [vmem:[#allocation10 + $0x330] ss:$24 sps:$4 sm:$0xff]  }
 0x1d9   :  { %2006 = vmatprep.subr.bf16.mxu1 %v5547_v48  ;;  %2088 = vmatprep.subr.bf16.mxu0 %v5550_v49  ;;  %v5590_v48 = vld [vmem:[#allocation10 + $0x338] ss:$24 sps:$4 sm:$0xff]   ;;  %v5595_v49 = vld [vmem:[#allocation10 + $0x364] ss:$24 sps:$4 sm:$0xff]  }
 0x1dc   :  { %2007 = vmatpush1.bf16.msra.mxu1 %v5545_v51  ;;  %2089 = vmatpush1.bf16.msra.mxu0 %v5548_v52  ;;  %v5598_v51 = vld [vmem:[#allocation10 + $0x36c] ss:$24 sps:$4 sm:$0xff]   ;;  %v5593_v52 = vld [vmem:[#allocation10 + $0x360] ss:$24 sps:$4 sm:$0xff]  }
 0x1dd   :  { %2008 = vmatprep.subr.bf16.mxu1 %v5553_v53  ;;  %2090 = vmatprep.subr.bf16.mxu0 %v5556_v54  ;;  %v5596_v53 = vld [vmem:[#allocation10 + $0x368] ss:$24 sps:$4 sm:$0xff]   ;;  %v5601_v54 = vld [vmem:[#allocation10 + $0x394] ss:$24 sps:$4 sm:$0xff]  }
 0x1e0   :  { %2009 = vmatpush1.bf16.msra.mxu1 %v5551_v55  ;;  %2091 = vmatpush1.bf16.msra.mxu0 %v5554_v56  ;;  %v5604_v55 = vld [vmem:[#allocation10 + $0x39c] ss:$24 sps:$4 sm:$0xff]   ;;  %v5599_v56 = vld [vmem:[#allocation10 + $0x390] ss:$24 sps:$4 sm:$0xff]  }
 0x1e1   :  { %2010 = vmatprep.subr.bf16.mxu1 %v5559_v57  ;;  %2092 = vmatprep.subr.bf16.mxu0 %v5562_v58  ;;  %v5602_v57 = vld [vmem:[#allocation10 + $0x398] ss:$24 sps:$4 sm:$0xff]   ;;  %v5607_v58 = vld [vmem:[#allocation10 + $0x3c4] ss:$24 sps:$4 sm:$0xff]  }
 0x1e4   :  { %2011 = vmatpush1.bf16.msra.mxu1 %v5557_v59  ;;  %2093 = vmatpush1.bf16.msra.mxu0 %v5560_v60  ;;  %v5610_v59 = vld [vmem:[#allocation10 + $0x3cc] ss:$24 sps:$4 sm:$0xff]   ;;  %v5605_v60 = vld [vmem:[#allocation10 + $0x3c0] ss:$24 sps:$4 sm:$0xff]  }
 0x1e5   :  { %2012 = vmatprep.subr.bf16.mxu1 %v5565_v61  ;;  %2094 = vmatprep.subr.bf16.mxu0 %v5568_v62  ;;  %v5608_v61 = vld [vmem:[#allocation10 + $0x3c8] ss:$24 sps:$4 sm:$0xff]   ;;  %v5613_v62 = vld [vmem:[#allocation10 + $0x3f4] ss:$24 sps:$4 sm:$0xff]  }
 0x1e8   :  { %2013 = vmatpush1.bf16.msra.mxu1 %v5563_v63  ;;  %2095 = vmatpush1.bf16.msra.mxu0 %v5566_v2  ;;  %v5616_v63 = vld [vmem:[#allocation10 + $0x3fc] ss:$24 sps:$4 sm:$0xff]   ;;  %v5611_v2 = vld [vmem:[#allocation10 + $0x3f0] ss:$24 sps:$4 sm:$0xff]  }
 0x1e9   :  { %2014 = vmatprep.subr.bf16.mxu1 %v5571_v3  ;;  %2096 = vmatprep.subr.bf16.mxu0 %v5574_v4  ;;  %v5614_v3 = vld [vmem:[#allocation10 + $0x3f8] ss:$24 sps:$4 sm:$0xff]   ;;  %v5619_v4 = vld [vmem:[#allocation10 + $0x424] ss:$24 sps:$4 sm:$0xff]  }
 0x1ec   :  { %2015 = vmatpush1.bf16.msra.mxu1 %v5569_v5  ;;  %2097 = vmatpush1.bf16.msra.mxu0 %v5572_v6  ;;  %v5622_v5 = vld [vmem:[#allocation10 + $0x42c] ss:$24 sps:$4 sm:$0xff]   ;;  %v5617_v6 = vld [vmem:[#allocation10 + $0x420] ss:$24 sps:$4 sm:$0xff]  }
 0x1ed   :  { %2016 = vmatprep.subr.bf16.mxu1 %v5577_v7  ;;  %2098 = vmatprep.subr.bf16.mxu0 %v5580_v8  ;;  %v5620_v7 = vld [vmem:[#allocation10 + $0x428] ss:$24 sps:$4 sm:$0xff]  }
 0x1f0   :  { %2017 = vmatpush1.bf16.msra.mxu1 %v5575_v9  ;;  %2099 = vmatpush1.bf16.msra.mxu0 %v5578_v10  ;;  %v5625_v9 = vld [vmem:[#allocation10 + $0x454] ss:$24 sps:$4 sm:$0xff]  }
 0x1f1   :  { %2027 = vmatprep.subr.bf16.mxu1 %v5583_v11  ;;  %2109 = vmatprep.subr.bf16.mxu0 %v5586_v12  ;;  %v5628_v10 = vld [vmem:[#allocation10 + $0x45c] ss:$24 sps:$4 sm:$0xff]   ;;  %v5623_v11 = vld [vmem:[#allocation10 + $0x450] ss:$24 sps:$4 sm:$0xff]  }
 0x1f2   :  { %v5626_v12 = vld [vmem:[#allocation10 + $0x458] ss:$24 sps:$4 sm:$0xff]  }
 0x266   :  { %v5141_v13 = vpop.f32.mrb[4].mxu1 }
 0x267   :  { %v5142_v14 = vpop.f32.mrb[5].mxu1 }
 0x268   :  { %v5143_v15 = vadd.f32 %v5142_v14, %v5141_v13  ;;  %v5144_v17 = vpop.f32.mrb[6].mxu1  ;;  %v5631_v14 = vld [vmem:[#allocation10 + $0x14] ss:$24 sps:$4 sm:$0xff]  }
 0x269   :  { %v5145_v20 = vpop.f32.mrb[7].mxu1  ;;  %v5629_v17 = vld [vmem:[#allocation10 + $0x10] ss:$24 sps:$4 sm:$0xff]  }
 0x26a   :  { %v1036_v25 = vadd.f32 %v5143_v15, %v531_v22  ;;  %v5703_v15 = vld [vmem:[#allocation11 + $0x4] ss:$12 sps:$4 sm:$0xff]   ;;  %v5701_v22 = vld [vmem:[#allocation11] ss:$12 sps:$4 sm:$0xff]  }
 0x286   :  { %v994_v26 = vpop.f32.mrb[4].mxu0  ;;  %v1075_v27 = vpop.f32.mrb[8].mxu1 }
 0x287   :  { %v5291_v28 = vadd.f32 %v994_v26, %v523_v23  ;;  %v6561_v29 = vadd.f32 %v1075_v27, %v1036_v25  ;;  %v996_v30 = vpop.f32.mrb[5].mxu0  ;;  %v5269_v31 = vpop.f32.mrb[9].mxu1  ;;  %v5706_v23 = vld [vmem:[#allocation11 + $0x1c] ss:$12 sps:$4 sm:$0xff]   ;;  %v5637_v25 = vld [vmem:[#allocation10 + $0x74] ss:$24 sps:$4 sm:$0xff]  }
 0x288   :  { %v5292_v32 = vadd.f32 %v996_v30, %v527_v24  ;;  %v998_v33 = vpop.f32.mrb[6].mxu0  ;;  %v1078_v34 = vpop.f32.mrb[10].mxu1  ;;  %v5632_v24 = vld [vmem:[#allocation10 + $0x40] ss:$24 sps:$4 sm:$0xff]   ;;  %v5707_v30 = vld [vmem:[#allocation11 + $0x30] ss:$12 sps:$4 sm:$0xff]  }
 0x289   :  { %v1081_v35 = vmul.f32 0.1, %v5291_v28  ;;  %v999_v36 = vpop.f32.mrb[7].mxu0  ;;  %v5270_v37 = vpop.f32.mrb[11].mxu1  ;;  %v1083_v8 = vmul.f32 0.1, %v6561_v29 }
 0x28a   :  { %v1082_v38 = vmul.f32 0.1, %v5292_v32  ;;  %v5704_v26 = vld [vmem:[#allocation11 + $0x18] ss:$12 sps:$4 sm:$0xff]   ;;  %v5709_v27 = vld [vmem:[#allocation11 + $0x34] ss:$12 sps:$4 sm:$0xff]  }
 0x28b   :  { %v1084_v39 = vmax.f32 %v5291_v28, %v1081_v35  ;;  %v1086_v13 = vmax.f32 %v6561_v29, %v1083_v8  ;;  %v5635_v28 = vld [vmem:[#allocation10 + $0x70] ss:$24 sps:$4 sm:$0xff]   ;;  %v5640_v29 = vld [vmem:[#allocation10 + $0xa4] ss:$24 sps:$4 sm:$0xff]   ;;  %v5712_v31 = vld [vmem:[#allocation11 + $0x4c] ss:$12 sps:$4 sm:$0xff]  }
 0x28c   :  { %v1085_v40 = vmax.f32 %v5292_v32, %v1082_v38  ;;  %v5638_v32 = vld [vmem:[#allocation10 + $0xa0] ss:$24 sps:$4 sm:$0xff]   ;;  %v5643_v33 = vld [vmem:[#allocation10 + $0xd4] ss:$24 sps:$4 sm:$0xff]   ;;  %v5715_v35 = vld [vmem:[#allocation11 + $0x64] ss:$12 sps:$4 sm:$0xff]  }
 0x28d   :  { %v6565_v44 = vpack.c.bf16 %v1084_v39, %v1084_v39  ;;  %v6575_v20 = vpack.c.bf16 %v1086_v13, %v1086_v13  ;;  %v5710_v34 = vld [vmem:[#allocation11 + $0x48] ss:$12 sps:$4 sm:$0xff]   ;;  %v5646_v37 = vld [vmem:[#allocation10 + $0x104] ss:$24 sps:$4 sm:$0xff]   ;;  %v5713_v38 = vld [vmem:[#allocation11 + $0x60] ss:$12 sps:$4 sm:$0xff]  }
 0x28e   :  { %v6563_v41 = vpack.c.bf16 %v1085_v40, %v1085_v40  ;;  %v5641_v36 = vld [vmem:[#allocation10 + $0xd0] ss:$24 sps:$4 sm:$0xff]   ;;  %v5644_v40 = vld [vmem:[#allocation10 + $0x100] ss:$24 sps:$4 sm:$0xff]   ;;  %v5673_v13 = vld [vmem:[#allocation10 + $0x2b4] ss:$24 sps:$4 sm:$0xff]  }
 0x28f   :  { %v5718_v39 = vld [vmem:[#allocation11 + $0x7c] ss:$12 sps:$4 sm:$0xff]  }
 0x290   :  { %2018 = vmatprep.mubr.bf16.mxu1 %v6563_v41  ;;  %2100 = vmatprep.mubr.bf16.mxu0 %v6563_v41  ;;  %v5665_v8 = vld [vmem:[#allocation10 + $0x250] ss:$24 sps:$4 sm:$0xff]  }
 0x291   :  { %2019 = vmatmul.mubr.bf16.vlgmr.msra.gmra.mrb[12].mxu1 %v6565_v44  ;;  %2101 = vmatmul.mubr.bf16.vlgmr.msra.gmra.mrb[8].mxu0 %v6565_v44 }
 0x292   :  { %2028 = vmatpush1.bf16.msra.mxu1 %v5581_v42  ;;  %2110 = vmatpush1.bf16.msra.mxu0 %v5584_v43  ;;  %v5716_v42 = vld [vmem:[#allocation11 + $0x78] ss:$12 sps:$4 sm:$0xff]   ;;  %v5721_v43 = vld [vmem:[#allocation11 + $0x94] ss:$12 sps:$4 sm:$0xff]  }
 0x293   :  { %2029 = vmatprep.subr.bf16.mxu1 %v5589_v45  ;;  %2111 = vmatprep.subr.bf16.mxu0 %v5592_v46  ;;  %v5647_v45 = vld [vmem:[#allocation10 + $0x130] ss:$24 sps:$4 sm:$0xff]   ;;  %v5652_v46 = vld [vmem:[#allocation10 + $0x164] ss:$24 sps:$4 sm:$0xff]  }
 0x294   :  { %2059 = vmatprep.mubr.bf16.mxu1 %v6336_v1  ;;  %2141 = vmatprep.mubr.bf16.mxu0 %v6336_v1 }
 0x296   :  { %2030 = vmatpush1.bf16.msra.mxu1 %v5587_v47  ;;  %2112 = vmatpush1.bf16.msra.mxu0 %v5590_v48  ;;  %v5719_v47 = vld [vmem:[#allocation11 + $0x90] ss:$12 sps:$4 sm:$0xff]   ;;  %v5724_v48 = vld [vmem:[#allocation11 + $0xac] ss:$12 sps:$4 sm:$0xff]  }
 0x297   :  { %2031 = vmatprep.subr.bf16.mxu1 %v5595_v49  ;;  %2113 = vmatprep.subr.bf16.mxu0 %v5598_v51  ;;  %v5650_v49 = vld [vmem:[#allocation10 + $0x160] ss:$24 sps:$4 sm:$0xff]   ;;  %v5655_v51 = vld [vmem:[#allocation10 + $0x194] ss:$24 sps:$4 sm:$0xff]  }
 0x29a   :  { %2032 = vmatpush1.bf16.msra.mxu1 %v5593_v52  ;;  %2114 = vmatpush1.bf16.msra.mxu0 %v5596_v53  ;;  %v5722_v52 = vld [vmem:[#allocation11 + $0xa8] ss:$12 sps:$4 sm:$0xff]   ;;  %v5727_v53 = vld [vmem:[#allocation11 + $0xc4] ss:$12 sps:$4 sm:$0xff]  }
 0x29b   :  { %2033 = vmatprep.subr.bf16.mxu1 %v5601_v54  ;;  %2115 = vmatprep.subr.bf16.mxu0 %v5604_v55  ;;  %v5653_v54 = vld [vmem:[#allocation10 + $0x190] ss:$24 sps:$4 sm:$0xff]   ;;  %v5658_v55 = vld [vmem:[#allocation10 + $0x1c4] ss:$24 sps:$4 sm:$0xff]  }
 0x29e   :  { %2034 = vmatpush1.bf16.msra.mxu1 %v5599_v56  ;;  %2116 = vmatpush1.bf16.msra.mxu0 %v5602_v57  ;;  %v5725_v56 = vld [vmem:[#allocation11 + $0xc0] ss:$12 sps:$4 sm:$0xff]   ;;  %v5732_v57 = vld [vmem:[#allocation11 + $0xdc] ss:$12 sps:$4 sm:$0xff]  }
 0x29f   :  { %2035 = vmatprep.subr.bf16.mxu1 %v5607_v58  ;;  %2117 = vmatprep.subr.bf16.mxu0 %v5610_v59  ;;  %v5656_v58 = vld [vmem:[#allocation10 + $0x1c0] ss:$24 sps:$4 sm:$0xff]   ;;  %v5661_v59 = vld [vmem:[#allocation10 + $0x1f4] ss:$24 sps:$4 sm:$0xff]  }
 0x2a2   :  { %2036 = vmatpush1.bf16.msra.mxu1 %v5605_v60  ;;  %2118 = vmatpush1.bf16.msra.mxu0 %v5608_v61  ;;  %v5730_v60 = vld [vmem:[#allocation11 + $0xd8] ss:$12 sps:$4 sm:$0xff]   ;;  %v5737_v61 = vld [vmem:[#allocation11 + $0xf4] ss:$12 sps:$4 sm:$0xff]  }
 0x2a3   :  { %2037 = vmatprep.subr.bf16.mxu1 %v5613_v62  ;;  %2119 = vmatprep.subr.bf16.mxu0 %v5616_v63  ;;  %v5659_v62 = vld [vmem:[#allocation10 + $0x1f0] ss:$24 sps:$4 sm:$0xff]   ;;  %v5664_v63 = vld [vmem:[#allocation10 + $0x224] ss:$24 sps:$4 sm:$0xff]  }
 0x2a6   :  { %2038 = vmatpush1.bf16.msra.mxu1 %v5611_v2  ;;  %2120 = vmatpush1.bf16.msra.mxu0 %v5614_v3  ;;  %v5735_v2 = vld [vmem:[#allocation11 + $0xf0] ss:$12 sps:$4 sm:$0xff]   ;;  %v5742_v3 = vld [vmem:[#allocation11 + $0x10c] ss:$12 sps:$4 sm:$0xff]  }
 0x2a7   :  { %2039 = vmatprep.subr.bf16.mxu1 %v5619_v4  ;;  %2121 = vmatprep.subr.bf16.mxu0 %v5622_v5  ;;  %v5662_v4 = vld [vmem:[#allocation10 + $0x220] ss:$24 sps:$4 sm:$0xff]   ;;  %v5667_v5 = vld [vmem:[#allocation10 + $0x254] ss:$24 sps:$4 sm:$0xff]  }
 0x2aa   :  { %2040 = vmatpush1.bf16.msra.mxu1 %v5617_v6  ;;  %2122 = vmatpush1.bf16.msra.mxu0 %v5620_v7  ;;  %v5740_v6 = vld [vmem:[#allocation11 + $0x108] ss:$12 sps:$4 sm:$0xff]   ;;  %v5747_v7 = vld [vmem:[#allocation11 + $0x124] ss:$12 sps:$4 sm:$0xff]  }
 0x2ab   :  { %2041 = vmatprep.subr.bf16.mxu1 %v5625_v9  ;;  %2123 = vmatprep.subr.bf16.mxu0 %v5628_v10  ;;  %v5670_v9 = vld [vmem:[#allocation10 + $0x284] ss:$24 sps:$4 sm:$0xff]   ;;  %v5745_v10 = vld [vmem:[#allocation11 + $0x120] ss:$12 sps:$4 sm:$0xff]  }
 0x2ae   :  { %2042 = vmatpush1.bf16.msra.mxu1 %v5623_v11  ;;  %2124 = vmatpush1.bf16.msra.mxu0 %v5626_v12  ;;  %v5752_v11 = vld [vmem:[#allocation11 + $0x13c] ss:$12 sps:$4 sm:$0xff]   ;;  %v5668_v12 = vld [vmem:[#allocation10 + $0x280] ss:$24 sps:$4 sm:$0xff]  }
 0x2af   :  { %2150 = vmatprep.subr.bf16.mxu1 %v5631_v14  ;;  %3227 = vmatprep.subr.bf16.mxu0 %v5703_v15  ;;  %v5750_v14 = vld [vmem:[#allocation11 + $0x138] ss:$12 sps:$4 sm:$0xff]   ;;  %v5671_v15 = vld [vmem:[#allocation10 + $0x2b0] ss:$24 sps:$4 sm:$0xff]  }
 0x2b1   :  { %2060 = vmatmul.mubr.bf16.vlgmr.msra.gmra.mrb[12].mxu1 %v6575_v20  ;;  %2142 = vmatmul.mubr.bf16.vlgmr.msra.gmra.mrb[8].mxu0 %v6575_v20 }
 0x2b2   :  { %2151 = vmatpush1.bf16.msra.mxu1 %v5629_v17  ;;  %2182 = vmatprep.mubr.bf16.mxu1 %v6563_v41  ;;  %v5649_v41 = vld [vmem:[#allocation10 + $0x134] ss:$24 sps:$4 sm:$0xff]   ;;  %v5676_v17 = vld [vmem:[#allocation10 + $0x2e4] ss:$24 sps:$4 sm:$0xff]  }
 0x2b3   :  { %2152 = vmatprep.subr.bf16.mxu1 %v5634_v21  ;;  %3228 = vmatpush1.bf16.msra.mxu0 %v5701_v22  ;;  %v5674_v21 = vld [vmem:[#allocation10 + $0x2e0] ss:$24 sps:$4 sm:$0xff]   ;;  %v5679_v22 = vld [vmem:[#allocation10 + $0x314] ss:$24 sps:$4 sm:$0xff]  }
 0x2b4   :  { %3229 = vmatprep.subr.bf16.mxu0 %v5706_v23  ;;  %v5677_v23 = vld [vmem:[#allocation10 + $0x310] ss:$24 sps:$4 sm:$0xff]  }
 0x2b6   :  { %2153 = vmatpush1.bf16.msra.mxu1 %v5632_v24  ;;  %v5682_v24 = vld [vmem:[#allocation10 + $0x344] ss:$24 sps:$4 sm:$0xff]  }
 0x2b7   :  { %2154 = vmatprep.subr.bf16.mxu1 %v5637_v25  ;;  %3230 = vmatpush1.bf16.msra.mxu0 %v5704_v26  ;;  %v5680_v25 = vld [vmem:[#allocation10 + $0x340] ss:$24 sps:$4 sm:$0xff]   ;;  %v5685_v26 = vld [vmem:[#allocation10 + $0x374] ss:$24 sps:$4 sm:$0xff]  }
 0x2b8   :  { %3231 = vmatprep.subr.bf16.mxu0 %v5709_v27  ;;  %v5683_v27 = vld [vmem:[#allocation10 + $0x370] ss:$24 sps:$4 sm:$0xff]  }
 0x2ba   :  { %2155 = vmatpush1.bf16.msra.mxu1 %v5635_v28  ;;  %v5688_v28 = vld [vmem:[#allocation10 + $0x3a4] ss:$24 sps:$4 sm:$0xff]  }
 0x2bb   :  { %2156 = vmatprep.subr.bf16.mxu1 %v5640_v29  ;;  %3232 = vmatpush1.bf16.msra.mxu0 %v5707_v30  ;;  %v5686_v29 = vld [vmem:[#allocation10 + $0x3a0] ss:$24 sps:$4 sm:$0xff]   ;;  %v5691_v30 = vld [vmem:[#allocation10 + $0x3d4] ss:$24 sps:$4 sm:$0xff]  }
 0x2bc   :  { %3233 = vmatprep.subr.bf16.mxu0 %v5712_v31  ;;  %v5689_v31 = vld [vmem:[#allocation10 + $0x3d0] ss:$24 sps:$4 sm:$0xff]  }
 0x2be   :  { %2157 = vmatpush1.bf16.msra.mxu1 %v5638_v32  ;;  %v5694_v32 = vld [vmem:[#allocation10 + $0x404] ss:$24 sps:$4 sm:$0xff]  }
 0x2bf   :  { %2158 = vmatprep.subr.bf16.mxu1 %v5643_v33  ;;  %3234 = vmatpush1.bf16.msra.mxu0 %v5710_v34  ;;  %v5697_v33 = vld [vmem:[#allocation10 + $0x434] ss:$24 sps:$4 sm:$0xff]  }
 0x2c0   :  { %3235 = vmatprep.subr.bf16.mxu0 %v5715_v35  ;;  %v5757_v34 = vld [vmem:[#allocation11 + $0x154] ss:$12 sps:$4 sm:$0xff]   ;;  %v5695_v35 = vld [vmem:[#allocation10 + $0x430] ss:$24 sps:$4 sm:$0xff]  }
 0x2c2   :  { %2159 = vmatpush1.bf16.msra.mxu1 %v5641_v36  ;;  %v5700_v36 = vld [vmem:[#allocation10 + $0x464] ss:$24 sps:$4 sm:$0xff]  }
 0x2c3   :  { %2160 = vmatprep.subr.bf16.mxu1 %v5646_v37  ;;  %3236 = vmatpush1.bf16.msra.mxu0 %v5713_v38  ;;  %v5762_v37 = vld [vmem:[#allocation11 + $0x16c] ss:$12 sps:$4 sm:$0xff]   ;;  %v5760_v38 = vld [vmem:[#allocation11 + $0x168] ss:$12 sps:$4 sm:$0xff]  }
 0x2c4   :  { %3237 = vmatprep.subr.bf16.mxu0 %v5718_v39  ;;  %v5698_v39 = vld [vmem:[#allocation10 + $0x460] ss:$24 sps:$4 sm:$0xff]  }
 0x2c6   :  { %2161 = vmatpush1.bf16.msra.mxu1 %v5644_v40  ;;  %v5728_v40 = vld [vmem:[#allocation11 + $0xc8] ss:$12 sps:$4 sm:$0xff]  }
 0x2c7   :  { %2162 = vmatprep.subr.bf16.mxu1 %v5649_v41  ;;  %3238 = vmatpush1.bf16.msra.mxu0 %v5716_v42  ;;  %v5767_v41 = vld [vmem:[#allocation11 + $0x184] ss:$12 sps:$4 sm:$0xff]   ;;  %v5729_v42 = vld [vmem:[#allocation11 + $0x8] ss:$12 sps:$4 sm:$0xff]  }
 0x2c8   :  { %3239 = vmatprep.subr.bf16.mxu0 %v5721_v43  ;;  %v5733_v43 = vld [vmem:[#allocation11 + $0xe0] ss:$12 sps:$4 sm:$0xff]  }
 0x2ca   :  { %2163 = vmatpush1.bf16.msra.mxu1 %v5647_v45  ;;  %v5734_v45 = vld [vmem:[#allocation11 + $0x20] ss:$12 sps:$4 sm:$0xff]  }
 0x2cb   :  { %2164 = vmatprep.subr.bf16.mxu1 %v5652_v46  ;;  %3240 = vmatpush1.bf16.msra.mxu0 %v5719_v47  ;;  %v5738_v46 = vld [vmem:[#allocation11 + $0xf8] ss:$12 sps:$4 sm:$0xff]  }
 0x2cc   :  { %3241 = vmatprep.subr.bf16.mxu0 %v5724_v48  ;;  %v5739_v47 = vld [vmem:[#allocation11 + $0x38] ss:$12 sps:$4 sm:$0xff]   ;;  %v5743_v48 = vld [vmem:[#allocation11 + $0x110] ss:$12 sps:$4 sm:$0xff]  }
 0x2ce   :  { %2165 = vmatpush1.bf16.msra.mxu1 %v5650_v49  ;;  %v5744_v49 = vld [vmem:[#allocation11 + $0x50] ss:$12 sps:$4 sm:$0xff]  }
 0x2cf   :  { %2166 = vmatprep.subr.bf16.mxu1 %v5655_v51  ;;  %3242 = vmatpush1.bf16.msra.mxu0 %v5722_v52  ;;  %v5748_v51 = vld [vmem:[#allocation11 + $0x128] ss:$12 sps:$4 sm:$0xff]  }
 0x2d0   :  { %3243 = vmatprep.subr.bf16.mxu0 %v5727_v53  ;;  %v5749_v52 = vld [vmem:[#allocation11 + $0x68] ss:$12 sps:$4 sm:$0xff]   ;;  %v5753_v53 = vld [vmem:[#allocation11 + $0x140] ss:$12 sps:$4 sm:$0xff]  }
 0x2d2   :  { %2167 = vmatpush1.bf16.msra.mxu1 %v5653_v54  ;;  %v5754_v54 = vld [vmem:[#allocation11 + $0x80] ss:$12 sps:$4 sm:$0xff]  }
 0x2d3   :  { %2168 = vmatprep.subr.bf16.mxu1 %v5658_v55  ;;  %3244 = vmatpush1.bf16.msra.mxu0 %v5725_v56  ;;  %v5759_v55 = vld [vmem:[#allocation11 + $0x98] ss:$12 sps:$4 sm:$0xff]   ;;  %v5763_v56 = vld [vmem:[#allocation11 + $0x170] ss:$12 sps:$4 sm:$0xff]  }
 0x2d4   :  { %3245 = vmatprep.subr.bf16.mxu0 %v5732_v57  ;;  %v5764_v57 = vld [vmem:[#allocation11 + $0xb0] ss:$12 sps:$4 sm:$0xff]  }
 0x2d6   :  { %2169 = vmatpush1.bf16.msra.mxu1 %v5656_v58  ;;  %v5768_v58 = vld [vmem:[#allocation11 + $0x248] ss:$12 sps:$4 sm:$0xff]  }
 0x2d7   :  { %2170 = vmatprep.subr.bf16.mxu1 %v5661_v59  ;;  %3246 = vmatpush1.bf16.msra.mxu0 %v5730_v60  ;;  %v6586_v59 = vld [vmem:[%s6658_s6] sm:$0x3f]  ;;  %v1250_v60 = vsub.s32 3, %v6526_v16 }
 0x2d8   :  { %3247 = vmatprep.subr.bf16.mxu0 %v5737_v61  ;;  %v1239_v61 = vrot.slane %v6586_v59, %v6531_v18 }
 0x2da   :  { %2171 = vmatpush1.bf16.msra.mxu1 %v5659_v62  ;;  %v1243_v62 = vrot.slane %v6586_v59, %v6534_v19 }
 0x2db   :  { %2172 = vmatprep.subr.bf16.mxu1 %v5664_v63  ;;  %3248 = vmatpush1.bf16.msra.mxu0 %v5735_v2  ;;  %v1251_v63 = vrot.slane %v6586_v59, %v1250_v60 }
 0x2dc   :  { %3249 = vmatprep.subr.bf16.mxu0 %v5742_v3 }
 0x2de   :  { %2173 = vmatpush1.bf16.msra.mxu1 %v5662_v4 }
 0x2df   :  { %2174 = vmatprep.subr.bf16.mxu1 %v5667_v5  ;;  %3250 = vmatpush1.bf16.msra.mxu0 %v5740_v6 }
 0x2e0   :  { %3251 = vmatprep.subr.bf16.mxu0 %v5747_v7 }
 0x2e2   :  { %2175 = vmatpush1.bf16.msra.mxu1 %v5665_v8 }
 0x2e3   :  { %2176 = vmatprep.subr.bf16.mxu1 %v5670_v9  ;;  %3252 = vmatpush1.bf16.msra.mxu0 %v5745_v10 }
 0x2e4   :  { %3253 = vmatprep.subr.bf16.mxu0 %v5752_v11 }
 0x2e6   :  { %2177 = vmatpush1.bf16.msra.mxu1 %v5668_v12 }
 0x2e7   :  { %2178 = vmatprep.subr.bf16.mxu1 %v5673_v13  ;;  %3254 = vmatpush1.bf16.msra.mxu0 %v5750_v14 }
 0x2e8   :  { %3255 = vmatprep.subr.bf16.mxu0 %v5757_v34  ;;  %v5779_v34 = vld [vmem:[#allocation11 + $0x1b8] ss:$12 sps:$4 sm:$0xff]  }
 0x2ea   :  { %2179 = vmatpush1.bf16.msra.mxu1 %v5671_v15 }
 0x2eb   :  { %2180 = vmatprep.subr.bf16.mxu1 %v5676_v17 }
 0x2ee   :  { %2181 = vmatpush1.bf16.msra.mxu1 %v5674_v21 }
 0x2ef   :  { %2191 = vmatprep.subr.bf16.mxu1 %v5679_v22 }
 0x2f1   :  { %2183 = vmatmul.mubr.bf16.vlgmr.msra.gmra.mrb[16].mxu1 %v6565_v44  ;;  %v5692_v44 = vld [vmem:[#allocation10 + $0x400] ss:$24 sps:$4 sm:$0xff]  }
 0x2f2   :  { %2192 = vmatpush1.bf16.msra.mxu1 %v5677_v23  ;;  %2223 = vmatprep.mubr.bf16.mxu1 %v6336_v1  ;;  %v5755_v1 = vld [vmem:[#allocation11 + $0x150] ss:$12 sps:$4 sm:$0xff]  }
 0x2f3   :  { %2193 = vmatprep.subr.bf16.mxu1 %v5682_v24  ;;  %3256 = vmatpush1.bf16.msra.mxu0 %v5755_v1  ;;  %v5765_v24 = vld [vmem:[#allocation11 + $0x180] ss:$12 sps:$4 sm:$0xff]  }
 0x2f4   :  { %3257 = vmatprep.subr.bf16.mxu0 %v5762_v37  ;;  %v5782_v1 = vld [vmem:[#allocation11 + $0x1cc] ss:$12 sps:$4 sm:$0xff]   ;;  %v5784_v37 = vld [vmem:[#allocation11 + $0x1d0] ss:$12 sps:$4 sm:$0xff]  }
 0x2f6   :  { %2194 = vmatpush1.bf16.msra.mxu1 %v5680_v25  ;;  %v5769_v25 = vld [vmem:[#allocation11 + $0x188] ss:$12 sps:$4 sm:$0xff]  }
 0x2f7   :  { %2195 = vmatprep.subr.bf16.mxu1 %v5685_v26  ;;  %3258 = vmatpush1.bf16.msra.mxu0 %v5760_v38  ;;  %v5787_v38 = vld [vmem:[#allocation11 + $0x1e4] ss:$12 sps:$4 sm:$0xff]  }
 0x2f8   :  { %3268 = vmatprep.subr.bf16.mxu0 %v5767_v41  ;;  %v5789_v41 = vld [vmem:[#allocation11 + $0x1e8] ss:$12 sps:$4 sm:$0xff]  }
 0x2fa   :  { %2196 = vmatpush1.bf16.msra.mxu1 %v5683_v27  ;;  %v5772_v27 = vld [vmem:[#allocation11 + $0x19c] ss:$12 sps:$4 sm:$0xff]  }
 0x2fb   :  { %2197 = vmatprep.subr.bf16.mxu1 %v5688_v28  ;;  %v5773_v28 = vld [vmem:[#allocation11 + $0x260] ss:$12 sps:$4 sm:$0xff]  }
 0x2fe   :  { %2198 = vmatpush1.bf16.msra.mxu1 %v5686_v29 }
 0x2ff   :  { %2199 = vmatprep.subr.bf16.mxu1 %v5691_v30  ;;  %v5770_v30 = vld [vmem:[#allocation11 + $0x198] ss:$12 sps:$4 sm:$0xff]  }
 0x302   :  { %2200 = vmatpush1.bf16.msra.mxu1 %v5689_v31  ;;  %v5774_v31 = vld [vmem:[#allocation11 + $0x1a0] ss:$12 sps:$4 sm:$0xff]  }
 0x303   :  { %2201 = vmatprep.subr.bf16.mxu1 %v5694_v32  ;;  %v5777_v32 = vld [vmem:[#allocation11 + $0x1b4] ss:$12 sps:$4 sm:$0xff]  }
 0x306   :  { %2202 = vmatpush1.bf16.msra.mxu1 %v5692_v44  ;;  %v5778_v44 = vld [vmem:[#allocation11 + $0x278] ss:$12 sps:$4 sm:$0xff]  }
 0x307   :  { %2203 = vmatprep.subr.bf16.mxu1 %v5697_v33  ;;  %v5775_v33 = vld [vmem:[#allocation11 + $0x1b0] ss:$12 sps:$4 sm:$0xff]  }
 0x30a   :  { %2204 = vmatpush1.bf16.msra.mxu1 %v5695_v35  ;;  %v5783_v35 = vld [vmem:[#allocation11 + $0x290] ss:$12 sps:$4 sm:$0xff]  }
 0x30b   :  { %2205 = vmatprep.subr.bf16.mxu1 %v5700_v36  ;;  %v5780_v36 = vld [vmem:[#allocation11 + $0x1c8] ss:$12 sps:$4 sm:$0xff]  }
 0x30e   :  { %2206 = vmatpush1.bf16.msra.mxu1 %v5698_v39  ;;  %v5788_v39 = vld [vmem:[#allocation11 + $0x2a8] ss:$12 sps:$4 sm:$0xff]  }
 0x30f   :  { %5156 = vmatprep.subr.bf16.mxu1 %v5728_v40  ;;  %v5785_v40 = vld [vmem:[#allocation11 + $0x1e0] ss:$12 sps:$4 sm:$0xff]  }
 0x311   :  { %2224 = vmatmul.mubr.bf16.vlgmr.msra.gmra.mrb[16].mxu1 %v6575_v20  ;;  %v5758_v20 = vld [vmem:[#allocation11 + $0x158] ss:$12 sps:$4 sm:$0xff]  }
 0x312   :  { %5157 = vmatpush3.bf16.msra.mxu1 %v5729_v42  ;;  %v1247_v42 = vrot.slane %v6586_v59, %v6547_v50 }
 0x313   :  { %5158 = vmatprep.subr.bf16.mxu1 %v5733_v43  ;;  %v5792_v43 = vld [vmem:[#allocation11 + $0x1fc] ss:$12 sps:$4 sm:$0xff]  }
 0x316   :  { %5159 = vmatpush3.bf16.msra.mxu1 %v5734_v45  ;;  %v5793_v45 = vld [vmem:[#allocation11 + $0x2c0] ss:$12 sps:$4 sm:$0xff]  }
 0x317   :  { %5160 = vmatprep.subr.bf16.mxu1 %v5738_v46  ;;  %v5790_v46 = vld [vmem:[#allocation11 + $0x1f8] ss:$12 sps:$4 sm:$0xff]  }
 0x31a   :  { %5161 = vmatpush3.bf16.msra.mxu1 %v5739_v47  ;;  %v5794_v47 = vld [vmem:[#allocation11 + $0x200] ss:$12 sps:$4 sm:$0xff]  }
 0x31b   :  { %5162 = vmatprep.subr.bf16.mxu1 %v5743_v48 }
 0x31e   :  { %5163 = vmatpush3.bf16.msra.mxu1 %v5744_v49  ;;  %v5797_v49 = vld [vmem:[#allocation11 + $0x214] ss:$12 sps:$4 sm:$0xff]  }
 0x31f   :  { %5164 = vmatprep.subr.bf16.mxu1 %v5748_v51  ;;  %v5798_v51 = vld [vmem:[#allocation11 + $0x2d8] ss:$12 sps:$4 sm:$0xff]  }
 0x322   :  { %5165 = vmatpush3.bf16.msra.mxu1 %v5749_v52  ;;  %v5795_v52 = vld [vmem:[#allocation11 + $0x210] ss:$12 sps:$4 sm:$0xff]  }
 0x323   :  { %5166 = vmatprep.subr.bf16.mxu1 %v5753_v53  ;;  %v5799_v53 = vld [vmem:[#allocation11 + $0x218] ss:$12 sps:$4 sm:$0xff]  }
 0x326   :  { %5167 = vmatpush3.bf16.msra.mxu1 %v5754_v54 }
 0x327   :  { %5168 = vmatprep.subr.bf16.mxu1 %v5758_v20  ;;  %v5802_v20 = vld [vmem:[#allocation11 + $0x22c] ss:$12 sps:$4 sm:$0xff]  }
 0x32a   :  { %5169 = vmatpush3.bf16.msra.mxu1 %v5759_v55  ;;  %v5803_v55 = vld [vmem:[#allocation11 + $0x2f0] ss:$12 sps:$4 sm:$0xff]  }
 0x32b   :  { %5170 = vmatprep.subr.bf16.mxu1 %v5763_v56  ;;  %v5800_v56 = vld [vmem:[#allocation11 + $0x228] ss:$12 sps:$4 sm:$0xff]  }
 0x32e   :  { %5171 = vmatpush3.bf16.msra.mxu1 %v5764_v57  ;;  %v5804_v57 = vld [vmem:[#allocation11 + $0x230] ss:$12 sps:$4 sm:$0xff]  }
 0x32f   :  { %5178 = vmatprep.subr.bf16.mxu1 %v5768_v58 }
 0x384   :  { %v2061_v2 = vpop.f32.mrb[12].mxu1  ;;  %v6596_v3 = vpop.f32.mrb[8].mxu0 }
 0x385   :  { %v5293_v4 = vadd.f32 %v2061_v2, %v1239_v61  ;;  %v2063_v5 = vpop.f32.mrb[13].mxu1  ;;  %v2145_v6 = vpop.f32.mrb[9].mxu0  ;;  %v5295_v48 = vadd.f32 %v6596_v3, %v1247_v42  ;;  %v5807_v61 = vld [vmem:[#allocation11 + $0x244] ss:$12 sps:$4 sm:$0xff]   ;;  %v5833_v2 = vld [vmem:[#allocation11 + $0x308] ss:$12 sps:$4 sm:$0xff]  }
 0x386   :  { %v5294_v7 = vadd.f32 %v2063_v5, %v1243_v62  ;;  %v5296_v8 = vadd.f32 %v2145_v6, %v1251_v63  ;;  %v2065_v9 = vpop.f32.mrb[14].mxu1  ;;  %v2147_v10 = vpop.f32.mrb[10].mxu0  ;;  %v5832_v62 = vld [vmem:[#allocation11 + $0x3c8] ss:$12 sps:$4 sm:$0xff]   ;;  %v5805_v63 = vld [vmem:[#allocation11 + $0x240] ss:$12 sps:$4 sm:$0xff]  }
 0x387   :  { %v2232_v11 = vmul.f32 0.1, %v5293_v4  ;;  %v2066_v12 = vpop.f32.mrb[15].mxu1  ;;  %v2148_v13 = vpop.f32.mrb[11].mxu0  ;;  %v2234_v54 = vmul.f32 0.1, %v5295_v48 }
 0x388   :  { %v2233_v14 = vmul.f32 0.1, %v5294_v7  ;;  %v2235_v15 = vmul.f32 0.1, %v5296_v8  ;;  %v5837_v5 = vld [vmem:[#allocation11 + $0x3e0] ss:$12 sps:$4 sm:$0xff]  }
 0x389   :  { %v2238_v17 = vmax.f32 %v5293_v4, %v2232_v11  ;;  %v2240_v58 = vmax.f32 %v5295_v48, %v2234_v54  ;;  %v5810_v4 = vld [vmem:[#allocation11 + $0x25c] ss:$12 sps:$4 sm:$0xff]   ;;  %v5808_v6 = vld [vmem:[#allocation11 + $0x258] ss:$12 sps:$4 sm:$0xff]  }
 0x38a   :  { %v2239_v21 = vmax.f32 %v5294_v7, %v2233_v14  ;;  %v2241_v22 = vmax.f32 %v5296_v8, %v2235_v15  ;;  %v5838_v7 = vld [vmem:[#allocation11 + $0x320] ss:$12 sps:$4 sm:$0xff]   ;;  %v5842_v9 = vld [vmem:[#allocation11 + $0x3f8] ss:$12 sps:$4 sm:$0xff]   ;;  %v5811_v10 = vld [vmem:[#allocation11 + $0x270] ss:$12 sps:$4 sm:$0xff]  }
 0x38b   :  { %v2244_v26 = vpack.c.bf16 %v2238_v17, %v2238_v17  ;;  %v6601_v3 = vpack.c.bf16 %v2240_v58, %v2240_v58  ;;  %v5813_v8 = vld [vmem:[#allocation11 + $0x274] ss:$12 sps:$4 sm:$0xff]   ;;  %v5843_v11 = vld [vmem:[#allocation11 + $0x338] ss:$12 sps:$4 sm:$0xff]   ;;  %v5847_v13 = vld [vmem:[#allocation11 + $0x410] ss:$12 sps:$4 sm:$0xff]  }
 0x38c   :  { %v2245_v23 = vpack.c.bf16 %v2239_v21, %v2239_v21  ;;  %v2247_v29 = vpack.c.bf16 %v2241_v22, %v2241_v22  ;;  %v5816_v12 = vld [vmem:[#allocation11 + $0x28c] ss:$12 sps:$4 sm:$0xff]   ;;  %v5814_v14 = vld [vmem:[#allocation11 + $0x288] ss:$12 sps:$4 sm:$0xff]   ;;  %v5848_v15 = vld [vmem:[#allocation11 + $0x350] ss:$12 sps:$4 sm:$0xff]  }
 0x38d   :  { %v5819_v17 = vld [vmem:[#allocation11 + $0x2a4] ss:$12 sps:$4 sm:$0xff]   ;;  %v5852_v21 = vld [vmem:[#allocation11 + $0x428] ss:$12 sps:$4 sm:$0xff]   ;;  %v5817_v22 = vld [vmem:[#allocation11 + $0x2a0] ss:$12 sps:$4 sm:$0xff]  }
 0x38e   :  { %3259 = vmatprep.mubr.bf16.mxu0 %v2245_v23  ;;  %3382 = vmatprep.mubr.bf16.mxu1 %v2245_v23  ;;  %v5853_v23 = vld [vmem:[#allocation11 + $0x368] ss:$12 sps:$4 sm:$0xff]   ;;  %v5851_v42 = vld [vmem:[#allocation11 + $0x364] ss:$12 sps:$4 sm:$0xff]  }
 0x38f   :  { %3260 = vmatmul.mubr.bf16.vlgmr.msra.gmra.mrb[12].mxu0 %v2244_v26  ;;  %3383 = vmatmul.mubr.bf16.vlgmr.msra.gmra.mrb[20].mxu1 %v2244_v26  ;;  %v5820_v26 = vld [vmem:[#allocation11 + $0x2b8] ss:$12 sps:$4 sm:$0xff]   ;;  %v5859_v54 = vld [vmem:[#allocation11 + $0x390] ss:$12 sps:$4 sm:$0xff]  }
 0x390   :  { %3269 = vmatpush1.bf16.msra.mxu0 %v5765_v24  ;;  %5179 = vmatpush3.bf16.msra.mxu1 %v5769_v25  ;;  %v5822_v24 = vld [vmem:[#allocation11 + $0x2bc] ss:$12 sps:$4 sm:$0xff]   ;;  %v5857_v25 = vld [vmem:[#allocation11 + $0x440] ss:$12 sps:$4 sm:$0xff]   ;;  %v5854_v48 = vld [vmem:[#allocation11 + $0x378] ss:$12 sps:$4 sm:$0xff]  }
 0x391   :  { %3300 = vmatprep.mubr.bf16.mxu0 %v2247_v29  ;;  %3422 = vmatprep.mubr.bf16.mxu1 %v2247_v29  ;;  %v5862_v29 = vld [vmem:[#allocation11 + $0x458] ss:$12 sps:$4 sm:$0xff]  }
 0x392   :  { %3270 = vmatprep.subr.bf16.mxu0 %v5772_v27  ;;  %5180 = vmatprep.subr.bf16.mxu1 %v5773_v28  ;;  %v5858_v27 = vld [vmem:[#allocation11 + $0x380] ss:$12 sps:$4 sm:$0xff]  }
 0x393   :  { %v5825_v28 = vld [vmem:[#allocation11 + $0x2d4] ss:$12 sps:$4 sm:$0xff]  }
 0x394   :  { %3271 = vmatpush1.bf16.msra.mxu0 %v5770_v30  ;;  %5181 = vmatpush3.bf16.msra.mxu1 %v5774_v31  ;;  %v5823_v30 = vld [vmem:[#allocation11 + $0x2d0] ss:$12 sps:$4 sm:$0xff]   ;;  %v5863_v31 = vld [vmem:[#allocation11 + $0x398] ss:$12 sps:$4 sm:$0xff]  }
 0x395   :  { %3272 = vmatprep.subr.bf16.mxu0 %v5777_v32  ;;  %5182 = vmatprep.subr.bf16.mxu1 %v5778_v44  ;;  %v5828_v32 = vld [vmem:[#allocation11 + $0x2ec] ss:$12 sps:$4 sm:$0xff]   ;;  %v5867_v44 = vld [vmem:[#allocation11 + $0x470] ss:$12 sps:$4 sm:$0xff]  }
 0x398   :  { %3273 = vmatpush1.bf16.msra.mxu0 %v5775_v33  ;;  %5183 = vmatpush3.bf16.msra.mxu1 %v5779_v34  ;;  %v5826_v33 = vld [vmem:[#allocation11 + $0x2e8] ss:$12 sps:$4 sm:$0xff]   ;;  %v5868_v34 = vld [vmem:[#allocation11 + $0x3b0] ss:$12 sps:$4 sm:$0xff]  }
 0x399   :  { %3274 = vmatprep.subr.bf16.mxu0 %v5782_v1  ;;  %5184 = vmatprep.subr.bf16.mxu1 %v5783_v35  ;;  %v5831_v1 = vld [vmem:[#allocation11 + $0x304] ss:$12 sps:$4 sm:$0xff]   ;;  %v5829_v35 = vld [vmem:[#allocation11 + $0x300] ss:$12 sps:$4 sm:$0xff]  }
 0x39c   :  { %3275 = vmatpush1.bf16.msra.mxu0 %v5780_v36  ;;  %5185 = vmatpush3.bf16.msra.mxu1 %v5784_v37  ;;  %v5836_v36 = vld [vmem:[#allocation11 + $0x31c] ss:$12 sps:$4 sm:$0xff]   ;;  %v5834_v37 = vld [vmem:[#allocation11 + $0x318] ss:$12 sps:$4 sm:$0xff]  }
 0x39d   :  { %3276 = vmatprep.subr.bf16.mxu0 %v5787_v38  ;;  %5186 = vmatprep.subr.bf16.mxu1 %v5788_v39  ;;  %v5841_v38 = vld [vmem:[#allocation11 + $0x334] ss:$12 sps:$4 sm:$0xff]   ;;  %v5839_v39 = vld [vmem:[#allocation11 + $0x330] ss:$12 sps:$4 sm:$0xff]  }
 0x3a0   :  { %3277 = vmatpush1.bf16.msra.mxu0 %v5785_v40  ;;  %5187 = vmatpush3.bf16.msra.mxu1 %v5789_v41  ;;  %v5846_v40 = vld [vmem:[#allocation11 + $0x34c] ss:$12 sps:$4 sm:$0xff]   ;;  %v5844_v41 = vld [vmem:[#allocation11 + $0x348] ss:$12 sps:$4 sm:$0xff]  }
 0x3a1   :  { %3278 = vmatprep.subr.bf16.mxu0 %v5792_v43  ;;  %5188 = vmatprep.subr.bf16.mxu1 %v5793_v45  ;;  %v5849_v43 = vld [vmem:[#allocation11 + $0x360] ss:$12 sps:$4 sm:$0xff]   ;;  %v5856_v45 = vld [vmem:[#allocation11 + $0x37c] ss:$12 sps:$4 sm:$0xff]  }
 0x3a4   :  { %3279 = vmatpush1.bf16.msra.mxu0 %v5790_v46  ;;  %5189 = vmatpush3.bf16.msra.mxu1 %v5794_v47  ;;  %v1254_v46 = vsub.s32 4, %v6526_v16  ;;  %v1258_v47 = vsub.s32 5, %v6526_v16 }
 0x3a5   :  { %3280 = vmatprep.subr.bf16.mxu0 %v5797_v49  ;;  %5190 = vmatprep.subr.bf16.mxu1 %v5798_v51  ;;  %v5861_v51 = vld [vmem:[#allocation11 + $0x394] ss:$12 sps:$4 sm:$0xff]  }
 0x3a6   :  { %v1255_v49 = vrot.slane %v6586_v59, %v1254_v46  ;;  %v5920_v46 = vld [vmem:[#allocation13 + $0x88] ss:$16 sps:$4 sm:$0xff]  }
 0x3a8   :  { %3281 = vmatpush1.bf16.msra.mxu0 %v5795_v52  ;;  %5191 = vmatpush3.bf16.msra.mxu1 %v5799_v53  ;;  %v1259_v52 = vrot.slane %v6586_v59, %v1258_v47  ;;  %v5869_v59 = vld [vmem:[#allocation11 + $0x3c0] ss:$12 sps:$4 sm:$0xff]  }
 0x3a9   :  { %3282 = vmatprep.subr.bf16.mxu0 %v5802_v20  ;;  %5192 = vmatprep.subr.bf16.mxu1 %v5803_v55  ;;  %v5928_v47 = vld [vmem:[#allocation13 + $0xac] ss:$16 sps:$4 sm:$0xff]  }
 0x3ac   :  { %3283 = vmatpush1.bf16.msra.mxu0 %v5800_v56  ;;  %5193 = vmatpush3.bf16.msra.mxu1 %v5804_v57  ;;  %v5866_v56 = vld [vmem:[#allocation11 + $0x3ac] ss:$12 sps:$4 sm:$0xff]  }
 0x3ad   :  { %3284 = vmatprep.subr.bf16.mxu0 %v5807_v61  ;;  %5200 = vmatprep.subr.bf16.mxu1 %v5832_v62 }
 0x3af   :  { %3423 = vmatmul.mubr.bf16.vlgmr.msra.gmra.mrb[24].mxu1 %v6601_v3 }
 0x3b0   :  { %3285 = vmatpush1.bf16.msra.mxu0 %v5805_v63  ;;  %5201 = vmatpush3.bf16.msra.mxu1 %v5833_v2  ;;  %v5864_v2 = vld [vmem:[#allocation11 + $0x3a8] ss:$12 sps:$4 sm:$0xff]  }
 0x3b1   :  { %3286 = vmatprep.subr.bf16.mxu0 %v5810_v4  ;;  %5202 = vmatprep.subr.bf16.mxu1 %v5837_v5  ;;  %v5871_v4 = vld [vmem:[#allocation11 + $0x3c4] ss:$12 sps:$4 sm:$0xff]  }
 0x3b4   :  { %3287 = vmatpush1.bf16.msra.mxu0 %v5808_v6  ;;  %5203 = vmatpush3.bf16.msra.mxu1 %v5838_v7 }
 0x3b5   :  { %3288 = vmatprep.subr.bf16.mxu0 %v5813_v8  ;;  %5204 = vmatprep.subr.bf16.mxu1 %v5842_v9  ;;  %v5874_v8 = vld [vmem:[#allocation11 + $0x3dc] ss:$12 sps:$4 sm:$0xff]   ;;  %v5872_v9 = vld [vmem:[#allocation11 + $0x3d8] ss:$12 sps:$4 sm:$0xff]  }
 0x3b8   :  { %3289 = vmatpush1.bf16.msra.mxu0 %v5811_v10  ;;  %5205 = vmatpush3.bf16.msra.mxu1 %v5843_v11  ;;  %v5877_v10 = vld [vmem:[#allocation11 + $0x3f4] ss:$12 sps:$4 sm:$0xff]   ;;  %v5875_v11 = vld [vmem:[#allocation11 + $0x3f0] ss:$12 sps:$4 sm:$0xff]  }
 0x3b9   :  { %3290 = vmatprep.subr.bf16.mxu0 %v5816_v12  ;;  %5206 = vmatprep.subr.bf16.mxu1 %v5847_v13  ;;  %v5880_v12 = vld [vmem:[#allocation11 + $0x40c] ss:$12 sps:$4 sm:$0xff]   ;;  %v5878_v13 = vld [vmem:[#allocation11 + $0x408] ss:$12 sps:$4 sm:$0xff]  }
 0x3bc   :  { %3291 = vmatpush1.bf16.msra.mxu0 %v5814_v14  ;;  %5207 = vmatpush3.bf16.msra.mxu1 %v5848_v15  ;;  %v5883_v14 = vld [vmem:[#allocation11 + $0x424] ss:$12 sps:$4 sm:$0xff]   ;;  %v5881_v15 = vld [vmem:[#allocation11 + $0x420] ss:$12 sps:$4 sm:$0xff]  }
 0x3bd   :  { %3292 = vmatprep.subr.bf16.mxu0 %v5819_v17  ;;  %5208 = vmatprep.subr.bf16.mxu1 %v5852_v21  ;;  %v5886_v17 = vld [vmem:[#allocation11 + $0x43c] ss:$12 sps:$4 sm:$0xff]   ;;  %v5884_v21 = vld [vmem:[#allocation11 + $0x438] ss:$12 sps:$4 sm:$0xff]  }
 0x3c0   :  { %3293 = vmatpush1.bf16.msra.mxu0 %v5817_v22  ;;  %5209 = vmatpush3.bf16.msra.mxu1 %v5853_v23  ;;  %v5889_v22 = vld [vmem:[#allocation11 + $0x454] ss:$12 sps:$4 sm:$0xff]   ;;  %v5887_v23 = vld [vmem:[#allocation11 + $0x450] ss:$12 sps:$4 sm:$0xff]  }
 0x3c1   :  { %3294 = vmatprep.subr.bf16.mxu0 %v5822_v24  ;;  %5210 = vmatprep.subr.bf16.mxu1 %v5857_v25  ;;  %v5892_v24 = vld [vmem:[#allocation11 + $0x46c] ss:$12 sps:$4 sm:$0xff]   ;;  %v5893_v25 = vld [vmem:[#allocation13] ss:$16 sps:$4 sm:$0xff]  }
 0x3c4   :  { %3295 = vmatpush1.bf16.msra.mxu0 %v5820_v26  ;;  %5211 = vmatpush3.bf16.msra.mxu1 %v5858_v27  ;;  %v5895_v26 = vld [vmem:[#allocation13 + $0x4] ss:$16 sps:$4 sm:$0xff]  }
 0x3c5   :  { %3296 = vmatprep.subr.bf16.mxu0 %v5825_v28  ;;  %5212 = vmatprep.subr.bf16.mxu1 %v5862_v29  ;;  %v5901_v27 = vld [vmem:[#allocation13 + $0x24] ss:$16 sps:$4 sm:$0xff]   ;;  %v5898_v29 = vld [vmem:[#allocation13 + $0xc] ss:$16 sps:$4 sm:$0xff]  }
 0x3c6   :  { %v5890_v28 = vld [vmem:[#allocation11 + $0x468] ss:$12 sps:$4 sm:$0xff]  }
 0x3c8   :  { %3297 = vmatpush1.bf16.msra.mxu0 %v5823_v30  ;;  %5213 = vmatpush3.bf16.msra.mxu1 %v5863_v31  ;;  %v5899_v30 = vld [vmem:[#allocation13 + $0x20] ss:$16 sps:$4 sm:$0xff]   ;;  %v5907_v31 = vld [vmem:[#allocation13 + $0x44] ss:$16 sps:$4 sm:$0xff]  }
 0x3c9   :  { %3298 = vmatprep.subr.bf16.mxu0 %v5828_v32  ;;  %5214 = vmatprep.subr.bf16.mxu1 %v5867_v44  ;;  %v5896_v32 = vld [vmem:[#allocation13 + $0x8] ss:$16 sps:$4 sm:$0xff]   ;;  %v5904_v44 = vld [vmem:[#allocation13 + $0x2c] ss:$16 sps:$4 sm:$0xff]  }
 0x3cc   :  { %3299 = vmatpush1.bf16.msra.mxu0 %v5826_v33  ;;  %5215 = vmatpush3.bf16.msra.mxu1 %v5868_v34  ;;  %v5905_v33 = vld [vmem:[#allocation13 + $0x40] ss:$16 sps:$4 sm:$0xff]   ;;  %v5913_v34 = vld [vmem:[#allocation13 + $0x64] ss:$16 sps:$4 sm:$0xff]  }
 0x3cd   :  { %3309 = vmatprep.subr.bf16.mxu0 %v5831_v1  ;;  %4270 = vmatprep.subr.bf16.mxu1 %v5895_v26  ;;  %v5902_v1 = vld [vmem:[#allocation13 + $0x28] ss:$16 sps:$4 sm:$0xff]   ;;  %v5982_v26 = vld [vmem:[#allocation13 + $0x1cc] ss:$16 sps:$4 sm:$0xff]  }
 0x3cf   :  { %3301 = vmatmul.mubr.bf16.vlgmr.msra.gmra.mrb[12].mxu0 %v6601_v3 }
 0x3d0   :  { %3310 = vmatpush1.bf16.msra.mxu0 %v5829_v35  ;;  %v5910_v35 = vld [vmem:[#allocation13 + $0x4c] ss:$16 sps:$4 sm:$0xff]  }
 0x3d1   :  { %3311 = vmatprep.subr.bf16.mxu0 %v5836_v36  ;;  %v5911_v36 = vld [vmem:[#allocation13 + $0x60] ss:$16 sps:$4 sm:$0xff]  }
 0x3d4   :  { %3312 = vmatpush1.bf16.msra.mxu0 %v5834_v37  ;;  %v5919_v37 = vld [vmem:[#allocation13 + $0x84] ss:$16 sps:$4 sm:$0xff]  }
 0x3d5   :  { %3313 = vmatprep.subr.bf16.mxu0 %v5841_v38  ;;  %v5908_v38 = vld [vmem:[#allocation13 + $0x48] ss:$16 sps:$4 sm:$0xff]  }
 0x3d8   :  { %3314 = vmatpush1.bf16.msra.mxu0 %v5839_v39  ;;  %v5916_v39 = vld [vmem:[#allocation13 + $0x6c] ss:$16 sps:$4 sm:$0xff]  }
 0x3d9   :  { %3315 = vmatprep.subr.bf16.mxu0 %v5846_v40  ;;  %v5917_v40 = vld [vmem:[#allocation13 + $0x80] ss:$16 sps:$4 sm:$0xff]  }
 0x3dc   :  { %3316 = vmatpush1.bf16.msra.mxu0 %v5844_v41  ;;  %v5925_v41 = vld [vmem:[#allocation13 + $0xa4] ss:$16 sps:$4 sm:$0xff]  }
 0x3dd   :  { %3317 = vmatprep.subr.bf16.mxu0 %v5851_v42  ;;  %v5914_v42 = vld [vmem:[#allocation13 + $0x68] ss:$16 sps:$4 sm:$0xff]  }
 0x3e0   :  { %3318 = vmatpush1.bf16.msra.mxu0 %v5849_v43  ;;  %v5922_v43 = vld [vmem:[#allocation13 + $0x8c] ss:$16 sps:$4 sm:$0xff]  }
 0x3e1   :  { %3319 = vmatprep.subr.bf16.mxu0 %v5856_v45  ;;  %v5923_v45 = vld [vmem:[#allocation13 + $0xa0] ss:$16 sps:$4 sm:$0xff]  }
 0x3e4   :  { %3320 = vmatpush1.bf16.msra.mxu0 %v5854_v48  ;;  %v2225_v53 = vpop.f32.mrb[16].mxu1  ;;  %v5926_v48 = vld [vmem:[#allocation13 + $0xa8] ss:$16 sps:$4 sm:$0xff]  }
 0x3e5   :  { %v5297_v20 = vadd.f32 %v2225_v53, %v1255_v49  ;;  %v2227_v55 = vpop.f32.mrb[17].mxu1  ;;  %3321 = vmatprep.subr.bf16.mxu0 %v5861_v51  ;;  %v5931_v49 = vld [vmem:[#allocation13 + $0xc4] ss:$16 sps:$4 sm:$0xff]   ;;  %v5934_v51 = vld [vmem:[#allocation13 + $0xcc] ss:$16 sps:$4 sm:$0xff]  }
 0x3e6   :  { %v5298_v57 = vadd.f32 %v2227_v55, %v1259_v52  ;;  %v2229_v58 = vpop.f32.mrb[18].mxu1  ;;  %v5929_v52 = vld [vmem:[#allocation13 + $0xc0] ss:$16 sps:$4 sm:$0xff]   ;;  %v5932_v53 = vld [vmem:[#allocation13 + $0xc8] ss:$16 sps:$4 sm:$0xff]  }
 0x3e7   :  { %v2236_v61 = vmul.f32 0.1, %v5297_v20  ;;  %v2230_v62 = vpop.f32.mrb[19].mxu1  ;;  %v5935_v55 = vld [vmem:[#allocation13 + $0xe0] ss:$16 sps:$4 sm:$0xff]  }
 0x3e8   :  { %v2237_v63 = vmul.f32 0.1, %v5298_v57  ;;  %3322 = vmatpush1.bf16.msra.mxu0 %v5859_v54  ;;  %v5937_v54 = vld [vmem:[#allocation13 + $0xe4] ss:$16 sps:$4 sm:$0xff]   ;;  %v5946_v58 = vld [vmem:[#allocation13 + $0x10c] ss:$16 sps:$4 sm:$0xff]  }
 0x3e9   :  { %v2242_v3 = vmax.f32 %v5297_v20, %v2236_v61  ;;  %3323 = vmatprep.subr.bf16.mxu0 %v5866_v56  ;;  %v5940_v20 = vld [vmem:[#allocation13 + $0xec] ss:$16 sps:$4 sm:$0xff]   ;;  %v5938_v56 = vld [vmem:[#allocation13 + $0xe8] ss:$16 sps:$4 sm:$0xff]   ;;  %v5941_v61 = vld [vmem:[#allocation13 + $0x100] ss:$16 sps:$4 sm:$0xff]  }
 0x3ea   :  { %v2243_v5 = vmax.f32 %v5298_v57, %v2237_v63  ;;  %v5943_v57 = vld [vmem:[#allocation13 + $0x104] ss:$16 sps:$4 sm:$0xff]   ;;  %v5944_v62 = vld [vmem:[#allocation13 + $0x108] ss:$16 sps:$4 sm:$0xff]  }
 0x3eb   :  { %v2248_v7 = vpack.c.bf16 %v2242_v3, %v2242_v3  ;;  %v5949_v63 = vld [vmem:[#allocation13 + $0x124] ss:$16 sps:$4 sm:$0xff]   ;;  %v5950_v3 = vld [vmem:[#allocation13 + $0x128] ss:$16 sps:$4 sm:$0xff]  }
 0x3ec   :  { %v2249_v6 = vpack.c.bf16 %v2243_v5, %v2243_v5  ;;  %3324 = vmatpush1.bf16.msra.mxu0 %v5864_v2  ;;  %v5947_v2 = vld [vmem:[#allocation13 + $0x120] ss:$16 sps:$4 sm:$0xff]   ;;  %v5955_v5 = vld [vmem:[#allocation13 + $0x144] ss:$16 sps:$4 sm:$0xff]  }
 0x3ed   :  { %3325 = vmatprep.subr.bf16.mxu0 %v5871_v4  ;;  %v5952_v4 = vld [vmem:[#allocation13 + $0x12c] ss:$16 sps:$4 sm:$0xff]  }
 0x3ee   :  { %3341 = vmatprep.mubr.bf16.mxu0 %v2249_v6  ;;  %3462 = vmatprep.mubr.bf16.mxu1 %v2249_v6  ;;  %v5958_v6 = vld [vmem:[#allocation13 + $0x14c] ss:$16 sps:$4 sm:$0xff]  }
 0x3ef   :  { %3463 = vmatmul.mubr.bf16.vlgmr.msra.gmra.mrb[28].mxu1 %v2248_v7 }
 0x3f0   :  { %3326 = vmatpush1.bf16.msra.mxu0 %v5869_v59  ;;  %4271 = vmatpush1.bf16.msra.mxu1 %v5893_v25  ;;  %v5953_v59 = vld [vmem:[#allocation13 + $0x140] ss:$16 sps:$4 sm:$0xff]   ;;  %v5979_v25 = vld [vmem:[#allocation13 + $0x1c4] ss:$16 sps:$4 sm:$0xff]  }
 0x3f1   :  { %3327 = vmatprep.subr.bf16.mxu0 %v5874_v8  ;;  %4272 = vmatprep.subr.bf16.mxu1 %v5901_v27  ;;  %v5961_v8 = vld [vmem:[#allocation13 + $0x164] ss:$16 sps:$4 sm:$0xff]  }
 0x3f4   :  { %3328 = vmatpush1.bf16.msra.mxu0 %v5872_v9  ;;  %4273 = vmatpush1.bf16.msra.mxu1 %v5899_v30  ;;  %v5964_v9 = vld [vmem:[#allocation13 + $0x16c] ss:$16 sps:$4 sm:$0xff]  }
 0x3f5   :  { %3329 = vmatprep.subr.bf16.mxu0 %v5877_v10  ;;  %4274 = vmatprep.subr.bf16.mxu1 %v5907_v31  ;;  %v5959_v10 = vld [vmem:[#allocation13 + $0x160] ss:$16 sps:$4 sm:$0xff]  }
 0x3f8   :  { %3330 = vmatpush1.bf16.msra.mxu0 %v5875_v11  ;;  %4275 = vmatpush1.bf16.msra.mxu1 %v5905_v33  ;;  %v5962_v11 = vld [vmem:[#allocation13 + $0x168] ss:$16 sps:$4 sm:$0xff]   ;;  %v5988_v33 = vld [vmem:[#allocation13 + $0x1ec] ss:$16 sps:$4 sm:$0xff]  }
 0x3f9   :  { %3331 = vmatprep.subr.bf16.mxu0 %v5880_v12  ;;  %4276 = vmatprep.subr.bf16.mxu1 %v5913_v34  ;;  %v5967_v12 = vld [vmem:[#allocation13 + $0x184] ss:$16 sps:$4 sm:$0xff]   ;;  %v5983_v34 = vld [vmem:[#allocation13 + $0x1e0] ss:$16 sps:$4 sm:$0xff]  }
 0x3fc   :  { %3332 = vmatpush1.bf16.msra.mxu0 %v5878_v13  ;;  %4277 = vmatpush1.bf16.msra.mxu1 %v5911_v36  ;;  %v5970_v13 = vld [vmem:[#allocation13 + $0x18c] ss:$16 sps:$4 sm:$0xff]  }
 0x3fd   :  { %3333 = vmatprep.subr.bf16.mxu0 %v5883_v14  ;;  %4278 = vmatprep.subr.bf16.mxu1 %v5919_v37  ;;  %v5965_v14 = vld [vmem:[#allocation13 + $0x180] ss:$16 sps:$4 sm:$0xff]   ;;  %v5994_v36 = vld [vmem:[#allocation13 + $0x20c] ss:$16 sps:$4 sm:$0xff]   ;;  %v2442_v37 = vld [vmem:[%s6660_s8] sm:$0x7] }
 0x400   :  { %3334 = vmatpush1.bf16.msra.mxu0 %v5881_v15  ;;  %4279 = vmatpush1.bf16.msra.mxu1 %v5917_v40  ;;  %v5968_v15 = vld [vmem:[#allocation13 + $0x188] ss:$16 sps:$4 sm:$0xff]  }
 0x401   :  { %3335 = vmatprep.subr.bf16.mxu0 %v5886_v17  ;;  %4280 = vmatprep.subr.bf16.mxu1 %v5925_v41  ;;  %v5973_v17 = vld [vmem:[#allocation13 + $0x1a4] ss:$16 sps:$4 sm:$0xff]  }
 0x404   :  { %3336 = vmatpush1.bf16.msra.mxu0 %v5884_v21  ;;  %4281 = vmatpush1.bf16.msra.mxu1 %v5923_v45  ;;  %v5976_v21 = vld [vmem:[#allocation13 + $0x1ac] ss:$16 sps:$4 sm:$0xff]  }
 0x405   :  { %3337 = vmatprep.subr.bf16.mxu0 %v5889_v22  ;;  %4282 = vmatprep.subr.bf16.mxu1 %v5931_v49  ;;  %v5971_v22 = vld [vmem:[#allocation13 + $0x1a0] ss:$16 sps:$4 sm:$0xff]  }
 0x408   :  { %3338 = vmatpush1.bf16.msra.mxu0 %v5887_v23  ;;  %4283 = vmatpush1.bf16.msra.mxu1 %v5929_v52  ;;  %v5974_v23 = vld [vmem:[#allocation13 + $0x1a8] ss:$16 sps:$4 sm:$0xff]  }
 0x409   :  { %3339 = vmatprep.subr.bf16.mxu0 %v5892_v24  ;;  %4284 = vmatprep.subr.bf16.mxu1 %v5937_v54  ;;  %v2447_v54 = vrot.slane %v2442_v37, %v6531_v18 }
 0x40c   :  { %3340 = vmatpush1.bf16.msra.mxu0 %v5890_v28  ;;  %4285 = vmatpush1.bf16.msra.mxu1 %v5935_v55  ;;  %v5977_v28 = vld [vmem:[#allocation13 + $0x1c0] ss:$16 sps:$4 sm:$0xff]  }
 0x40d   :  { %4352 = vmatprep.subr.bf16.mxu0 %v5898_v29  ;;  %4286 = vmatprep.subr.bf16.mxu1 %v5943_v57  ;;  %v5980_v29 = vld [vmem:[#allocation13 + $0x1c8] ss:$16 sps:$4 sm:$0xff]  }
 0x40f   :  { %3342 = vmatmul.mubr.bf16.vlgmr.msra.gmra.mrb[12].mxu0 %v2248_v7  ;;  %v5956_v7 = vld [vmem:[#allocation13 + $0x148] ss:$16 sps:$4 sm:$0xff]  }
 0x410   :  { %4353 = vmatpush1.bf16.msra.mxu0 %v5896_v32  ;;  %4287 = vmatpush1.bf16.msra.mxu1 %v5941_v61 }
 0x411   :  { %4354 = vmatprep.subr.bf16.mxu0 %v5904_v44  ;;  %4288 = vmatprep.subr.bf16.mxu1 %v5949_v63  ;;  %v5985_v44 = vld [vmem:[#allocation13 + $0x1e4] ss:$16 sps:$4 sm:$0xff]  }
 0x414   :  { %4355 = vmatpush1.bf16.msra.mxu0 %v5902_v1  ;;  %4289 = vmatpush1.bf16.msra.mxu1 %v5947_v2  ;;  %v5986_v1 = vld [vmem:[#allocation13 + $0x1e8] ss:$16 sps:$4 sm:$0xff]  }
 0x415   :  { %4356 = vmatprep.subr.bf16.mxu0 %v5910_v35  ;;  %4290 = vmatprep.subr.bf16.mxu1 %v5955_v5  ;;  %v5991_v35 = vld [vmem:[#allocation13 + $0x204] ss:$16 sps:$4 sm:$0xff]  }
 0x416   :  { %v151_v5 = vld [vmem:[#allocation2] sm:$0xff] }
 0x418   :  { %4357 = vmatpush1.bf16.msra.mxu0 %v5908_v38  ;;  %4291 = vmatpush1.bf16.msra.mxu1 %v5953_v59  ;;  %v2455_v38 = vrot.slane %v2442_v37, %v6547_v50  ;;  %v5989_v59 = vld [vmem:[#allocation13 + $0x200] ss:$16 sps:$4 sm:$0xff]  }
 0x419   :  { %4358 = vmatprep.subr.bf16.mxu0 %v5916_v39  ;;  %4292 = vmatprep.subr.bf16.mxu1 %v5961_v8 }
 0x41c   :  { %4359 = vmatpush1.bf16.msra.mxu0 %v5914_v42  ;;  %4293 = vmatpush1.bf16.msra.mxu1 %v5959_v10  ;;  %v6000_v10 = vld [vmem:[#allocation13 + $0x22c] ss:$16 sps:$4 sm:$0xff]  }
 0x41d   :  { %4360 = vmatprep.subr.bf16.mxu0 %v5922_v43  ;;  %4294 = vmatprep.subr.bf16.mxu1 %v5967_v12  ;;  %v5995_v12 = vld [vmem:[#allocation13 + $0x220] ss:$16 sps:$4 sm:$0xff]  }
 0x420   :  { %4361 = vmatpush1.bf16.msra.mxu0 %v5920_v46  ;;  %4295 = vmatpush1.bf16.msra.mxu1 %v5965_v14  ;;  %v6003_v14 = vld [vmem:[#allocation13 + $0x244] ss:$16 sps:$4 sm:$0xff]  }
 0x421   :  { %4362 = vmatprep.subr.bf16.mxu0 %v5928_v47  ;;  %4296 = vmatprep.subr.bf16.mxu1 %v5973_v17  ;;  %v6001_v17 = vld [vmem:[#allocation13 + $0x240] ss:$16 sps:$4 sm:$0xff]  }
 0x424   :  { %4363 = vmatpush1.bf16.msra.mxu0 %v5926_v48  ;;  %4297 = vmatpush1.bf16.msra.mxu1 %v5971_v22  ;;  %v6009_v22 = vld [vmem:[#allocation13 + $0x264] ss:$16 sps:$4 sm:$0xff]  }
 0x425   :  { %4364 = vmatprep.subr.bf16.mxu0 %v5934_v51  ;;  %4298 = vmatprep.subr.bf16.mxu1 %v5979_v25  ;;  %v6010_v25 = vld [vmem:[#allocation13 + $0x268] ss:$16 sps:$4 sm:$0xff]  }
 0x428   :  { %4365 = vmatpush1.bf16.msra.mxu0 %v5932_v53  ;;  %4299 = vmatpush1.bf16.msra.mxu1 %v5977_v28  ;;  %v6013_v28 = vld [vmem:[#allocation13 + $0x280] ss:$16 sps:$4 sm:$0xff]  }
 0x429   :  { %4366 = vmatprep.subr.bf16.mxu0 %v5940_v20  ;;  %4300 = vmatprep.subr.bf16.mxu1 %v5985_v44  ;;  %v2451_v20 = vrot.slane %v2442_v37, %v6534_v19  ;;  %v6022_v44 = vld [vmem:[#allocation13 + $0x2a8] ss:$16 sps:$4 sm:$0xff]   ;;  %v6036_v37 = vld [vmem:[#allocation13 + $0x2ec] ss:$16 sps:$4 sm:$0xff]  }
 0x42c   :  { %4367 = vmatpush1.bf16.msra.mxu0 %v5938_v56  ;;  %4301 = vmatpush1.bf16.msra.mxu1 %v5983_v34  ;;  %v6030_v34 = vld [vmem:[#allocation13 + $0x2cc] ss:$16 sps:$4 sm:$0xff]  }
 0x42d   :  { %4368 = vmatprep.subr.bf16.mxu0 %v5946_v58  ;;  %4311 = vmatprep.subr.bf16.mxu1 %v5991_v35  ;;  %v6028_v35 = vld [vmem:[#allocation13 + $0x2c8] ss:$16 sps:$4 sm:$0xff]  }
 0x430   :  { %4369 = vmatpush1.bf16.msra.mxu0 %v5944_v62 }
 0x431   :  { %4370 = vmatprep.subr.bf16.mxu0 %v5952_v4 }
 0x434   :  { %4371 = vmatpush1.bf16.msra.mxu0 %v5950_v3 }
 0x435   :  { %4372 = vmatprep.subr.bf16.mxu0 %v5958_v6 }
 0x438   :  { %4373 = vmatpush1.bf16.msra.mxu0 %v5956_v7  ;;  %v5992_v7 = vld [vmem:[#allocation13 + $0x208] ss:$16 sps:$4 sm:$0xff]  }
 0x439   :  { %4374 = vmatprep.subr.bf16.mxu0 %v5964_v9  ;;  %v5997_v9 = vld [vmem:[#allocation13 + $0x224] ss:$16 sps:$4 sm:$0xff]  }
 0x43c   :  { %4375 = vmatpush1.bf16.msra.mxu0 %v5962_v11  ;;  %v3479_v11 = vpack.c.bf16 %v151_v5, %v151_v5  ;;  %v6070_v5 = vld [vmem:[#allocation13 + $0x3a8] ss:$16 sps:$4 sm:$0xff]  }
 0x43d   :  { %4376 = vmatprep.subr.bf16.mxu0 %v5970_v13  ;;  %v5998_v13 = vld [vmem:[#allocation13 + $0x228] ss:$16 sps:$4 sm:$0xff]  }
 0x440   :  { %4377 = vmatpush1.bf16.msra.mxu0 %v5968_v15  ;;  %v6006_v15 = vld [vmem:[#allocation13 + $0x24c] ss:$16 sps:$4 sm:$0xff]  }
 0x441   :  { %4378 = vmatprep.subr.bf16.mxu0 %v5976_v21  ;;  %v6004_v21 = vld [vmem:[#allocation13 + $0x248] ss:$16 sps:$4 sm:$0xff]  }
 0x444   :  { %4379 = vmatpush1.bf16.msra.mxu0 %v5974_v23  ;;  %v6012_v23 = vld [vmem:[#allocation13 + $0x26c] ss:$16 sps:$4 sm:$0xff]  }
 0x445   :  { %4380 = vmatprep.subr.bf16.mxu0 %v5982_v26  ;;  %v6015_v26 = vld [vmem:[#allocation13 + $0x284] ss:$16 sps:$4 sm:$0xff]  }
 0x448   :  { %4381 = vmatpush1.bf16.msra.mxu0 %v5980_v29  ;;  %v6016_v29 = vld [vmem:[#allocation13 + $0x288] ss:$16 sps:$4 sm:$0xff]  }
 0x449   :  { %4382 = vmatprep.subr.bf16.mxu0 %v5988_v33  ;;  %v6027_v33 = vld [vmem:[#allocation13 + $0x2c4] ss:$16 sps:$4 sm:$0xff]  }
 0x44c   :  { %4383 = vmatpush1.bf16.msra.mxu0 %v5986_v1  ;;  %v6025_v1 = vld [vmem:[#allocation13 + $0x2c0] ss:$16 sps:$4 sm:$0xff]  }
 0x44d   :  { %4393 = vmatprep.subr.bf16.mxu0 %v5994_v36  ;;  %v6033_v36 = vld [vmem:[#allocation13 + $0x2e4] ss:$16 sps:$4 sm:$0xff]  }
 0x462   :  { %v5172_v24 = vpop.f32.mrb[20].mxu1 }
 0x463   :  { %v5173_v27 = vpop.f32.mrb[21].mxu1 }
 0x464   :  { %v5174_v30 = vadd.f32 %v5173_v27, %v5172_v24  ;;  %v5175_v31 = vpop.f32.mrb[22].mxu1  ;;  %v6007_v24 = vld [vmem:[#allocation13 + $0x260] ss:$16 sps:$4 sm:$0xff]   ;;  %v6018_v27 = vld [vmem:[#allocation13 + $0x28c] ss:$16 sps:$4 sm:$0xff]  }
 0x465   :  { %v5176_v32 = vpop.f32.mrb[23].mxu1  ;;  %v6024_v31 = vld [vmem:[#allocation13 + $0x2ac] ss:$16 sps:$4 sm:$0xff]  }
 0x466   :  { %v3385_v41 = vadd.f32 %v5174_v30, %v2455_v38  ;;  %v6021_v30 = vld [vmem:[#allocation13 + $0x2a4] ss:$16 sps:$4 sm:$0xff]   ;;  %v6019_v32 = vld [vmem:[#allocation13 + $0x2a0] ss:$16 sps:$4 sm:$0xff]  }
 0x467   :  { %v6031_v38 = vld [vmem:[#allocation13 + $0x2e0] ss:$16 sps:$4 sm:$0xff]  }
 0x482   :  { %v5194_v39 = vpop.f32.mrb[24].mxu1 }
 0x483   :  { %v5195_v40 = vpop.f32.mrb[25].mxu1 }
 0x484   :  { %v5196_v42 = vadd.f32 %v5195_v40, %v5194_v39  ;;  %v5197_v43 = vpop.f32.mrb[26].mxu1  ;;  %v6034_v39 = vld [vmem:[#allocation13 + $0x2e8] ss:$16 sps:$4 sm:$0xff]   ;;  %v6039_v40 = vld [vmem:[#allocation13 + $0x304] ss:$16 sps:$4 sm:$0xff]  }
 0x485   :  { %v5198_v45 = vpop.f32.mrb[27].mxu1  ;;  %v6040_v43 = vld [vmem:[#allocation13 + $0x308] ss:$16 sps:$4 sm:$0xff]  }
 0x486   :  { %v3425_v46 = vadd.f32 %v5196_v42, %v3385_v41  ;;  %v6042_v41 = vld [vmem:[#allocation13 + $0x30c] ss:$16 sps:$4 sm:$0xff]   ;;  %v6037_v42 = vld [vmem:[#allocation13 + $0x300] ss:$16 sps:$4 sm:$0xff]   ;;  %v6045_v45 = vld [vmem:[#allocation13 + $0x324] ss:$16 sps:$4 sm:$0xff]  }
 0x4c2   :  { %v5216_v47 = vpop.f32.mrb[28].mxu1 }
 0x4c3   :  { %v5217_v48 = vpop.f32.mrb[29].mxu1 }
 0x4c4   :  { %v5218_v49 = vadd.f32 %v5217_v48, %v5216_v47  ;;  %v5219_v51 = vpop.f32.mrb[30].mxu1  ;;  %v6043_v47 = vld [vmem:[#allocation13 + $0x320] ss:$16 sps:$4 sm:$0xff]   ;;  %v6046_v48 = vld [vmem:[#allocation13 + $0x328] ss:$16 sps:$4 sm:$0xff]  }
 0x4c5   :  { %v5220_v52 = vpop.f32.mrb[31].mxu1  ;;  %v6054_v51 = vld [vmem:[#allocation13 + $0x34c] ss:$16 sps:$4 sm:$0xff]  }
 0x4c6   :  { %v6613_v53 = vadd.f32 %v5218_v49, %v3425_v46  ;;  %v6048_v46 = vld [vmem:[#allocation13 + $0x32c] ss:$16 sps:$4 sm:$0xff]   ;;  %v6051_v49 = vld [vmem:[#allocation13 + $0x344] ss:$16 sps:$4 sm:$0xff]   ;;  %v6049_v52 = vld [vmem:[#allocation13 + $0x340] ss:$16 sps:$4 sm:$0xff]  }
 0x4e2   :  { %v3343_v55 = vpop.f32.mrb[12].mxu0 }
 0x4e3   :  { %v5299_v56 = vadd.f32 %v3343_v55, %v2447_v54  ;;  %v3345_v57 = vpop.f32.mrb[13].mxu0  ;;  %v6052_v54 = vld [vmem:[#allocation13 + $0x348] ss:$16 sps:$4 sm:$0xff]   ;;  %v6060_v55 = vld [vmem:[#allocation13 + $0x36c] ss:$16 sps:$4 sm:$0xff]  }
 0x4e4   :  { %v5300_v58 = vadd.f32 %v3345_v57, %v2451_v20  ;;  %v3347_v61 = vpop.f32.mrb[14].mxu0  ;;  %v6057_v20 = vld [vmem:[#allocation13 + $0x364] ss:$16 sps:$4 sm:$0xff]   ;;  %v6058_v57 = vld [vmem:[#allocation13 + $0x368] ss:$16 sps:$4 sm:$0xff]  }
 0x4e5   :  { %v3470_v62 = vmul.f32 0.1, %v5299_v56  ;;  %v3348_v63 = vpop.f32.mrb[15].mxu0  ;;  %v6066_v61 = vld [vmem:[#allocation13 + $0x38c] ss:$16 sps:$4 sm:$0xff]  }
 0x4e6   :  { %v3471_v2 = vmul.f32 0.1, %v5300_v58  ;;  %v6064_v63 = vld [vmem:[#allocation13 + $0x388] ss:$16 sps:$4 sm:$0xff]  }
 0x4e7   :  { %v3473_v3 = vmax.f32 %v5299_v56, %v3470_v62  ;;  %v6055_v56 = vld [vmem:[#allocation13 + $0x360] ss:$16 sps:$4 sm:$0xff]  }
 0x4e8   :  { %v3474_v4 = vmax.f32 %v5300_v58, %v3471_v2  ;;  %v6063_v58 = vld [vmem:[#allocation13 + $0x384] ss:$16 sps:$4 sm:$0xff]   ;;  %v6061_v62 = vld [vmem:[#allocation13 + $0x380] ss:$16 sps:$4 sm:$0xff]  }
 0x4e9   :  { %v3476_v8 = vpack.c.bf16 %v3473_v3, %v3473_v3  ;;  %v6069_v2 = vld [vmem:[#allocation13 + $0x3a4] ss:$16 sps:$4 sm:$0xff]   ;;  %v6072_v3 = vld [vmem:[#allocation13 + $0x3ac] ss:$16 sps:$4 sm:$0xff]  }
 0x4ea   :  { %v3477_v6 = vpack.c.bf16 %v3474_v4, %v3474_v4  ;;  %v6067_v4 = vld [vmem:[#allocation13 + $0x3a0] ss:$16 sps:$4 sm:$0xff]  }
 0x4ec   :  { %4302 = vmatprep.mubr.bf16.mxu1 %v3477_v6  ;;  %4384 = vmatprep.mubr.bf16.mxu0 %v3477_v6  ;;  %v6075_v6 = vld [vmem:[#allocation13 + $0x3c4] ss:$16 sps:$4 sm:$0xff]  }
 0x4ed   :  { %4303 = vmatmul.mubr.bf16.vlgmr.msra.gmra.mrb[32].mxu1 %v3476_v8  ;;  %4385 = vmatmul.mubr.bf16.vlgmr.msra.gmra.mrb[16].mxu0 %v3476_v8  ;;  %v6076_v8 = vld [vmem:[#allocation13 + $0x3c8] ss:$16 sps:$4 sm:$0xff]  }
 0x4ee   :  { %4312 = vmatpush1.bf16.msra.mxu1 %v5989_v59  ;;  %4394 = vmatpush1.bf16.msra.mxu0 %v5992_v7  ;;  %v6078_v59 = vld [vmem:[#allocation13 + $0x3cc] ss:$16 sps:$4 sm:$0xff]   ;;  %v6073_v7 = vld [vmem:[#allocation13 + $0x3c0] ss:$16 sps:$4 sm:$0xff]  }
 0x4ef   :  { %4313 = vmatprep.subr.bf16.mxu1 %v5997_v9  ;;  %4395 = vmatprep.subr.bf16.mxu0 %v6000_v10  ;;  %v3472_v9 = vmul.f32 0.1, %v6613_v53  ;;  %v6081_v10 = vld [vmem:[#allocation13 + $0x3e4] ss:$16 sps:$4 sm:$0xff]  }
 0x4f0   :  { %4343 = vmatprep.mubr.bf16.mxu1 %v3479_v11  ;;  %4425 = vmatprep.mubr.bf16.mxu0 %v3479_v11  ;;  %v6084_v11 = vld [vmem:[#allocation13 + $0x3ec] ss:$16 sps:$4 sm:$0xff]  }
 0x4f2   :  { %4314 = vmatpush1.bf16.msra.mxu1 %v5995_v12  ;;  %4396 = vmatpush1.bf16.msra.mxu0 %v5998_v13  ;;  %v6079_v12 = vld [vmem:[#allocation13 + $0x3e0] ss:$16 sps:$4 sm:$0xff]   ;;  %v6082_v13 = vld [vmem:[#allocation13 + $0x3e8] ss:$16 sps:$4 sm:$0xff]  }
 0x4f3   :  { %4315 = vmatprep.subr.bf16.mxu1 %v6003_v14  ;;  %4397 = vmatprep.subr.bf16.mxu0 %v6006_v15  ;;  %v3475_v14 = vmax.f32 %v6613_v53, %v3472_v9  ;;  %v6087_v53 = vld [vmem:[#allocation14 + $0x10] sm:$0xff]  }
 0x4f5   :  { %v3478_v15 = vpack.c.bf16 %v3475_v14, %v3475_v14 }
 0x4f6   :  { %4316 = vmatpush1.bf16.msra.mxu1 %v6001_v17  ;;  %4398 = vmatpush1.bf16.msra.mxu0 %v6004_v21  ;;  %v6085_v17 = vld [vmem:[#allocation14] sm:$0xff]   ;;  %v6086_v21 = vld [vmem:[#allocation14 + $0x8] sm:$0xff]  }
 0x4f7   :  { %4317 = vmatprep.subr.bf16.mxu1 %v6009_v22  ;;  %4399 = vmatprep.subr.bf16.mxu0 %v6012_v23  ;;  %v6088_v22 = vld [vmem:[#allocation14 + $0x18] sm:$0xff]   ;;  %v6089_v23 = vld [vmem:[#allocation14 + $0x20] sm:$0xff]  }
 0x4fa   :  { %4318 = vmatpush1.bf16.msra.mxu1 %v6007_v24  ;;  %4400 = vmatpush1.bf16.msra.mxu0 %v6010_v25  ;;  %v6090_v24 = vld [vmem:[#allocation14 + $0x28] sm:$0xff]   ;;  %v6091_v25 = vld [vmem:[#allocation14 + $0x30] sm:$0xff]  }
 0x4fb   :  { %4319 = vmatprep.subr.bf16.mxu1 %v6015_v26  ;;  %4401 = vmatprep.subr.bf16.mxu0 %v6018_v27  ;;  %v6092_v26 = vld [vmem:[#allocation14 + $0x38] sm:$0xff]   ;;  %v3608_v27 = vld [vmem:[%s6662_s10] sm:$0xf] }
 0x4fe   :  { %4320 = vmatpush1.bf16.msra.mxu1 %v6013_v28  ;;  %4402 = vmatpush1.bf16.msra.mxu0 %v6016_v29  ;;  %v3613_v28 = vrot.slane %v3608_v27, %v6531_v18  ;;  %v3617_v29 = vrot.slane %v3608_v27, %v6534_v19  ;;  %v3621_v19 = vrot.slane %v3608_v27, %v6547_v50 }
 0x4ff   :  { %4321 = vmatprep.subr.bf16.mxu1 %v6021_v30  ;;  %4403 = vmatprep.subr.bf16.mxu0 %v6024_v31 }
 0x502   :  { %4322 = vmatpush1.bf16.msra.mxu1 %v6019_v32  ;;  %4404 = vmatpush1.bf16.msra.mxu0 %v6022_v44 }
 0x503   :  { %4323 = vmatprep.subr.bf16.mxu1 %v6027_v33  ;;  %4405 = vmatprep.subr.bf16.mxu0 %v6030_v34 }
 0x506   :  { %4324 = vmatpush1.bf16.msra.mxu1 %v6025_v1  ;;  %4406 = vmatpush1.bf16.msra.mxu0 %v6028_v35 }
 0x507   :  { %4325 = vmatprep.subr.bf16.mxu1 %v6033_v36  ;;  %4407 = vmatprep.subr.bf16.mxu0 %v6036_v37 }
 0x50a   :  { %4326 = vmatpush1.bf16.msra.mxu1 %v6031_v38  ;;  %4408 = vmatpush1.bf16.msra.mxu0 %v6034_v39  ;;  %v3625_v39 = vrot.slane %v3608_v27, %v1250_v60 }
 0x50b   :  { %4327 = vmatprep.subr.bf16.mxu1 %v6039_v40  ;;  %4409 = vmatprep.subr.bf16.mxu0 %v6042_v41 }
 0x50e   :  { %4328 = vmatpush1.bf16.msra.mxu1 %v6037_v42  ;;  %4410 = vmatpush1.bf16.msra.mxu0 %v6040_v43 }
 0x50f   :  { %4329 = vmatprep.subr.bf16.mxu1 %v6045_v45  ;;  %4411 = vmatprep.subr.bf16.mxu0 %v6048_v46 }
 0x512   :  { %4330 = vmatpush1.bf16.msra.mxu1 %v6043_v47  ;;  %4412 = vmatpush1.bf16.msra.mxu0 %v6046_v48 }
 0x513   :  { %4331 = vmatprep.subr.bf16.mxu1 %v6051_v49  ;;  %4413 = vmatprep.subr.bf16.mxu0 %v6054_v51  ;;  %v152_v49 = vld [vmem:[#allocation2 + $0x8] sm:$0xff] }
 0x516   :  { %4332 = vmatpush1.bf16.msra.mxu1 %v6049_v52  ;;  %4414 = vmatpush1.bf16.msra.mxu0 %v6052_v54 }
 0x517   :  { %4333 = vmatprep.subr.bf16.mxu1 %v6057_v20  ;;  %4415 = vmatprep.subr.bf16.mxu0 %v6060_v55 }
 0x51a   :  { %4334 = vmatpush1.bf16.msra.mxu1 %v6055_v56  ;;  %4416 = vmatpush1.bf16.msra.mxu0 %v6058_v57 }
 0x51b   :  { %4335 = vmatprep.subr.bf16.mxu1 %v6063_v58  ;;  %4417 = vmatprep.subr.bf16.mxu0 %v6066_v61  ;;  %v5107_v58 = vld [vmem:[%s6664_s12] ss:$0 sm:$0xff] }
 0x51e   :  { %4336 = vmatpush1.bf16.msra.mxu1 %v6061_v62  ;;  %4418 = vmatpush1.bf16.msra.mxu0 %v6064_v63 }
 0x51f   :  { %4337 = vmatprep.subr.bf16.mxu1 %v6069_v2  ;;  %4419 = vmatprep.subr.bf16.mxu0 %v6072_v3 }
 0x522   :  { %4338 = vmatpush1.bf16.msra.mxu1 %v6067_v4  ;;  %4420 = vmatpush1.bf16.msra.mxu0 %v6070_v5 }
 0x523   :  { %4339 = vmatprep.subr.bf16.mxu1 %v6075_v6  ;;  %4421 = vmatprep.subr.bf16.mxu0 %v6078_v59 }
 0x526   :  { %4340 = vmatpush1.bf16.msra.mxu1 %v6073_v7  ;;  %4422 = vmatpush1.bf16.msra.mxu0 %v6076_v8 }
 0x527   :  { %4341 = vmatprep.subr.bf16.mxu1 %v6081_v10  ;;  %4423 = vmatprep.subr.bf16.mxu0 %v6084_v11 }
 0x52a   :  { %4342 = vmatpush1.bf16.msra.mxu1 %v6079_v12  ;;  %4424 = vmatpush1.bf16.msra.mxu0 %v6082_v13 }
 0x52b   :  { %5271 = vmatprep.subr.bf16.mxu1 %v6335_v0 }
 0x52d   :  { %4344 = vmatmul.mubr.bf16.vlgmr.msra.gmra.mrb[32].mxu1 %v3478_v15  ;;  %4426 = vmatmul.mubr.bf16.vlgmr.msra.gmra.mrb[16].mxu0 %v3478_v15 }
 0x52e   :  { %5287 = vmatprep.mubr.msk.bf16.mxu1 %vm6337_vm0, %v6335_v0  ;;  %5272 = vmatpush3.bf16.msra.mxu1 %v6085_v17 }
 0x52f   :  { %5273 = vmatprep.subr.bf16.mxu1 %v6335_v0 }
 0x532   :  { %5274 = vmatpush3.bf16.msra.mxu1 %v6086_v21 }
 0x533   :  { %5275 = vmatprep.subr.bf16.mxu1 %v6335_v0 }
 0x536   :  { %5276 = vmatpush3.bf16.msra.mxu1 %v6087_v53 }
 0x537   :  { %5277 = vmatprep.subr.bf16.mxu1 %v6335_v0 }
 0x53a   :  { %5278 = vmatpush3.bf16.msra.mxu1 %v6088_v22 }
 0x53b   :  { %5279 = vmatprep.subr.bf16.mxu1 %v6335_v0 }
 0x53e   :  { %5280 = vmatpush3.bf16.msra.mxu1 %v6089_v23 }
 0x53f   :  { %5281 = vmatprep.subr.bf16.mxu1 %v6335_v0 }
 0x542   :  { %5282 = vmatpush3.bf16.msra.mxu1 %v6090_v24 }
 0x543   :  { %5283 = vmatprep.subr.bf16.mxu1 %v6335_v0 }
 0x546   :  { %5284 = vmatpush3.bf16.msra.mxu1 %v6091_v25 }
 0x547   :  { %5285 = vmatprep.subr.bf16.mxu1 %v6335_v0 }
 0x54a   :  { %5286 = vmatpush3.bf16.msra.mxu1 %v6092_v26 }
 0x600   :  { %v4345_v30 = vpop.f32.mrb[32].mxu1  ;;  %v4427_v31 = vpop.f32.mrb[16].mxu0 }
 0x601   :  { %v5301_v32 = vadd.f32 %v4345_v30, %v3613_v28  ;;  %v4347_v44 = vpop.f32.mrb[33].mxu1  ;;  %v4429_v33 = vpop.f32.mrb[17].mxu0  ;;  %v5303_v41 = vadd.f32 %v4427_v31, %v3621_v19 }
 0x602   :  { %v5302_v34 = vadd.f32 %v4347_v44, %v3617_v29  ;;  %v4349_v1 = vpop.f32.mrb[34].mxu1  ;;  %v4431_v35 = vpop.f32.mrb[18].mxu0  ;;  %v5304_v18 = vadd.f32 %v4429_v33, %v3625_v39 }
 0x603   :  { %v5104_v36 = vmul.f32 -1.442695, %v5301_v32  ;;  %v4350_v37 = vpop.f32.mrb[35].mxu1  ;;  %v4432_v0 = vpop.f32.mrb[19].mxu0 }
 0x604   :  { %v5105_v38 = vmul.f32 -1.442695, %v5302_v34  ;;  %v5106_v40 = vmul.f32 -1.442695, %v5304_v18 }
 0x605   :  { %6093 = vpow2.f32 %v5104_v36 }
 0x606   :  { %6095 = vpow2.f32 %v5105_v38 }
 0x607   :  { %6097 = vpow2.f32 %v5106_v40 }
 0x608   :  { %6099 = vtanh.f32 %v5303_v41 }
 0x60f   :  { %v6094_v42 = vpop.eup %6093 }
 0x610   :  { %v6096_v43 = vpop.eup %6095  ;;  %v4437_v45 = vadd.f32 1.0, %v6094_v42 }
 0x611   :  { %v4443_v46 = vadd.f32 1.0, %v6096_v43  ;;  %v6098_v47 = vpop.eup %6097 }
 0x612   :  { %6101 = vrcp.f32 %v4437_v45  ;;  %v6100_v48 = vpop.eup %6099  ;;  %v4450_v52 = vadd.f32 1.0, %v6098_v47 }
 0x613   :  { %6103 = vrcp.f32 %v4443_v46 }
 0x614   :  { %6105 = vrcp.f32 %v4450_v52 }
 0x61c   :  { %v6102_v16 = vpop.eup %6101 }
 0x61d   :  { %v6104_v60 = vpop.eup %6103  ;;  %v4454_v51 = vmul.f32 %v6102_v16, %v6100_v48 }
 0x61e   :  { %v4453_v54 = vmul.f32 %v6104_v60, %v152_v49  ;;  %v6106_v50 = vpop.eup %6105 }
 0x620   :  { %v4455_v20 = vadd.f32 %v4454_v51, %v4453_v54 }
 0x622   :  { %6107 = vtanh.f32 %v4455_v20  ;;  %4572 = vst [vmem:[#allocation16 + $0x10] sm:$0xff] %v4455_v20 }
 0x62c   :  { %v6108_v55 = vpop.eup %6107 }
 0x62d   :  { %v4457_v56 = vmul.f32 %v6108_v55, %v6106_v50 }
 0x62f   :  { %v4458_v57 = vpack.c.bf16 %v4457_v56, %v4457_v56  ;;  %4571 = vst [vmem:[#allocation16 + $0x8] sm:$0xff] %v4457_v56 }
 0x631   :  { %5288 = vmatmul.mubr.bf16.vlgmr.msra.gmra.mrb[36].mxu1 %v4458_v57 }
 0x704   :  { %v4564_v61 = vpop.f32.mrb[36].mxu1 }
 0x705   :  { %v4565_v62 = vadd.f32 %v5107_v58, %v4564_v61  ;;  %v5289_v63 = vpop.f32.mrb[37].mxu1 }
 0x706   :  { %v4567_v2 = vpop.f32.mrb[38].mxu1 }
 0x707   :  { %4570 = vst [vmem:[#allocation16] sm:$0xff] %v4565_v62  ;;  %v5290_v3 = vpop.f32.mrb[39].mxu1 }
 0x708   :  { %6296 = shalt.err (!%p6293_p12)
}
 0x709   :  { %s6297_s12 = scalar_lea.hbm %s6665_s13, 384 }
 0x70a   :  { %p6298_p13 = scmp.ne.s32.totalorder %s6665_s13, %s6297_s12  ;;  %p6301_p0 = scmp.lt.u32.totalorder %s6297_s12, %s6665_s13 }
 0x70c   :  { %p6303_p1 = pnand %p6301_p0, %p6298_p13 }
 0x70e   :  { %6306 = shalt.err (!%p6303_p1)
}
 0x70f   :  { %4582 = dma.vmem_to_hbm [thread:$0]  %s4580_s5, 384, %s6665_s13, [#allocation4]  }
 0x710   :  { %6317 = dma.done.wait [#allocation4], 384  }
 0x711   :  { %6318 = vsyncadd [#allocation4], 4294966912 }
 0x712   :  { %4586 = vsyncpa [#allocation3], 1 }
 0x713   :  { %4587 = vsyncpa [#allocation6], 1 }
 0x714   :  { %4588 = vsyncpa [#allocation9], 1 }
 0x715   :  { %4589 = vsyncpa [#allocation12], 1 }
 0x716   :  { %4590 = vsyncpa [#allocation15], 1 }
 0x717   :  { %4591 = vsyncpa [#allocation4], 1 }

// kernel: tpu_custom_call.1
= control target key start
LH: loop header
LB: loop body
LE: loop exit
PB: predicated region body
PF: predicated region fallthrough
CT: control target
= control target key end

     0   :  { %18 = vsyncpa [#allocation3], 0  ;;  %s6652_s0 = inlined_call_operand.hbm [shape: f32[8,384], index: 0, kind: input, shape index: {}]   ;;  %s6653_s1 = inlined_call_operand.hbm [shape: bf16[128,384], index: 1, kind: input, shape index: {}]   ;;  %s6654_s2 = inlined_call_operand.hbm [shape: f32[1,384], index: 2, kind: input, shape index: {}]   ;;  %s6655_s3 = inlined_call_operand.hbm [shape: bf16[384,384], index: 3, kind: input, shape index: {}]   ;;  %s6656_s4 = inlined_call_operand.vmem [shape: f32[1,384], index: 4, kind: input, shape index: {}]   ;;  %s6657_s5 = inlined_call_operand.hbm [shape: bf16[384,768], index: 5, kind: input, shape index: {}]   ;;  %s6658_s6 = inlined_call_operand.vmem [shape: f32[1,768], index: 6, kind: input, shape index: {}]   ;;  %s6659_s7 = inlined_call_operand.hbm [shape: bf16[768,384], index: 7, kind: input, shape index: {}]   ;;  %s6660_s8 = inlined_call_operand.vmem [shape: f32[1,384], index: 8, kind: input, shape index: {}]   ;;  %s6661_s9 = inlined_call_operand.hbm [shape: bf16[512,512], index: 9, kind: input, shape index: {}]   ;;  %s6662_s10 = inlined_call_operand.vmem [shape: f32[1,512], index: 10, kind: input, shape index: {}]   ;;  %s6663_s11 = inlined_call_operand.hbm [shape: bf16[128,128], index: 11, kind: input, shape index: {}]   ;;  %s6664_s12 = inlined_call_operand.vmem [shape: f32[1,128], index: 12, kind: input, shape index: {}]   ;;  %s6665_s13 = inlined_call_operand.hbm [shape: f32[8,384], index: 13, kind: output, shape index: {}]  }
   0x1   :  { %19 = vsyncpa [#allocation6], 0 }
   0x2   :  { %20 = vsyncpa [#allocation9], 0 }
   0x3   :  { %21 = vsyncpa [#allocation12], 0 }
   0x4   :  { %22 = vsyncpa [#allocation15], 0 }
   0x5   :  { %23 = vsyncpa [#allocation4], 0  ;;  %s6319_s25 = smov [#allocation5]   ;;  %s6109_s29 = scalar_lea.hbm %s6653_s1, 3072 }
   0x6   :  { %s39_s26 = sshll.u32 %s6319_s25, 4  ;;  %p6110_p0 = scmp.ne.s32.totalorder %s6653_s1, %s6109_s29  ;;  %s40_s26 = int_to_ptr.vmem [resolvable:$true] %s39_s26 }
   0x7   :  { %p6113_p1 = scmp.lt.u32.totalorder %s6109_s29, %s6653_s1 }
   0x9   :  { %p6115_p2 = pnand %p6113_p1, %p6110_p0 }
   0xb   :  { %6118 = shalt.err (!%p6115_p2)
}
   0xc   :  { %s6119_s17 = scalar_lea.vmem %s40_s26, 3072  ;;  %p6124_p4 = scmp.lt.s32.totalorder %s40_s26, %s40_s26 }
   0xd   :  { %p6120_p3 = scmp.ne.s32.totalorder %s40_s26, %s6119_s17  ;;  %p6125_p5 = scmp.lt.s32.totalorder %s6119_s17, %s6119_s17 }
   0xf   :  { %p6126_p6 = por %p6125_p5, %p6124_p4 }
  0x11   :  { %p6127_p7 = pnand %p6126_p6, %p6120_p3 }
  0x13   :  { %6130 = shalt.err (!%p6127_p7)
}
  0x14   :  { %s6320_s18 = smov 192   ;;  %s6321_s19 = smov 12  }
  0x15   :  { %45 = dma.hbm_to_vmem [thread:$0]  %s6653_s1, 3072, %s40_s26, [#allocation6], %s6320_s18, %s6320_s18, %s6321_s19  }
  0x16   :  { %s6322_s22 = smov [#allocation8]   ;;  %s6323_s24 = smov [#allocation11]  }
  0x17   :  { %s61_s23 = sshll.u32 %s6322_s22, 4  ;;  %s89_s25 = sshll.u32 %s6323_s24, 4  ;;  %s62_s23 = int_to_ptr.vmem [resolvable:$true] %s61_s23  ;;  %s90_s25 = int_to_ptr.vmem [resolvable:$true] %s89_s25 }
  0x18   :  { %s6131_s29 = scalar_lea.hbm %s6655_s3, 9216 }
  0x19   :  { %p6132_p8 = scmp.ne.s32.totalorder %s6655_s3, %s6131_s29  ;;  %p6135_p9 = scmp.lt.u32.totalorder %s6131_s29, %s6655_s3 }
  0x1b   :  { %p6137_p10 = pnand %p6135_p9, %p6132_p8 }
  0x1d   :  { %6140 = shalt.err (!%p6137_p10)
}
  0x1e   :  { %s6141_s1 = scalar_lea.vmem %s62_s23, 9216  ;;  %p6146_p12 = scmp.lt.s32.totalorder %s62_s23, %s62_s23 }
  0x1f   :  { %p6142_p11 = scmp.ne.s32.totalorder %s62_s23, %s6141_s1  ;;  %p6147_p13 = scmp.lt.s32.totalorder %s6141_s1, %s6141_s1 }
  0x21   :  { %p6148_p0 = por %p6147_p13, %p6146_p12 }
  0x23   :  { %p6149_p1 = pnand %p6148_p0, %p6142_p11 }
  0x25   :  { %6152 = shalt.err (!%p6149_p1)
}
  0x26   :  { %67 = dma.hbm_to_vmem [thread:$0]  %s6655_s3, 9216, %s62_s23, [#allocation9], %s6320_s18, %s6320_s18, %s6321_s19  }
  0x27   :  { %s6153_s22 = scalar_lea.hbm %s6659_s7, 18432 }
  0x28   :  { %p6154_p2 = scmp.ne.s32.totalorder %s6659_s7, %s6153_s22  ;;  %p6157_p3 = scmp.lt.u32.totalorder %s6153_s22, %s6659_s7 }
  0x2a   :  { %p6159_p4 = pnand %p6157_p3, %p6154_p2 }
  0x2c   :  { %6162 = shalt.err (!%p6159_p4)
}
  0x2d   :  { %s6163_s30 = scalar_lea.vmem %s90_s25, 18432  ;;  %p6168_p6 = scmp.lt.s32.totalorder %s90_s25, %s90_s25 }
  0x2e   :  { %p6164_p5 = scmp.ne.s32.totalorder %s90_s25, %s6163_s30  ;;  %p6169_p7 = scmp.lt.s32.totalorder %s6163_s30, %s6163_s30 }
  0x30   :  { %p6170_p8 = por %p6169_p7, %p6168_p6 }
  0x32   :  { %p6171_p9 = pnand %p6170_p8, %p6164_p5 }
  0x34   :  { %6174 = shalt.err (!%p6171_p9)
}
  0x35   :  { %95 = dma.hbm_to_vmem [thread:$0]  %s6659_s7, 18432, %s90_s25, [#allocation12], %s6320_s18, %s6320_s18, %s6321_s19  }
  0x36   :  { %s6324_s14 = smov [#allocation2]   ;;  %s6325_s16 = smov [#allocation7]  }
  0x37   :  { %s30_s15 = sshll.u32 %s6324_s14, 4  ;;  %s52_s1 = sshll.u32 %s6325_s16, 4  ;;  %s31_s15 = int_to_ptr.vmem [resolvable:$true] %s30_s15  ;;  %s53_s1 = int_to_ptr.vmem [resolvable:$true] %s52_s1 }
  0x38   :  { %s6175_s20 = scalar_lea.hbm %s6652_s0, 384 }
  0x39   :  { %p6176_p10 = scmp.ne.s32.totalorder %s6652_s0, %s6175_s20  ;;  %p6179_p11 = scmp.lt.u32.totalorder %s6175_s20, %s6652_s0 }
  0x3b   :  { %p6181_p12 = pnand %p6179_p11, %p6176_p10 }
  0x3d   :  { %6184 = shalt.err (!%p6181_p12)
}
  0x3e   :  { %s6185_s7 = scalar_lea.vmem %s31_s15, 384  ;;  %p6190_p0 = scmp.lt.s32.totalorder %s31_s15, %s31_s15 }
  0x3f   :  { %p6186_p13 = scmp.ne.s32.totalorder %s31_s15, %s6185_s7  ;;  %p6191_p1 = scmp.lt.s32.totalorder %s6185_s7, %s6185_s7 }
  0x41   :  { %p6192_p2 = por %p6191_p1, %p6190_p0 }
  0x43   :  { %p6193_p3 = pnand %p6192_p2, %p6186_p13 }
  0x45   :  { %6196 = shalt.err (!%p6193_p3)
}
  0x46   :  { %33 = dma.hbm_to_vmem [thread:$0]  %s6652_s0, 384, %s31_s15, [#allocation3]  }
  0x47   :  { %s6197_s29 = scalar_lea.hbm %s6654_s2, 48 }
  0x48   :  { %p6198_p4 = scmp.ne.s32.totalorder %s6654_s2, %s6197_s29  ;;  %p6201_p5 = scmp.lt.u32.totalorder %s6197_s29, %s6654_s2 }
  0x4a   :  { %p6203_p6 = pnand %p6201_p5, %p6198_p4 }
  0x4c   :  { %6206 = shalt.err (!%p6203_p6)
}
  0x4d   :  { %s6207_s16 = scalar_lea.vmem %s53_s1, 48  ;;  %s6211_s26 = scalar_lea.vmem %s53_s1, 64 }
  0x4e   :  { %p6208_p7 = scmp.ne.s32.totalorder %s53_s1, %s6207_s16  ;;  %p6212_p8 = scmp.lt.s32.totalorder %s53_s1, %s53_s1 }
  0x4f   :  { %p6213_p9 = scmp.lt.s32.totalorder %s6211_s26, %s6207_s16 }
  0x51   :  { %p6214_p10 = por %p6213_p9, %p6212_p8 }
  0x53   :  { %p6215_p11 = pnand %p6214_p10, %p6208_p7 }
  0x55   :  { %6218 = shalt.err (!%p6215_p11)
}
  0x56   :  { %55 = dma.hbm_to_vmem [thread:$0]  %s6654_s2, 48, %s53_s1, [#allocation6]  }
  0x57   :  { %s6326_s17 = smov [#allocation10]   ;;  %s6219_s24 = scalar_lea.hbm %s6657_s5, 18432 }
  0x58   :  { %s75_s20 = sshll.u32 %s6326_s17, 4  ;;  %p6220_p12 = scmp.ne.s32.totalorder %s6657_s5, %s6219_s24  ;;  %s76_s20 = int_to_ptr.vmem [resolvable:$true] %s75_s20 }
  0x59   :  { %p6223_p13 = scmp.lt.u32.totalorder %s6219_s24, %s6657_s5 }
  0x5b   :  { %p6225_p0 = pnand %p6223_p13, %p6220_p12 }
  0x5d   :  { %6228 = shalt.err (!%p6225_p0)
}
  0x5e   :  { %s6229_s25 = scalar_lea.vmem %s76_s20, 18432  ;;  %p6234_p2 = scmp.lt.s32.totalorder %s76_s20, %s76_s20 }
  0x5f   :  { %p6230_p1 = scmp.ne.s32.totalorder %s76_s20, %s6229_s25  ;;  %p6235_p3 = scmp.lt.s32.totalorder %s6229_s25, %s6229_s25 }
  0x61   :  { %p6236_p4 = por %p6235_p3, %p6234_p2 }
  0x63   :  { %p6237_p5 = pnand %p6236_p4, %p6230_p1 }
  0x65   :  { %6240 = shalt.err (!%p6237_p5)
}
  0x66   :  { %s6327_s2 = smov 384   ;;  %s6328_s1 = smov 24  }
  0x67   :  { %81 = dma.hbm_to_vmem [thread:$0]  %s6657_s5, 18432, %s76_s20, [#allocation9], %s6327_s2, %s6327_s2, %s6328_s1  }
  0x68   :  { %s6329_s30 = smov [#allocation13]   ;;  %s6241_s16 = scalar_lea.hbm %s6661_s9, 16384 }
  0x69   :  { %s103_s3 = sshll.u32 %s6329_s30, 4  ;;  %p6242_p6 = scmp.ne.s32.totalorder %s6661_s9, %s6241_s16  ;;  %s104_s3 = int_to_ptr.vmem [resolvable:$true] %s103_s3 }
  0x6a   :  { %p6245_p7 = scmp.lt.u32.totalorder %s6241_s16, %s6661_s9 }
  0x6c   :  { %p6247_p8 = pnand %p6245_p7, %p6242_p6 }
  0x6e   :  { %6250 = shalt.err (!%p6247_p8)
}
  0x6f   :  { %s6251_s21 = scalar_lea.vmem %s104_s3, 16384  ;;  %p6256_p10 = scmp.lt.s32.totalorder %s104_s3, %s104_s3 }
  0x70   :  { %p6252_p9 = scmp.ne.s32.totalorder %s104_s3, %s6251_s21  ;;  %p6257_p11 = scmp.lt.s32.totalorder %s6251_s21, %s6251_s21 }
  0x72   :  { %p6258_p12 = por %p6257_p11, %p6256_p10 }
  0x74   :  { %p6259_p13 = pnand %p6258_p12, %p6252_p9 }
  0x76   :  { %6262 = shalt.err (!%p6259_p13)
}
  0x77   :  { %s6330_s5 = smov 256   ;;  %s6331_s20 = smov 16  }
  0x78   :  { %109 = dma.hbm_to_vmem [thread:$0]  %s6661_s9, 16384, %s104_s3, [#allocation12], %s6330_s5, %s6330_s5, %s6331_s20  }
  0x79   :  { %s6332_s27 = smov [#allocation14]   ;;  %s6263_s25 = scalar_lea.hbm %s6663_s11, 1024 }
  0x7a   :  { %s117_s7 = sshll.u32 %s6332_s27, 4  ;;  %p6264_p0 = scmp.ne.s32.totalorder %s6663_s11, %s6263_s25  ;;  %s118_s7 = int_to_ptr.vmem [resolvable:$true] %s117_s7 }
  0x7b   :  { %p6267_p1 = scmp.lt.u32.totalorder %s6263_s25, %s6663_s11 }
  0x7d   :  { %p6269_p2 = pnand %p6267_p1, %p6264_p0 }
  0x7f   :  { %6272 = shalt.err (!%p6269_p2)
}
  0x80   :  { %s6273_s30 = scalar_lea.vmem %s118_s7, 1024  ;;  %p6278_p4 = scmp.lt.s32.totalorder %s118_s7, %s118_s7 }
  0x81   :  { %p6274_p3 = scmp.ne.s32.totalorder %s118_s7, %s6273_s30  ;;  %p6279_p5 = scmp.lt.s32.totalorder %s6273_s30, %s6273_s30 }
  0x83   :  { %p6280_p6 = por %p6279_p5, %p6278_p4 }
  0x85   :  { %p6281_p7 = pnand %p6280_p6, %p6274_p3 }
  0x87   :  { %6284 = shalt.err (!%p6281_p7)
}
  0x88   :  { %s6333_s9 = smov 64   ;;  %s6334_s3 = smov 4  }
  0x89   :  { %123 = dma.hbm_to_vmem [thread:$0]  %s6663_s11, 1024, %s118_s7, [#allocation15], %s6333_s9, %s6333_s9, %s6334_s3  }
  0x8a   :  { %6307 = dma.done.wait [#allocation3], 384  }
  0x8b   :  { %6308 = vsyncadd [#allocation3], 4294966912 }
  0x8c   :  { %6309 = dma.done.wait [#allocation6], 3120  }
  0x8d   :  { %6310 = vsyncadd [#allocation6], 4294964176 }
  0x8e   :  { %6311 = dma.done.wait [#allocation9], 27648  }
  0x8f   :  { %6312 = vsyncadd [#allocation9], 4294939648 }
  0x90   :  { %6313 = dma.done.wait [#allocation12], 34816  }
  0x91   :  { %6314 = vsyncadd [#allocation12], 4294932480 }
  0x92   :  { %6315 = dma.done.wait [#allocation15], 1024  }
  0x93   :  { %6316 = vsyncadd [#allocation15], 4294966272  ;;  %v6335_v0 = vmov 0.0   ;;  %v6336_v1 = vmov 0   ;;  %vm6337_vm0 = vmmov 0   ;;  %v153_v23 = vld [vmem:[#allocation2 + $0x10] sm:$0xff] }
  0x94   :  { %5231 = vmatprep.subr.bf16.mxu1 %v6335_v0  ;;  %364 = vmatprep.mubr.bf16.mxu0 %v6336_v1  ;;  %v5357_v2 = vld [vmem:[#allocation5 + $0x4] ss:$12 sps:$4 sm:$0xff]   ;;  %v5359_v3 = vld [vmem:[#allocation5] ss:$12 sps:$4 sm:$0xff]   ;;  %v5360_v4 = vld [vmem:[#allocation5 + $0x1c] ss:$12 sps:$4 sm:$0xff]   ;;  %v154_v26 = vpack.c.bf16 %v153_v23, %v153_v23 }
  0x95   :  { %5247 = vmatprep.mubr.msk.bf16.mxu1 %vm6337_vm0, %v6335_v0  ;;  %332 = vmatprep.subr.bf16.mxu0 %v5357_v2  ;;  %v5362_v5 = vld [vmem:[#allocation5 + $0x18] ss:$12 sps:$4 sm:$0xff]   ;;  %v5363_v6 = vld [vmem:[#allocation5 + $0x34] ss:$12 sps:$4 sm:$0xff]   ;;  %v5365_v7 = vld [vmem:[#allocation5 + $0x30] ss:$12 sps:$4 sm:$0xff]  }
  0x96   :  { %333 = vmatpush1.bf16.msra.mxu0 %v5359_v3  ;;  %v5366_v8 = vld [vmem:[#allocation5 + $0x4c] ss:$12 sps:$4 sm:$0xff]   ;;  %v5368_v9 = vld [vmem:[#allocation5 + $0x48] ss:$12 sps:$4 sm:$0xff]   ;;  %v5369_v11 = vld [vmem:[#allocation5 + $0x64] ss:$12 sps:$4 sm:$0xff]  }
  0x97   :  { %334 = vmatprep.subr.bf16.mxu0 %v5360_v4  ;;  %v5381_v10 = vld [vmem:[#allocation5 + $0x8] ss:$12 sps:$4 sm:$0xff]   ;;  %v5382_v12 = vld [vmem:[#allocation5 + $0x20] ss:$12 sps:$4 sm:$0xff]   ;;  %v5383_v15 = vld [vmem:[#allocation5 + $0x38] ss:$12 sps:$4 sm:$0xff]  }
  0x98   :  { %5232 = vmatpush3.bf16.msra.mxu1 %v5381_v10  ;;  %v5371_v13 = vld [vmem:[#allocation5 + $0x60] ss:$12 sps:$4 sm:$0xff]   ;;  %v5372_v14 = vld [vmem:[#allocation5 + $0x7c] ss:$12 sps:$4 sm:$0xff]   ;;  %v5374_v16 = vld [vmem:[#allocation5 + $0x78] ss:$12 sps:$4 sm:$0xff]  }
  0x99   :  { %5233 = vmatprep.subr.bf16.mxu1 %v6335_v0  ;;  %v5375_v17 = vld [vmem:[#allocation5 + $0x94] ss:$12 sps:$4 sm:$0xff]   ;;  %v5384_v18 = vld [vmem:[#allocation5 + $0x50] ss:$12 sps:$4 sm:$0xff]   ;;  %v5378_v20 = vld [vmem:[#allocation5 + $0xac] ss:$12 sps:$4 sm:$0xff]  }
  0x9a   :  { %335 = vmatpush1.bf16.msra.mxu0 %v5362_v5  ;;  %v5377_v19 = vld [vmem:[#allocation5 + $0x90] ss:$12 sps:$4 sm:$0xff]   ;;  %v5385_v21 = vld [vmem:[#allocation5 + $0x68] ss:$12 sps:$4 sm:$0xff]   ;;  %v5386_v25 = vld [vmem:[#allocation5 + $0x80] ss:$12 sps:$4 sm:$0xff]  }
  0x9b   :  { %336 = vmatprep.subr.bf16.mxu0 %v5363_v6  ;;  %v5380_v22 = vld [vmem:[#allocation5 + $0xa8] ss:$12 sps:$4 sm:$0xff]   ;;  %v5389_v27 = vld [vmem:[#allocation8] ss:$12 sps:$4 sm:$0xff]   ;;  %v5394_v28 = vld [vmem:[#allocation8 + $0x1c] ss:$12 sps:$4 sm:$0xff]  }
  0x9c   :  { %5234 = vmatpush3.bf16.msra.mxu1 %v5382_v12  ;;  %v5391_v24 = vld [vmem:[#allocation8 + $0x4] ss:$12 sps:$4 sm:$0xff]   ;;  %v5387_v29 = vld [vmem:[#allocation5 + $0x98] ss:$12 sps:$4 sm:$0xff]   ;;  %v5388_v32 = vld [vmem:[#allocation5 + $0xb0] ss:$12 sps:$4 sm:$0xff]  }
  0x9d   :  { %5235 = vmatprep.subr.bf16.mxu1 %v6335_v0  ;;  %v5392_v30 = vld [vmem:[#allocation8 + $0x18] ss:$12 sps:$4 sm:$0xff]   ;;  %v5397_v31 = vld [vmem:[#allocation8 + $0x34] ss:$12 sps:$4 sm:$0xff]   ;;  %v5395_v34 = vld [vmem:[#allocation8 + $0x30] ss:$12 sps:$4 sm:$0xff]  }
  0x9e   :  { %337 = vmatpush1.bf16.msra.mxu0 %v5365_v7  ;;  %v5416_v33 = vld [vmem:[#allocation8 + $0xc8] ss:$12 sps:$4 sm:$0xff]   ;;  %v5400_v35 = vld [vmem:[#allocation8 + $0x4c] ss:$12 sps:$4 sm:$0xff]   ;;  %v5403_v39 = vld [vmem:[#allocation8 + $0x64] ss:$12 sps:$4 sm:$0xff]  }
  0x9f   :  { %338 = vmatprep.subr.bf16.mxu0 %v5366_v8  ;;  %v5417_v36 = vld [vmem:[#allocation8 + $0x8] ss:$12 sps:$4 sm:$0xff]   ;;  %v5421_v37 = vld [vmem:[#allocation8 + $0xe0] ss:$12 sps:$4 sm:$0xff]   ;;  %v5426_v41 = vld [vmem:[#allocation8 + $0xf8] ss:$12 sps:$4 sm:$0xff]  }
  0xa0   :  { %5236 = vmatpush3.bf16.msra.mxu1 %v5383_v15  ;;  %v5398_v38 = vld [vmem:[#allocation8 + $0x48] ss:$12 sps:$4 sm:$0xff]   ;;  %v5422_v40 = vld [vmem:[#allocation8 + $0x20] ss:$12 sps:$4 sm:$0xff]   ;;  %v5404_v44 = vld [vmem:[#allocation8 + $0x78] ss:$12 sps:$4 sm:$0xff]   ;;  %v189_v15 = vlaneseq }
  0xa1   :  { %5237 = vmatprep.subr.bf16.mxu1 %v6335_v0  ;;  %v5401_v42 = vld [vmem:[#allocation8 + $0x60] ss:$12 sps:$4 sm:$0xff]   ;;  %v5406_v43 = vld [vmem:[#allocation8 + $0x7c] ss:$12 sps:$4 sm:$0xff]   ;;  %v5427_v45 = vld [vmem:[#allocation8 + $0x38] ss:$12 sps:$4 sm:$0xff]  }
  0xa2   :  { %339 = vmatpush1.bf16.msra.mxu0 %v5368_v9  ;;  %v5431_v46 = vld [vmem:[#allocation8 + $0x110] ss:$12 sps:$4 sm:$0xff]   ;;  %v5409_v47 = vld [vmem:[#allocation8 + $0x94] ss:$12 sps:$4 sm:$0xff]   ;;  %v5412_v51 = vld [vmem:[#allocation8 + $0xac] ss:$12 sps:$4 sm:$0xff]  }
  0xa3   :  { %340 = vmatprep.subr.bf16.mxu0 %v5369_v11  ;;  %v5432_v48 = vld [vmem:[#allocation8 + $0x50] ss:$12 sps:$4 sm:$0xff]   ;;  %v5436_v49 = vld [vmem:[#allocation8 + $0x128] ss:$12 sps:$4 sm:$0xff]   ;;  %v5441_v53 = vld [vmem:[#allocation8 + $0x140] ss:$12 sps:$4 sm:$0xff]  }
  0xa4   :  { %5238 = vmatpush3.bf16.msra.mxu1 %v5384_v18  ;;  %v5407_v50 = vld [vmem:[#allocation8 + $0x90] ss:$12 sps:$4 sm:$0xff]   ;;  %v5437_v52 = vld [vmem:[#allocation8 + $0x68] ss:$12 sps:$4 sm:$0xff]   ;;  %v5442_v56 = vld [vmem:[#allocation8 + $0x80] ss:$12 sps:$4 sm:$0xff]  }
  0xa5   :  { %5239 = vmatprep.subr.bf16.mxu1 %v6335_v0  ;;  %v5410_v54 = vld [vmem:[#allocation8 + $0xa8] ss:$12 sps:$4 sm:$0xff]   ;;  %v5415_v55 = vld [vmem:[#allocation8 + $0xc4] ss:$12 sps:$4 sm:$0xff]   ;;  %v5413_v57 = vld [vmem:[#allocation8 + $0xc0] ss:$12 sps:$4 sm:$0xff]  }
  0xa6   :  { %341 = vmatpush1.bf16.msra.mxu0 %v5371_v13  ;;  %v5420_v58 = vld [vmem:[#allocation8 + $0xdc] ss:$12 sps:$4 sm:$0xff]   ;;  %v5418_v59 = vld [vmem:[#allocation8 + $0xd8] ss:$12 sps:$4 sm:$0xff]   ;;  %v5425_v60 = vld [vmem:[#allocation8 + $0xf4] ss:$12 sps:$4 sm:$0xff]  }
  0xa7   :  { %342 = vmatprep.subr.bf16.mxu0 %v5372_v14  ;;  %v5423_v61 = vld [vmem:[#allocation8 + $0xf0] ss:$12 sps:$4 sm:$0xff]   ;;  %v5430_v62 = vld [vmem:[#allocation8 + $0x10c] ss:$12 sps:$4 sm:$0xff]   ;;  %v5428_v63 = vld [vmem:[#allocation8 + $0x108] ss:$12 sps:$4 sm:$0xff]  }
  0xa8   :  { %5240 = vmatpush3.bf16.msra.mxu1 %v5385_v21  ;;  %v5435_v2 = vld [vmem:[#allocation8 + $0x124] ss:$12 sps:$4 sm:$0xff]   ;;  %v5433_v3 = vld [vmem:[#allocation8 + $0x120] ss:$12 sps:$4 sm:$0xff]   ;;  %v5440_v4 = vld [vmem:[#allocation8 + $0x13c] ss:$12 sps:$4 sm:$0xff]  }
  0xa9   :  { %5241 = vmatprep.subr.bf16.mxu1 %v6335_v0  ;;  %v5438_v5 = vld [vmem:[#allocation8 + $0x138] ss:$12 sps:$4 sm:$0xff]   ;;  %v5445_v6 = vld [vmem:[#allocation8 + $0x154] ss:$12 sps:$4 sm:$0xff]   ;;  %v5443_v8 = vld [vmem:[#allocation8 + $0x150] ss:$12 sps:$4 sm:$0xff]  }
  0xaa   :  { %343 = vmatpush1.bf16.msra.mxu0 %v5374_v16  ;;  %v5446_v7 = vld [vmem:[#allocation8 + $0x158] ss:$12 sps:$4 sm:$0xff]   ;;  %v5451_v11 = vld [vmem:[#allocation8 + $0x170] ss:$12 sps:$4 sm:$0xff]   ;;  %v5448_v12 = vld [vmem:[#allocation8 + $0x168] ss:$12 sps:$4 sm:$0xff]  }
  0xab   :  { %344 = vmatprep.subr.bf16.mxu0 %v5375_v17  ;;  %v5447_v9 = vld [vmem:[#allocation8 + $0x98] ss:$12 sps:$4 sm:$0xff]   ;;  %v5452_v13 = vld [vmem:[#allocation8 + $0xb0] ss:$12 sps:$4 sm:$0xff]   ;;  %v6526_v16 = vshrl.u32 %v189_v15, 7  ;;  %s6338_s21 = smov [#allocation16]  }
  0xac   :  { %5242 = vmatpush3.bf16.msra.mxu1 %v5386_v25  ;;  %v5450_v10 = vld [vmem:[#allocation8 + $0x16c] ss:$12 sps:$4 sm:$0xff]   ;;  %v5455_v14 = vld [vmem:[#allocation8 + $0x184] ss:$12 sps:$4 sm:$0xff]   ;;  %v6528_v17 = vld [vmem:[#allocation7] sm:$0x7] }
  0xad   :  { %5243 = vmatprep.subr.bf16.mxu1 %v6335_v0  ;;  %v6531_v18 = vsub.s32 0, %v6526_v16  ;;  %v5497_v15 = vld [vmem:[#allocation10 + $0x60] ss:$24 sps:$4 sm:$0xff]   ;;  %s4579_s5 = sshll.u32 %s6338_s21, 4  ;;  %s4580_s5 = int_to_ptr.vmem [resolvable:$true] %s4579_s5 }
  0xae   :  { %345 = vmatpush1.bf16.msra.mxu0 %v5377_v19  ;;  %v6534_v19 = vsub.s32 1, %v6526_v16  ;;  %s6285_s20 = scalar_lea.vmem %s4580_s5, 384  ;;  %p6290_p9 = scmp.lt.s32.totalorder %s4580_s5, %s4580_s5 }
  0xaf   :  { %346 = vmatprep.subr.bf16.mxu0 %v5378_v20  ;;  %v192_v20 = vrot.slane %v6528_v17, %v6531_v18  ;;  %p6286_p8 = scmp.ne.s32.totalorder %s4580_s5, %s6285_s20  ;;  %p6291_p10 = scmp.lt.s32.totalorder %s6285_s20, %s6285_s20 }
  0xb0   :  { %5244 = vmatpush3.bf16.msra.mxu1 %v5387_v29  ;;  %v196_v21 = vrot.slane %v6528_v17, %v6534_v19 }
  0xb1   :  { %5245 = vmatprep.subr.bf16.mxu1 %v6335_v0  ;;  %p6292_p11 = por %p6291_p10, %p6290_p9 }
  0xb2   :  { %347 = vmatpush1.bf16.msra.mxu0 %v5380_v22 }
  0xb3   :  { %919 = vmatprep.subr.bf16.mxu0 %v5391_v24  ;;  %p6293_p12 = pnand %p6292_p11, %p6286_p8 }
  0xb4   :  { %5246 = vmatpush3.bf16.msra.mxu1 %v5388_v32 }
  0xb5   :  { %365 = vmatmul.mubr.bf16.vlgmr.msra.gmra.mrb[0].mxu0 %v154_v26  ;;  %5125 = vmatprep.subr.bf16.mxu1 %v5416_v33  ;;  %v5453_v33 = vld [vmem:[#allocation8 + $0x180] ss:$12 sps:$4 sm:$0xff]  }
  0xb6   :  { %920 = vmatpush1.bf16.msra.mxu0 %v5389_v27 }
  0xb7   :  { %921 = vmatprep.subr.bf16.mxu0 %v5394_v28  ;;  %5248 = vmatmul.mubr.bf16.vlgmr.msra.gmra.mrb[0].mxu1 %v154_v26 }
  0xb8   :  { %5126 = vmatpush3.bf16.msra.mxu1 %v5417_v36  ;;  %v5459_v36 = vld [vmem:[#allocation8 + $0x19c] ss:$12 sps:$4 sm:$0xff]  }
  0xb9   :  { %5127 = vmatprep.subr.bf16.mxu1 %v5421_v37 }
  0xba   :  { %922 = vmatpush1.bf16.msra.mxu0 %v5392_v30 }
  0xbb   :  { %923 = vmatprep.subr.bf16.mxu0 %v5397_v31 }
  0xbc   :  { %5128 = vmatpush3.bf16.msra.mxu1 %v5422_v40  ;;  %v5460_v40 = vld [vmem:[#allocation8 + $0x1a0] ss:$12 sps:$4 sm:$0xff]  }
  0xbd   :  { %5129 = vmatprep.subr.bf16.mxu1 %v5426_v41 }
  0xbe   :  { %924 = vmatpush1.bf16.msra.mxu0 %v5395_v34  ;;  %v5456_v34 = vld [vmem:[#allocation8 + $0x188] ss:$12 sps:$4 sm:$0xff]  }
  0xbf   :  { %925 = vmatprep.subr.bf16.mxu0 %v5400_v35 }
  0xc0   :  { %5130 = vmatpush3.bf16.msra.mxu1 %v5427_v45  ;;  %v5464_v45 = vld [vmem:[#allocation8 + $0x1b8] ss:$12 sps:$4 sm:$0xff]  }
  0xc1   :  { %5131 = vmatprep.subr.bf16.mxu1 %v5431_v46  ;;  %v5467_v46 = vld [vmem:[#allocation8 + $0x1cc] ss:$12 sps:$4 sm:$0xff]  }
  0xc2   :  { %926 = vmatpush1.bf16.msra.mxu0 %v5398_v38 }
  0xc3   :  { %927 = vmatprep.subr.bf16.mxu0 %v5403_v39  ;;  %v5457_v39 = vld [vmem:[#allocation8 + $0x198] ss:$12 sps:$4 sm:$0xff]  }
  0xc4   :  { %5132 = vmatpush3.bf16.msra.mxu1 %v5432_v48  ;;  %v5468_v48 = vld [vmem:[#allocation8 + $0x1d0] ss:$12 sps:$4 sm:$0xff]  }
  0xc5   :  { %5133 = vmatprep.subr.bf16.mxu1 %v5436_v49  ;;  %v5471_v49 = vld [vmem:[#allocation8 + $0x1e4] ss:$12 sps:$4 sm:$0xff]  }
  0xc6   :  { %928 = vmatpush1.bf16.msra.mxu0 %v5401_v42  ;;  %v5463_v42 = vld [vmem:[#allocation8 + $0x1b4] ss:$12 sps:$4 sm:$0xff]  }
  0xc7   :  { %929 = vmatprep.subr.bf16.mxu0 %v5406_v43 }
  0xc8   :  { %5134 = vmatpush3.bf16.msra.mxu1 %v5437_v52  ;;  %v5472_v52 = vld [vmem:[#allocation8 + $0x1e8] ss:$12 sps:$4 sm:$0xff]  }
  0xc9   :  { %5135 = vmatprep.subr.bf16.mxu1 %v5441_v53 }
  0xca   :  { %930 = vmatpush1.bf16.msra.mxu0 %v5404_v44  ;;  %v5461_v44 = vld [vmem:[#allocation8 + $0x1b0] ss:$12 sps:$4 sm:$0xff]  }
  0xcb   :  { %931 = vmatprep.subr.bf16.mxu0 %v5409_v47  ;;  %v5465_v47 = vld [vmem:[#allocation8 + $0x1c8] ss:$12 sps:$4 sm:$0xff]  }
  0xcc   :  { %5136 = vmatpush3.bf16.msra.mxu1 %v5442_v56  ;;  %v5476_v56 = vld [vmem:[#allocation8 + $0x200] ss:$12 sps:$4 sm:$0xff]  }
  0xcd   :  { %5137 = vmatprep.subr.bf16.mxu1 %v5446_v7  ;;  %v5488_v7 = vld [vmem:[#allocation10 + $0x8] ss:$24 sps:$4 sm:$0xff]  }
  0xce   :  { %932 = vmatpush1.bf16.msra.mxu0 %v5407_v50  ;;  %v6547_v50 = vsub.s32 2, %v6526_v16 }
  0xcf   :  { %933 = vmatprep.subr.bf16.mxu0 %v5412_v51  ;;  %v5469_v51 = vld [vmem:[#allocation8 + $0x1e0] ss:$12 sps:$4 sm:$0xff]  }
  0xd0   :  { %5138 = vmatpush3.bf16.msra.mxu1 %v5447_v9  ;;  %v200_v53 = vrot.slane %v6528_v17, %v6547_v50  ;;  %v5493_v9 = vld [vmem:[#allocation10 + $0x34] ss:$24 sps:$4 sm:$0xff]   ;;  %v5500_v17 = vld [vmem:[#allocation10 + $0x68] ss:$24 sps:$4 sm:$0xff]  }
  0xd1   :  { %5139 = vmatprep.subr.bf16.mxu1 %v5451_v11  ;;  %v5491_v11 = vld [vmem:[#allocation10 + $0x30] ss:$24 sps:$4 sm:$0xff]  }
  0xd2   :  { %934 = vmatpush1.bf16.msra.mxu0 %v5410_v54  ;;  %v5475_v54 = vld [vmem:[#allocation8 + $0x1fc] ss:$12 sps:$4 sm:$0xff]  }
  0xd3   :  { %935 = vmatprep.subr.bf16.mxu0 %v5415_v55  ;;  %v5473_v55 = vld [vmem:[#allocation8 + $0x1f8] ss:$12 sps:$4 sm:$0xff]  }
  0xd4   :  { %5140 = vmatpush3.bf16.msra.mxu1 %v5452_v13  ;;  %v5499_v13 = vld [vmem:[#allocation10 + $0x64] ss:$24 sps:$4 sm:$0xff]  }
  0xd5   :  { %5251 = vmatprep.subr.bf16.mxu1 %v6335_v0 }
  0xd6   :  { %936 = vmatpush1.bf16.msra.mxu0 %v5413_v57 }
  0xd7   :  { %937 = vmatprep.subr.bf16.mxu0 %v5420_v58  ;;  %v5479_v58 = vld [vmem:[#allocation8 + $0x214] ss:$12 sps:$4 sm:$0xff]  }
  0xda   :  { %938 = vmatpush1.bf16.msra.mxu0 %v5418_v59  ;;  %v5477_v59 = vld [vmem:[#allocation8 + $0x210] ss:$12 sps:$4 sm:$0xff]  }
  0xdb   :  { %939 = vmatprep.subr.bf16.mxu0 %v5425_v60  ;;  %v5480_v60 = vld [vmem:[#allocation8 + $0x218] ss:$12 sps:$4 sm:$0xff]  }
  0xde   :  { %940 = vmatpush1.bf16.msra.mxu0 %v5423_v61 }
  0xdf   :  { %941 = vmatprep.subr.bf16.mxu0 %v5430_v62  ;;  %v5483_v62 = vld [vmem:[#allocation8 + $0x22c] ss:$12 sps:$4 sm:$0xff]  }
  0xe2   :  { %942 = vmatpush1.bf16.msra.mxu0 %v5428_v63  ;;  %v5481_v63 = vld [vmem:[#allocation8 + $0x228] ss:$12 sps:$4 sm:$0xff]  }
  0xe3   :  { %943 = vmatprep.subr.bf16.mxu0 %v5435_v2  ;;  %v5484_v2 = vld [vmem:[#allocation8 + $0x230] ss:$12 sps:$4 sm:$0xff]  }
  0xe6   :  { %944 = vmatpush1.bf16.msra.mxu0 %v5433_v3 }
  0xe7   :  { %945 = vmatprep.subr.bf16.mxu0 %v5440_v4  ;;  %v5487_v4 = vld [vmem:[#allocation10 + $0x4] ss:$24 sps:$4 sm:$0xff]  }
  0xea   :  { %946 = vmatpush1.bf16.msra.mxu0 %v5438_v5  ;;  %v5490_v5 = vld [vmem:[#allocation10 + $0xc] ss:$24 sps:$4 sm:$0xff]  }
  0xeb   :  { %947 = vmatprep.subr.bf16.mxu0 %v5445_v6  ;;  %v5485_v6 = vld [vmem:[#allocation10] ss:$24 sps:$4 sm:$0xff]  }
  0xee   :  { %948 = vmatpush1.bf16.msra.mxu0 %v5443_v8 }
  0xef   :  { %949 = vmatprep.subr.bf16.mxu0 %v5450_v10  ;;  %v5496_v10 = vld [vmem:[#allocation10 + $0x3c] ss:$24 sps:$4 sm:$0xff]  }
  0xf2   :  { %950 = vmatpush1.bf16.msra.mxu0 %v5448_v12  ;;  %v5494_v12 = vld [vmem:[#allocation10 + $0x38] ss:$24 sps:$4 sm:$0xff]  }
  0xf3   :  { %960 = vmatprep.subr.bf16.mxu0 %v5455_v14  ;;  %v5502_v14 = vld [vmem:[#allocation10 + $0x6c] ss:$24 sps:$4 sm:$0xff]  }
 0x188   :  { %v366_v22 = vpop.f32.mrb[0].mxu0 }
 0x189   :  { %v367_v23 = vadd.f32 %v366_v22, %v192_v20  ;;  %v368_v24 = vpop.f32.mrb[1].mxu0  ;;  %v5505_v20 = vld [vmem:[#allocation10 + $0x94] ss:$24 sps:$4 sm:$0xff]   ;;  %v5503_v22 = vld [vmem:[#allocation10 + $0x90] ss:$24 sps:$4 sm:$0xff]  }
 0x18a   :  { %v369_v25 = vadd.f32 %v368_v24, %v196_v21  ;;  %v370_v26 = vpop.f32.mrb[2].mxu0  ;;  %v407_v37 = vpop.f32.mrb[0].mxu1  ;;  %v5508_v21 = vld [vmem:[#allocation10 + $0x9c] ss:$24 sps:$4 sm:$0xff]  }
 0x18b   :  { %v413_v27 = vmul.f32 0.1, %v367_v23  ;;  %v371_v28 = vpop.f32.mrb[3].mxu0  ;;  %v5249_v38 = vpop.f32.mrb[1].mxu1  ;;  %v408_v57 = vadd.f32 %v407_v37, %v200_v53  ;;  %v5511_v24 = vld [vmem:[#allocation10 + $0xc4] ss:$24 sps:$4 sm:$0xff]  }
 0x18c   :  { %v414_v29 = vmul.f32 0.1, %v369_v25  ;;  %v410_v41 = vpop.f32.mrb[2].mxu1  ;;  %v5509_v26 = vld [vmem:[#allocation10 + $0xc0] ss:$24 sps:$4 sm:$0xff]  }
 0x18d   :  { %v416_v30 = vmax.f32 %v367_v23, %v413_v27  ;;  %v5250_v43 = vpop.f32.mrb[3].mxu1  ;;  %v415_v61 = vmul.f32 0.1, %v408_v57  ;;  %v5506_v23 = vld [vmem:[#allocation10 + $0x98] ss:$24 sps:$4 sm:$0xff]  }
 0x18e   :  { %v417_v31 = vmax.f32 %v369_v25, %v414_v29  ;;  %v5514_v25 = vld [vmem:[#allocation10 + $0xcc] ss:$24 sps:$4 sm:$0xff]   ;;  %v5512_v27 = vld [vmem:[#allocation10 + $0xc8] ss:$24 sps:$4 sm:$0xff]   ;;  %v5520_v29 = vld [vmem:[#allocation10 + $0xfc] ss:$24 sps:$4 sm:$0xff]  }
 0x18f   :  { %v419_v35 = vpack.c.bf16 %v416_v30, %v416_v30  ;;  %v418_v3 = vmax.f32 %v408_v57, %v415_v61  ;;  %v5517_v28 = vld [vmem:[#allocation10 + $0xf4] ss:$24 sps:$4 sm:$0xff]   ;;  %v5515_v30 = vld [vmem:[#allocation10 + $0xf0] ss:$24 sps:$4 sm:$0xff]   ;;  %v5559_v57 = vld [vmem:[#allocation10 + $0x244] ss:$24 sps:$4 sm:$0xff]  }
 0x190   :  { %v420_v32 = vpack.c.bf16 %v417_v31, %v417_v31  ;;  %v5518_v31 = vld [vmem:[#allocation10 + $0xf8] ss:$24 sps:$4 sm:$0xff]   ;;  %v5529_v37 = vld [vmem:[#allocation10 + $0x154] ss:$24 sps:$4 sm:$0xff]   ;;  %v5536_v43 = vld [vmem:[#allocation10 + $0x188] ss:$24 sps:$4 sm:$0xff]  }
 0x191   :  { %v421_v8 = vpack.c.bf16 %v418_v3, %v418_v3  ;;  %v5530_v38 = vld [vmem:[#allocation10 + $0x158] ss:$24 sps:$4 sm:$0xff]   ;;  %v5538_v41 = vld [vmem:[#allocation10 + $0x18c] ss:$24 sps:$4 sm:$0xff]  }
 0x192   :  { %951 = vmatprep.mubr.bf16.mxu0 %v420_v32  ;;  %1033 = vmatprep.mubr.bf16.mxu1 %v420_v32  ;;  %v5523_v32 = vld [vmem:[#allocation10 + $0x124] ss:$24 sps:$4 sm:$0xff]   ;;  %v5553_v53 = vld [vmem:[#allocation10 + $0x214] ss:$24 sps:$4 sm:$0xff]  }
 0x193   :  { %952 = vmatmul.mubr.bf16.vlgmr.msra.gmra.mrb[4].mxu0 %v419_v35  ;;  %1034 = vmatmul.mubr.bf16.vlgmr.msra.gmra.mrb[4].mxu1 %v419_v35  ;;  %v5524_v35 = vld [vmem:[#allocation10 + $0x128] ss:$24 sps:$4 sm:$0xff]   ;;  %v5565_v61 = vld [vmem:[#allocation10 + $0x274] ss:$24 sps:$4 sm:$0xff]   ;;  %v5571_v3 = vld [vmem:[#allocation10 + $0x2a4] ss:$24 sps:$4 sm:$0xff]  }
 0x194   :  { %961 = vmatpush1.bf16.msra.mxu0 %v5453_v33  ;;  %5252 = vmatpush3.bf16.msra.mxu1 %v5456_v34  ;;  %v5526_v33 = vld [vmem:[#allocation10 + $0x12c] ss:$24 sps:$4 sm:$0xff]   ;;  %v5521_v34 = vld [vmem:[#allocation10 + $0x120] ss:$24 sps:$4 sm:$0xff]  }
 0x195   :  { %962 = vmatprep.subr.bf16.mxu0 %v5459_v36  ;;  %5253 = vmatprep.subr.bf16.mxu1 %v6335_v0  ;;  %v5527_v36 = vld [vmem:[#allocation10 + $0x150] ss:$24 sps:$4 sm:$0xff]  }
 0x196   :  { %992 = vmatprep.mubr.bf16.mxu0 %v6336_v1  ;;  %5267 = vmatprep.mubr.msk.bf16.mxu1 %vm6337_vm0, %v6335_v0 }
 0x198   :  { %963 = vmatpush1.bf16.msra.mxu0 %v5457_v39  ;;  %5254 = vmatpush3.bf16.msra.mxu1 %v5460_v40  ;;  %v5532_v39 = vld [vmem:[#allocation10 + $0x15c] ss:$24 sps:$4 sm:$0xff]  }
 0x199   :  { %964 = vmatprep.subr.bf16.mxu0 %v5463_v42  ;;  %5255 = vmatprep.subr.bf16.mxu1 %v6335_v0  ;;  %v5535_v40 = vld [vmem:[#allocation10 + $0x184] ss:$24 sps:$4 sm:$0xff]   ;;  %v5533_v42 = vld [vmem:[#allocation10 + $0x180] ss:$24 sps:$4 sm:$0xff]  }
 0x19c   :  { %965 = vmatpush1.bf16.msra.mxu0 %v5461_v44  ;;  %5256 = vmatpush3.bf16.msra.mxu1 %v5464_v45  ;;  %v5541_v44 = vld [vmem:[#allocation10 + $0x1b4] ss:$24 sps:$4 sm:$0xff]  }
 0x19d   :  { %966 = vmatprep.subr.bf16.mxu0 %v5467_v46  ;;  %5257 = vmatprep.subr.bf16.mxu1 %v6335_v0  ;;  %v5544_v45 = vld [vmem:[#allocation10 + $0x1bc] ss:$24 sps:$4 sm:$0xff]   ;;  %v5539_v46 = vld [vmem:[#allocation10 + $0x1b0] ss:$24 sps:$4 sm:$0xff]  }
 0x1a0   :  { %967 = vmatpush1.bf16.msra.mxu0 %v5465_v47  ;;  %5258 = vmatpush3.bf16.msra.mxu1 %v5468_v48  ;;  %v5542_v47 = vld [vmem:[#allocation10 + $0x1b8] ss:$24 sps:$4 sm:$0xff]   ;;  %v5547_v48 = vld [vmem:[#allocation10 + $0x1e4] ss:$24 sps:$4 sm:$0xff]  }
 0x1a1   :  { %968 = vmatprep.subr.bf16.mxu0 %v5471_v49  ;;  %5259 = vmatprep.subr.bf16.mxu1 %v6335_v0  ;;  %v5550_v49 = vld [vmem:[#allocation10 + $0x1ec] ss:$24 sps:$4 sm:$0xff]  }
 0x1a4   :  { %969 = vmatpush1.bf16.msra.mxu0 %v5469_v51  ;;  %5260 = vmatpush3.bf16.msra.mxu1 %v5472_v52  ;;  %v5545_v51 = vld [vmem:[#allocation10 + $0x1e0] ss:$24 sps:$4 sm:$0xff]  }
 0x1a5   :  { %970 = vmatprep.subr.bf16.mxu0 %v5475_v54  ;;  %5261 = vmatprep.subr.bf16.mxu1 %v6335_v0  ;;  %v5548_v52 = vld [vmem:[#allocation10 + $0x1e8] ss:$24 sps:$4 sm:$0xff]   ;;  %v5556_v54 = vld [vmem:[#allocation10 + $0x21c] ss:$24 sps:$4 sm:$0xff]  }
 0x1a8   :  { %971 = vmatpush1.bf16.msra.mxu0 %v5473_v55  ;;  %5262 = vmatpush3.bf16.msra.mxu1 %v5476_v56  ;;  %v5551_v55 = vld [vmem:[#allocation10 + $0x210] ss:$24 sps:$4 sm:$0xff]  }
 0x1a9   :  { %972 = vmatprep.subr.bf16.mxu0 %v5479_v58  ;;  %5263 = vmatprep.subr.bf16.mxu1 %v6335_v0  ;;  %v5554_v56 = vld [vmem:[#allocation10 + $0x218] ss:$24 sps:$4 sm:$0xff]   ;;  %v5562_v58 = vld [vmem:[#allocation10 + $0x24c] ss:$24 sps:$4 sm:$0xff]  }
 0x1ac   :  { %973 = vmatpush1.bf16.msra.mxu0 %v5477_v59  ;;  %5264 = vmatpush3.bf16.msra.mxu1 %v5480_v60  ;;  %v5557_v59 = vld [vmem:[#allocation10 + $0x240] ss:$24 sps:$4 sm:$0xff]  }
 0x1ad   :  { %974 = vmatprep.subr.bf16.mxu0 %v5483_v62  ;;  %5265 = vmatprep.subr.bf16.mxu1 %v6335_v0  ;;  %v5560_v60 = vld [vmem:[#allocation10 + $0x248] ss:$24 sps:$4 sm:$0xff]   ;;  %v5568_v62 = vld [vmem:[#allocation10 + $0x27c] ss:$24 sps:$4 sm:$0xff]  }
 0x1b0   :  { %975 = vmatpush1.bf16.msra.mxu0 %v5481_v63  ;;  %5266 = vmatpush3.bf16.msra.mxu1 %v5484_v2  ;;  %v5563_v63 = vld [vmem:[#allocation10 + $0x270] ss:$24 sps:$4 sm:$0xff]  }
 0x1b1   :  { %1986 = vmatprep.subr.bf16.mxu1 %v5487_v4  ;;  %2068 = vmatprep.subr.bf16.mxu0 %v5490_v5  ;;  %v5566_v2 = vld [vmem:[#allocation10 + $0x278] ss:$24 sps:$4 sm:$0xff]   ;;  %v5574_v4 = vld [vmem:[#allocation10 + $0x2ac] ss:$24 sps:$4 sm:$0xff]  }
 0x1b2   :  { %v5569_v5 = vld [vmem:[#allocation10 + $0x2a0] ss:$24 sps:$4 sm:$0xff]  }
 0x1b3   :  { %993 = vmatmul.mubr.bf16.vlgmr.msra.gmra.mrb[4].mxu0 %v421_v8  ;;  %5268 = vmatmul.mubr.bf16.vlgmr.msra.gmra.mrb[8].mxu1 %v421_v8  ;;  %v5580_v8 = vld [vmem:[#allocation10 + $0x2dc] ss:$24 sps:$4 sm:$0xff]  }
 0x1b4   :  { %1987 = vmatpush1.bf16.msra.mxu1 %v5485_v6  ;;  %2069 = vmatpush1.bf16.msra.mxu0 %v5488_v7  ;;  %v5572_v6 = vld [vmem:[#allocation10 + $0x2a8] ss:$24 sps:$4 sm:$0xff]   ;;  %v5577_v7 = vld [vmem:[#allocation10 + $0x2d4] ss:$24 sps:$4 sm:$0xff]  }
 0x1b5   :  { %1988 = vmatprep.subr.bf16.mxu1 %v5493_v9  ;;  %2070 = vmatprep.subr.bf16.mxu0 %v5496_v10  ;;  %v5575_v9 = vld [vmem:[#allocation10 + $0x2d0] ss:$24 sps:$4 sm:$0xff]  }
 0x1b6   :  { %v5578_v10 = vld [vmem:[#allocation10 + $0x2d8] ss:$24 sps:$4 sm:$0xff]  }
 0x1b8   :  { %1989 = vmatpush1.bf16.msra.mxu1 %v5491_v11  ;;  %2071 = vmatpush1.bf16.msra.mxu0 %v5494_v12  ;;  %v5583_v11 = vld [vmem:[#allocation10 + $0x304] ss:$24 sps:$4 sm:$0xff]  }
 0x1b9   :  { %1990 = vmatprep.subr.bf16.mxu1 %v5499_v13  ;;  %2072 = vmatprep.subr.bf16.mxu0 %v5502_v14  ;;  %v5586_v12 = vld [vmem:[#allocation10 + $0x30c] ss:$24 sps:$4 sm:$0xff]  }
 0x1bc   :  { %1991 = vmatpush1.bf16.msra.mxu1 %v5497_v15  ;;  %2073 = vmatpush1.bf16.msra.mxu0 %v5500_v17 }
 0x1bd   :  { %1992 = vmatprep.subr.bf16.mxu1 %v5505_v20  ;;  %2074 = vmatprep.subr.bf16.mxu0 %v5508_v21  ;;  %v518_v21 = vld [vmem:[%s6656_s4] sm:$0x7] }
 0x1c0   :  { %1993 = vmatpush1.bf16.msra.mxu1 %v5503_v22  ;;  %2075 = vmatpush1.bf16.msra.mxu0 %v5506_v23  ;;  %v531_v22 = vrot.slane %v518_v21, %v6547_v50  ;;  %v523_v23 = vrot.slane %v518_v21, %v6531_v18 }
 0x1c1   :  { %1994 = vmatprep.subr.bf16.mxu1 %v5511_v24  ;;  %2076 = vmatprep.subr.bf16.mxu0 %v5514_v25  ;;  %v527_v24 = vrot.slane %v518_v21, %v6534_v19  ;;  %v5634_v21 = vld [vmem:[#allocation10 + $0x44] ss:$24 sps:$4 sm:$0xff]  }
 0x1c4   :  { %1995 = vmatpush1.bf16.msra.mxu1 %v5509_v26  ;;  %2077 = vmatpush1.bf16.msra.mxu0 %v5512_v27 }
 0x1c5   :  { %1996 = vmatprep.subr.bf16.mxu1 %v5517_v28  ;;  %2078 = vmatprep.subr.bf16.mxu0 %v5520_v29 }
 0x1c8   :  { %1997 = vmatpush1.bf16.msra.mxu1 %v5515_v30  ;;  %2079 = vmatpush1.bf16.msra.mxu0 %v5518_v31 }
 0x1c9   :  { %1998 = vmatprep.subr.bf16.mxu1 %v5523_v32  ;;  %2080 = vmatprep.subr.bf16.mxu0 %v5526_v33 }
 0x1cc   :  { %1999 = vmatpush1.bf16.msra.mxu1 %v5521_v34  ;;  %2081 = vmatpush1.bf16.msra.mxu0 %v5524_v35 }
 0x1cd   :  { %2000 = vmatprep.subr.bf16.mxu1 %v5529_v37  ;;  %2082 = vmatprep.subr.bf16.mxu0 %v5532_v39 }
 0x1d0   :  { %2001 = vmatpush1.bf16.msra.mxu1 %v5527_v36  ;;  %2083 = vmatpush1.bf16.msra.mxu0 %v5530_v38 }
 0x1d1   :  { %2002 = vmatprep.subr.bf16.mxu1 %v5535_v40  ;;  %2084 = vmatprep.subr.bf16.mxu0 %v5538_v41 }
 0x1d4   :  { %2003 = vmatpush1.bf16.msra.mxu1 %v5533_v42  ;;  %2085 = vmatpush1.bf16.msra.mxu0 %v5536_v43  ;;  %v5581_v42 = vld [vmem:[#allocation10 + $0x300] ss:$24 sps:$4 sm:$0xff]  }
 0x1d5   :  { %2004 = vmatprep.subr.bf16.mxu1 %v5541_v44  ;;  %2086 = vmatprep.subr.bf16.mxu0 %v5544_v45  ;;  %v5584_v43 = vld [vmem:[#allocation10 + $0x308] ss:$24 sps:$4 sm:$0xff]   ;;  %v5589_v45 = vld [vmem:[#allocation10 + $0x334] ss:$24 sps:$4 sm:$0xff]  }
 0x1d8   :  { %2005 = vmatpush1.bf16.msra.mxu1 %v5539_v46  ;;  %2087 = vmatpush1.bf16.msra.mxu0 %v5542_v47  ;;  %v5592_v46 = vld [vmem:[#allocation10 + $0x33c] ss:$24 sps:$4 sm:$0xff]   ;;  %v5587_v47 = vld [vmem:[#allocation10 + $0x330] ss:$24 sps:$4 sm:$0xff]  }
 0x1d9   :  { %2006 = vmatprep.subr.bf16.mxu1 %v5547_v48  ;;  %2088 = vmatprep.subr.bf16.mxu0 %v5550_v49  ;;  %v5590_v48 = vld [vmem:[#allocation10 + $0x338] ss:$24 sps:$4 sm:$0xff]   ;;  %v5595_v49 = vld [vmem:[#allocation10 + $0x364] ss:$24 sps:$4 sm:$0xff]  }
 0x1dc   :  { %2007 = vmatpush1.bf16.msra.mxu1 %v5545_v51  ;;  %2089 = vmatpush1.bf16.msra.mxu0 %v5548_v52  ;;  %v5598_v51 = vld [vmem:[#allocation10 + $0x36c] ss:$24 sps:$4 sm:$0xff]   ;;  %v5593_v52 = vld [vmem:[#allocation10 + $0x360] ss:$24 sps:$4 sm:$0xff]  }
 0x1dd   :  { %2008 = vmatprep.subr.bf16.mxu1 %v5553_v53  ;;  %2090 = vmatprep.subr.bf16.mxu0 %v5556_v54  ;;  %v5596_v53 = vld [vmem:[#allocation10 + $0x368] ss:$24 sps:$4 sm:$0xff]   ;;  %v5601_v54 = vld [vmem:[#allocation10 + $0x394] ss:$24 sps:$4 sm:$0xff]  }
 0x1e0   :  { %2009 = vmatpush1.bf16.msra.mxu1 %v5551_v55  ;;  %2091 = vmatpush1.bf16.msra.mxu0 %v5554_v56  ;;  %v5604_v55 = vld [vmem:[#allocation10 + $0x39c] ss:$24 sps:$4 sm:$0xff]   ;;  %v5599_v56 = vld [vmem:[#allocation10 + $0x390] ss:$24 sps:$4 sm:$0xff]  }
 0x1e1   :  { %2010 = vmatprep.subr.bf16.mxu1 %v5559_v57  ;;  %2092 = vmatprep.subr.bf16.mxu0 %v5562_v58  ;;  %v5602_v57 = vld [vmem:[#allocation10 + $0x398] ss:$24 sps:$4 sm:$0xff]   ;;  %v5607_v58 = vld [vmem:[#allocation10 + $0x3c4] ss:$24 sps:$4 sm:$0xff]  }
 0x1e4   :  { %2011 = vmatpush1.bf16.msra.mxu1 %v5557_v59  ;;  %2093 = vmatpush1.bf16.msra.mxu0 %v5560_v60  ;;  %v5610_v59 = vld [vmem:[#allocation10 + $0x3cc] ss:$24 sps:$4 sm:$0xff]   ;;  %v5605_v60 = vld [vmem:[#allocation10 + $0x3c0] ss:$24 sps:$4 sm:$0xff]  }
 0x1e5   :  { %2012 = vmatprep.subr.bf16.mxu1 %v5565_v61  ;;  %2094 = vmatprep.subr.bf16.mxu0 %v5568_v62  ;;  %v5608_v61 = vld [vmem:[#allocation10 + $0x3c8] ss:$24 sps:$4 sm:$0xff]   ;;  %v5613_v62 = vld [vmem:[#allocation10 + $0x3f4] ss:$24 sps:$4 sm:$0xff]  }
 0x1e8   :  { %2013 = vmatpush1.bf16.msra.mxu1 %v5563_v63  ;;  %2095 = vmatpush1.bf16.msra.mxu0 %v5566_v2  ;;  %v5616_v63 = vld [vmem:[#allocation10 + $0x3fc] ss:$24 sps:$4 sm:$0xff]   ;;  %v5611_v2 = vld [vmem:[#allocation10 + $0x3f0] ss:$24 sps:$4 sm:$0xff]  }
 0x1e9   :  { %2014 = vmatprep.subr.bf16.mxu1 %v5571_v3  ;;  %2096 = vmatprep.subr.bf16.mxu0 %v5574_v4  ;;  %v5614_v3 = vld [vmem:[#allocation10 + $0x3f8] ss:$24 sps:$4 sm:$0xff]   ;;  %v5619_v4 = vld [vmem:[#allocation10 + $0x424] ss:$24 sps:$4 sm:$0xff]  }
 0x1ec   :  { %2015 = vmatpush1.bf16.msra.mxu1 %v5569_v5  ;;  %2097 = vmatpush1.bf16.msra.mxu0 %v5572_v6  ;;  %v5622_v5 = vld [vmem:[#allocation10 + $0x42c] ss:$24 sps:$4 sm:$0xff]   ;;  %v5617_v6 = vld [vmem:[#allocation10 + $0x420] ss:$24 sps:$4 sm:$0xff]  }
 0x1ed   :  { %2016 = vmatprep.subr.bf16.mxu1 %v5577_v7  ;;  %2098 = vmatprep.subr.bf16.mxu0 %v5580_v8  ;;  %v5620_v7 = vld [vmem:[#allocation10 + $0x428] ss:$24 sps:$4 sm:$0xff]  }
 0x1f0   :  { %2017 = vmatpush1.bf16.msra.mxu1 %v5575_v9  ;;  %2099 = vmatpush1.bf16.msra.mxu0 %v5578_v10  ;;  %v5625_v9 = vld [vmem:[#allocation10 + $0x454] ss:$24 sps:$4 sm:$0xff]  }
 0x1f1   :  { %2027 = vmatprep.subr.bf16.mxu1 %v5583_v11  ;;  %2109 = vmatprep.subr.bf16.mxu0 %v5586_v12  ;;  %v5628_v10 = vld [vmem:[#allocation10 + $0x45c] ss:$24 sps:$4 sm:$0xff]   ;;  %v5623_v11 = vld [vmem:[#allocation10 + $0x450] ss:$24 sps:$4 sm:$0xff]  }
 0x1f2   :  { %v5626_v12 = vld [vmem:[#allocation10 + $0x458] ss:$24 sps:$4 sm:$0xff]  }
 0x266   :  { %v5141_v13 = vpop.f32.mrb[4].mxu1 }
 0x267   :  { %v5142_v14 = vpop.f32.mrb[5].mxu1 }
 0x268   :  { %v5143_v15 = vadd.f32 %v5142_v14, %v5141_v13  ;;  %v5144_v17 = vpop.f32.mrb[6].mxu1  ;;  %v5631_v14 = vld [vmem:[#allocation10 + $0x14] ss:$24 sps:$4 sm:$0xff]  }
 0x269   :  { %v5145_v20 = vpop.f32.mrb[7].mxu1  ;;  %v5629_v17 = vld [vmem:[#allocation10 + $0x10] ss:$24 sps:$4 sm:$0xff]  }
 0x26a   :  { %v1036_v25 = vadd.f32 %v5143_v15, %v531_v22  ;;  %v5703_v15 = vld [vmem:[#allocation11 + $0x4] ss:$12 sps:$4 sm:$0xff]   ;;  %v5701_v22 = vld [vmem:[#allocation11] ss:$12 sps:$4 sm:$0xff]  }
 0x286   :  { %v994_v26 = vpop.f32.mrb[4].mxu0  ;;  %v1075_v27 = vpop.f32.mrb[8].mxu1 }
 0x287   :  { %v5291_v28 = vadd.f32 %v994_v26, %v523_v23  ;;  %v6561_v29 = vadd.f32 %v1075_v27, %v1036_v25  ;;  %v996_v30 = vpop.f32.mrb[5].mxu0  ;;  %v5269_v31 = vpop.f32.mrb[9].mxu1  ;;  %v5706_v23 = vld [vmem:[#allocation11 + $0x1c] ss:$12 sps:$4 sm:$0xff]   ;;  %v5637_v25 = vld [vmem:[#allocation10 + $0x74] ss:$24 sps:$4 sm:$0xff]  }
 0x288   :  { %v5292_v32 = vadd.f32 %v996_v30, %v527_v24  ;;  %v998_v33 = vpop.f32.mrb[6].mxu0  ;;  %v1078_v34 = vpop.f32.mrb[10].mxu1  ;;  %v5632_v24 = vld [vmem:[#allocation10 + $0x40] ss:$24 sps:$4 sm:$0xff]   ;;  %v5707_v30 = vld [vmem:[#allocation11 + $0x30] ss:$12 sps:$4 sm:$0xff]  }
 0x289   :  { %v1081_v35 = vmul.f32 0.1, %v5291_v28  ;;  %v999_v36 = vpop.f32.mrb[7].mxu0  ;;  %v5270_v37 = vpop.f32.mrb[11].mxu1  ;;  %v1083_v8 = vmul.f32 0.1, %v6561_v29 }
 0x28a   :  { %v1082_v38 = vmul.f32 0.1, %v5292_v32  ;;  %v5704_v26 = vld [vmem:[#allocation11 + $0x18] ss:$12 sps:$4 sm:$0xff]   ;;  %v5709_v27 = vld [vmem:[#allocation11 + $0x34] ss:$12 sps:$4 sm:$0xff]  }
 0x28b   :  { %v1084_v39 = vmax.f32 %v5291_v28, %v1081_v35  ;;  %v1086_v13 = vmax.f32 %v6561_v29, %v1083_v8  ;;  %v5635_v28 = vld [vmem:[#allocation10 + $0x70] ss:$24 sps:$4 sm:$0xff]   ;;  %v5640_v29 = vld [vmem:[#allocation10 + $0xa4] ss:$24 sps:$4 sm:$0xff]   ;;  %v5712_v31 = vld [vmem:[#allocation11 + $0x4c] ss:$12 sps:$4 sm:$0xff]  }
 0x28c   :  { %v1085_v40 = vmax.f32 %v5292_v32, %v1082_v38  ;;  %v5638_v32 = vld [vmem:[#allocation10 + $0xa0] ss:$24 sps:$4 sm:$0xff]   ;;  %v5643_v33 = vld [vmem:[#allocation10 + $0xd4] ss:$24 sps:$4 sm:$0xff]   ;;  %v5715_v35 = vld [vmem:[#allocation11 + $0x64] ss:$12 sps:$4 sm:$0xff]  }
 0x28d   :  { %v6565_v44 = vpack.c.bf16 %v1084_v39, %v1084_v39  ;;  %v6575_v20 = vpack.c.bf16 %v1086_v13, %v1086_v13  ;;  %v5710_v34 = vld [vmem:[#allocation11 + $0x48] ss:$12 sps:$4 sm:$0xff]   ;;  %v5646_v37 = vld [vmem:[#allocation10 + $0x104] ss:$24 sps:$4 sm:$0xff]   ;;  %v5713_v38 = vld [vmem:[#allocation11 + $0x60] ss:$12 sps:$4 sm:$0xff]  }
 0x28e   :  { %v6563_v41 = vpack.c.bf16 %v1085_v40, %v1085_v40  ;;  %v5641_v36 = vld [vmem:[#allocation10 + $0xd0] ss:$24 sps:$4 sm:$0xff]   ;;  %v5644_v40 = vld [vmem:[#allocation10 + $0x100] ss:$24 sps:$4 sm:$0xff]   ;;  %v5673_v13 = vld [vmem:[#allocation10 + $0x2b4] ss:$24 sps:$4 sm:$0xff]  }
 0x28f   :  { %v5718_v39 = vld [vmem:[#allocation11 + $0x7c] ss:$12 sps:$4 sm:$0xff]  }
 0x290   :  { %2018 = vmatprep.mubr.bf16.mxu1 %v6563_v41  ;;  %2100 = vmatprep.mubr.bf16.mxu0 %v6563_v41  ;;  %v5665_v8 = vld [vmem:[#allocation10 + $0x250] ss:$24 sps:$4 sm:$0xff]  }
 0x291   :  { %2019 = vmatmul.mubr.bf16.vlgmr.msra.gmra.mrb[12].mxu1 %v6565_v44  ;;  %2101 = vmatmul.mubr.bf16.vlgmr.msra.gmra.mrb[8].mxu0 %v6565_v44 }
 0x292   :  { %2028 = vmatpush1.bf16.msra.mxu1 %v5581_v42  ;;  %2110 = vmatpush1.bf16.msra.mxu0 %v5584_v43  ;;  %v5716_v42 = vld [vmem:[#allocation11 + $0x78] ss:$12 sps:$4 sm:$0xff]   ;;  %v5721_v43 = vld [vmem:[#allocation11 + $0x94] ss:$12 sps:$4 sm:$0xff]  }
 0x293   :  { %2029 = vmatprep.subr.bf16.mxu1 %v5589_v45  ;;  %2111 = vmatprep.subr.bf16.mxu0 %v5592_v46  ;;  %v5647_v45 = vld [vmem:[#allocation10 + $0x130] ss:$24 sps:$4 sm:$0xff]   ;;  %v5652_v46 = vld [vmem:[#allocation10 + $0x164] ss:$24 sps:$4 sm:$0xff]  }
 0x294   :  { %2059 = vmatprep.mubr.bf16.mxu1 %v6336_v1  ;;  %2141 = vmatprep.mubr.bf16.mxu0 %v6336_v1 }
 0x296   :  { %2030 = vmatpush1.bf16.msra.mxu1 %v5587_v47  ;;  %2112 = vmatpush1.bf16.msra.mxu0 %v5590_v48  ;;  %v5719_v47 = vld [vmem:[#allocation11 + $0x90] ss:$12 sps:$4 sm:$0xff]   ;;  %v5724_v48 = vld [vmem:[#allocation11 + $0xac] ss:$12 sps:$4 sm:$0xff]  }
 0x297   :  { %2031 = vmatprep.subr.bf16.mxu1 %v5595_v49  ;;  %2113 = vmatprep.subr.bf16.mxu0 %v5598_v51  ;;  %v5650_v49 = vld [vmem:[#allocation10 + $0x160] ss:$24 sps:$4 sm:$0xff]   ;;  %v5655_v51 = vld [vmem:[#allocation10 + $0x194] ss:$24 sps:$4 sm:$0xff]  }
 0x29a   :  { %2032 = vmatpush1.bf16.msra.mxu1 %v5593_v52  ;;  %2114 = vmatpush1.bf16.msra.mxu0 %v5596_v53  ;;  %v5722_v52 = vld [vmem:[#allocation11 + $0xa8] ss:$12 sps:$4 sm:$0xff]   ;;  %v5727_v53 = vld [vmem:[#allocation11 + $0xc4] ss:$12 sps:$4 sm:$0xff]  }
 0x29b   :  { %2033 = vmatprep.subr.bf16.mxu1 %v5601_v54  ;;  %2115 = vmatprep.subr.bf16.mxu0 %v5604_v55  ;;  %v5653_v54 = vld [vmem:[#allocation10 + $0x190] ss:$24 sps:$4 sm:$0xff]   ;;  %v5658_v55 = vld [vmem:[#allocation10 + $0x1c4] ss:$24 sps:$4 sm:$0xff]  }
 0x29e   :  { %2034 = vmatpush1.bf16.msra.mxu1 %v5599_v56  ;;  %2116 = vmatpush1.bf16.msra.mxu0 %v5602_v57  ;;  %v5725_v56 = vld [vmem:[#allocation11 + $0xc0] ss:$12 sps:$4 sm:$0xff]   ;;  %v5732_v57 = vld [vmem:[#allocation11 + $0xdc] ss:$12 sps:$4 sm:$0xff]  }
 0x29f   :  { %2035 = vmatprep.subr.bf16.mxu1 %v5607_v58  ;;  %2117 = vmatprep.subr.bf16.mxu0 %v5610_v59  ;;  %v5656_v58 = vld [vmem:[#allocation10 + $0x1c0] ss:$24 sps:$4 sm:$0xff]   ;;  %v5661_v59 = vld [vmem:[#allocation10 + $0x1f4] ss:$24 sps:$4 sm:$0xff]  }
 0x2a2   :  { %2036 = vmatpush1.bf16.msra.mxu1 %v5605_v60  ;;  %2118 = vmatpush1.bf16.msra.mxu0 %v5608_v61  ;;  %v5730_v60 = vld [vmem:[#allocation11 + $0xd8] ss:$12 sps:$4 sm:$0xff]   ;;  %v5737_v61 = vld [vmem:[#allocation11 + $0xf4] ss:$12 sps:$4 sm:$0xff]  }
 0x2a3   :  { %2037 = vmatprep.subr.bf16.mxu1 %v5613_v62  ;;  %2119 = vmatprep.subr.bf16.mxu0 %v5616_v63  ;;  %v5659_v62 = vld [vmem:[#allocation10 + $0x1f0] ss:$24 sps:$4 sm:$0xff]   ;;  %v5664_v63 = vld [vmem:[#allocation10 + $0x224] ss:$24 sps:$4 sm:$0xff]  }
 0x2a6   :  { %2038 = vmatpush1.bf16.msra.mxu1 %v5611_v2  ;;  %2120 = vmatpush1.bf16.msra.mxu0 %v5614_v3  ;;  %v5735_v2 = vld [vmem:[#allocation11 + $0xf0] ss:$12 sps:$4 sm:$0xff]   ;;  %v5742_v3 = vld [vmem:[#allocation11 + $0x10c] ss:$12 sps:$4 sm:$0xff]  }
 0x2a7   :  { %2039 = vmatprep.subr.bf16.mxu1 %v5619_v4  ;;  %2121 = vmatprep.subr.bf16.mxu0 %v5622_v5  ;;  %v5662_v4 = vld [vmem:[#allocation10 + $0x220] ss:$24 sps:$4 sm:$0xff]   ;;  %v5667_v5 = vld [vmem:[#allocation10 + $0x254] ss:$24 sps:$4 sm:$0xff]  }
 0x2aa   :  { %2040 = vmatpush1.bf16.msra.mxu1 %v5617_v6  ;;  %2122 = vmatpush1.bf16.msra.mxu0 %v5620_v7  ;;  %v5740_v6 = vld [vmem:[#allocation11 + $0x108] ss:$12 sps:$4 sm:$0xff]   ;;  %v5747_v7 = vld [vmem:[#allocation11 + $0x124] ss:$12 sps:$4 sm:$0xff]  }
 0x2ab   :  { %2041 = vmatprep.subr.bf16.mxu1 %v5625_v9  ;;  %2123 = vmatprep.subr.bf16.mxu0 %v5628_v10  ;;  %v5670_v9 = vld [vmem:[#allocation10 + $0x284] ss:$24 sps:$4 sm:$0xff]   ;;  %v5745_v10 = vld [vmem:[#allocation11 + $0x120] ss:$12 sps:$4 sm:$0xff]  }
 0x2ae   :  { %2042 = vmatpush1.bf16.msra.mxu1 %v5623_v11  ;;  %2124 = vmatpush1.bf16.msra.mxu0 %v5626_v12  ;;  %v5752_v11 = vld [vmem:[#allocation11 + $0x13c] ss:$12 sps:$4 sm:$0xff]   ;;  %v5668_v12 = vld [vmem:[#allocation10 + $0x280] ss:$24 sps:$4 sm:$0xff]  }
 0x2af   :  { %2150 = vmatprep.subr.bf16.mxu1 %v5631_v14  ;;  %3227 = vmatprep.subr.bf16.mxu0 %v5703_v15  ;;  %v5750_v14 = vld [vmem:[#allocation11 + $0x138] ss:$12 sps:$4 sm:$0xff]   ;;  %v5671_v15 = vld [vmem:[#allocation10 + $0x2b0] ss:$24 sps:$4 sm:$0xff]  }
 0x2b1   :  { %2060 = vmatmul.mubr.bf16.vlgmr.msra.gmra.mrb[12].mxu1 %v6575_v20  ;;  %2142 = vmatmul.mubr.bf16.vlgmr.msra.gmra.mrb[8].mxu0 %v6575_v20 }
 0x2b2   :  { %2151 = vmatpush1.bf16.msra.mxu1 %v5629_v17  ;;  %2182 = vmatprep.mubr.bf16.mxu1 %v6563_v41  ;;  %v5649_v41 = vld [vmem:[#allocation10 + $0x134] ss:$24 sps:$4 sm:$0xff]   ;;  %v5676_v17 = vld [vmem:[#allocation10 + $0x2e4] ss:$24 sps:$4 sm:$0xff]  }
 0x2b3   :  { %2152 = vmatprep.subr.bf16.mxu1 %v5634_v21  ;;  %3228 = vmatpush1.bf16.msra.mxu0 %v5701_v22  ;;  %v5674_v21 = vld [vmem:[#allocation10 + $0x2e0] ss:$24 sps:$4 sm:$0xff]   ;;  %v5679_v22 = vld [vmem:[#allocation10 + $0x314] ss:$24 sps:$4 sm:$0xff]  }
 0x2b4   :  { %3229 = vmatprep.subr.bf16.mxu0 %v5706_v23  ;;  %v5677_v23 = vld [vmem:[#allocation10 + $0x310] ss:$24 sps:$4 sm:$0xff]  }
 0x2b6   :  { %2153 = vmatpush1.bf16.msra.mxu1 %v5632_v24  ;;  %v5682_v24 = vld [vmem:[#allocation10 + $0x344] ss:$24 sps:$4 sm:$0xff]  }
 0x2b7   :  { %2154 = vmatprep.subr.bf16.mxu1 %v5637_v25  ;;  %3230 = vmatpush1.bf16.msra.mxu0 %v5704_v26  ;;  %v5680_v25 = vld [vmem:[#allocation10 + $0x340] ss:$24 sps:$4 sm:$0xff]   ;;  %v5685_v26 = vld [vmem:[#allocation10 + $0x374] ss:$24 sps:$4 sm:$0xff]  }
 0x2b8   :  { %3231 = vmatprep.subr.bf16.mxu0 %v5709_v27  ;;  %v5683_v27 = vld [vmem:[#allocation10 + $0x370] ss:$24 sps:$4 sm:$0xff]  }
 0x2ba   :  { %2155 = vmatpush1.bf16.msra.mxu1 %v5635_v28  ;;  %v5688_v28 = vld [vmem:[#allocation10 + $0x3a4] ss:$24 sps:$4 sm:$0xff]  }
 0x2bb   :  { %2156 = vmatprep.subr.bf16.mxu1 %v5640_v29  ;;  %3232 = vmatpush1.bf16.msra.mxu0 %v5707_v30  ;;  %v5686_v29 = vld [vmem:[#allocation10 + $0x3a0] ss:$24 sps:$4 sm:$0xff]   ;;  %v5691_v30 = vld [vmem:[#allocation10 + $0x3d4] ss:$24 sps:$4 sm:$0xff]  }
 0x2bc   :  { %3233 = vmatprep.subr.bf16.mxu0 %v5712_v31  ;;  %v5689_v31 = vld [vmem:[#allocation10 + $0x3d0] ss:$24 sps:$4 sm:$0xff]  }
 0x2be   :  { %2157 = vmatpush1.bf16.msra.mxu1 %v5638_v32  ;;  %v5694_v32 = vld [vmem:[#allocation10 + $0x404] ss:$24 sps:$4 sm:$0xff]  }
 0x2bf   :  { %2158 = vmatprep.subr.bf16.mxu1 %v5643_v33  ;;  %3234 = vmatpush1.bf16.msra.mxu0 %v5710_v34  ;;  %v5697_v33 = vld [vmem:[#allocation10 + $0x434] ss:$24 sps:$4 sm:$0xff]  }
 0x2c0   :  { %3235 = vmatprep.subr.bf16.mxu0 %v5715_v35  ;;  %v5757_v34 = vld [vmem:[#allocation11 + $0x154] ss:$12 sps:$4 sm:$0xff]   ;;  %v5695_v35 = vld [vmem:[#allocation10 + $0x430] ss:$24 sps:$4 sm:$0xff]  }
 0x2c2   :  { %2159 = vmatpush1.bf16.msra.mxu1 %v5641_v36  ;;  %v5700_v36 = vld [vmem:[#allocation10 + $0x464] ss:$24 sps:$4 sm:$0xff]  }
 0x2c3   :  { %2160 = vmatprep.subr.bf16.mxu1 %v5646_v37  ;;  %3236 = vmatpush1.bf16.msra.mxu0 %v5713_v38  ;;  %v5762_v37 = vld [vmem:[#allocation11 + $0x16c] ss:$12 sps:$4 sm:$0xff]   ;;  %v5760_v38 = vld [vmem:[#allocation11 + $0x168] ss:$12 sps:$4 sm:$0xff]  }
 0x2c4   :  { %3237 = vmatprep.subr.bf16.mxu0 %v5718_v39  ;;  %v5698_v39 = vld [vmem:[#allocation10 + $0x460] ss:$24 sps:$4 sm:$0xff]  }
 0x2c6   :  { %2161 = vmatpush1.bf16.msra.mxu1 %v5644_v40  ;;  %v5728_v40 = vld [vmem:[#allocation11 + $0xc8] ss:$12 sps:$4 sm:$0xff]  }
 0x2c7   :  { %2162 = vmatprep.subr.bf16.mxu1 %v5649_v41  ;;  %3238 = vmatpush1.bf16.msra.mxu0 %v5716_v42  ;;  %v5767_v41 = vld [vmem:[#allocation11 + $0x184] ss:$12 sps:$4 sm:$0xff]   ;;  %v5729_v42 = vld [vmem:[#allocation11 + $0x8] ss:$12 sps:$4 sm:$0xff]  }
 0x2c8   :  { %3239 = vmatprep.subr.bf16.mxu0 %v5721_v43  ;;  %v5733_v43 = vld [vmem:[#allocation11 + $0xe0] ss:$12 sps:$4 sm:$0xff]  }
 0x2ca   :  { %2163 = vmatpush1.bf16.msra.mxu1 %v5647_v45  ;;  %v5734_v45 = vld [vmem:[#allocation11 + $0x20] ss:$12 sps:$4 sm:$0xff]  }
 0x2cb   :  { %2164 = vmatprep.subr.bf16.mxu1 %v5652_v46  ;;  %3240 = vmatpush1.bf16.msra.mxu0 %v5719_v47  ;;  %v5738_v46 = vld [vmem:[#allocation11 + $0xf8] ss:$12 sps:$4 sm:$0xff]  }
 0x2cc   :  { %3241 = vmatprep.subr.bf16.mxu0 %v5724_v48  ;;  %v5739_v47 = vld [vmem:[#allocation11 + $0x38] ss:$12 sps:$4 sm:$0xff]   ;;  %v5743_v48 = vld [vmem:[#allocation11 + $0x110] ss:$12 sps:$4 sm:$0xff]  }
 0x2ce   :  { %2165 = vmatpush1.bf16.msra.mxu1 %v5650_v49  ;;  %v5744_v49 = vld [vmem:[#allocation11 + $0x50] ss:$12 sps:$4 sm:$0xff]  }
 0x2cf   :  { %2166 = vmatprep.subr.bf16.mxu1 %v5655_v51  ;;  %3242 = vmatpush1.bf16.msra.mxu0 %v5722_v52  ;;  %v5748_v51 = vld [vmem:[#allocation11 + $0x128] ss:$12 sps:$4 sm:$0xff]  }
 0x2d0   :  { %3243 = vmatprep.subr.bf16.mxu0 %v5727_v53  ;;  %v5749_v52 = vld [vmem:[#allocation11 + $0x68] ss:$12 sps:$4 sm:$0xff]   ;;  %v5753_v53 = vld [vmem:[#allocation11 + $0x140] ss:$12 sps:$4 sm:$0xff]  }
 0x2d2   :  { %2167 = vmatpush1.bf16.msra.mxu1 %v5653_v54  ;;  %v5754_v54 = vld [vmem:[#allocation11 + $0x80] ss:$12 sps:$4 sm:$0xff]  }
 0x2d3   :  { %2168 = vmatprep.subr.bf16.mxu1 %v5658_v55  ;;  %3244 = vmatpush1.bf16.msra.mxu0 %v5725_v56  ;;  %v5759_v55 = vld [vmem:[#allocation11 + $0x98] ss:$12 sps:$4 sm:$0xff]   ;;  %v5763_v56 = vld [vmem:[#allocation11 + $0x170] ss:$12 sps:$4 sm:$0xff]  }
 0x2d4   :  { %3245 = vmatprep.subr.bf16.mxu0 %v5732_v57  ;;  %v5764_v57 = vld [vmem:[#allocation11 + $0xb0] ss:$12 sps:$4 sm:$0xff]  }
 0x2d6   :  { %2169 = vmatpush1.bf16.msra.mxu1 %v5656_v58  ;;  %v5768_v58 = vld [vmem:[#allocation11 + $0x248] ss:$12 sps:$4 sm:$0xff]  }
 0x2d7   :  { %2170 = vmatprep.subr.bf16.mxu1 %v5661_v59  ;;  %3246 = vmatpush1.bf16.msra.mxu0 %v5730_v60  ;;  %v6586_v59 = vld [vmem:[%s6658_s6] sm:$0x3f]  ;;  %v1250_v60 = vsub.s32 3, %v6526_v16 }
 0x2d8   :  { %3247 = vmatprep.subr.bf16.mxu0 %v5737_v61  ;;  %v1239_v61 = vrot.slane %v6586_v59, %v6531_v18 }
 0x2da   :  { %2171 = vmatpush1.bf16.msra.mxu1 %v5659_v62  ;;  %v1243_v62 = vrot.slane %v6586_v59, %v6534_v19 }
 0x2db   :  { %2172 = vmatprep.subr.bf16.mxu1 %v5664_v63  ;;  %3248 = vmatpush1.bf16.msra.mxu0 %v5735_v2  ;;  %v1251_v63 = vrot.slane %v6586_v59, %v1250_v60 }
 0x2dc   :  { %3249 = vmatprep.subr.bf16.mxu0 %v5742_v3 }
 0x2de   :  { %2173 = vmatpush1.bf16.msra.mxu1 %v5662_v4 }
 0x2df   :  { %2174 = vmatprep.subr.bf16.mxu1 %v5667_v5  ;;  %3250 = vmatpush1.bf16.msra.mxu0 %v5740_v6 }
 0x2e0   :  { %3251 = vmatprep.subr.bf16.mxu0 %v5747_v7 }
 0x2e2   :  { %2175 = vmatpush1.bf16.msra.mxu1 %v5665_v8 }
 0x2e3   :  { %2176 = vmatprep.subr.bf16.mxu1 %v5670_v9  ;;  %3252 = vmatpush1.bf16.msra.mxu0 %v5745_v10 }
 0x2e4   :  { %3253 = vmatprep.subr.bf16.mxu0 %v5752_v11 }
 0x2e6   :  { %2177 = vmatpush1.bf16.msra.mxu1 %v5668_v12 }
 0x2e7   :  { %2178 = vmatprep.subr.bf16.mxu1 %v5673_v13  ;;  %3254 = vmatpush1.bf16.msra.mxu0 %v5750_v14 }
 0x2e8   :  { %3255 = vmatprep.subr.bf16.mxu0 %v5757_v34  ;;  %v5779_v34 = vld [vmem:[#allocation11 + $0x1b8] ss:$12 sps:$4 sm:$0xff]  }
 0x2ea   :  { %2179 = vmatpush1.bf16.msra.mxu1 %v5671_v15 }
 0x2eb   :  { %2180 = vmatprep.subr.bf16.mxu1 %v5676_v17 }
 0x2ee   :  { %2181 = vmatpush1.bf16.msra.mxu1 %v5674_v21 }
 0x2ef   :  { %2191 = vmatprep.subr.bf16.mxu1 %v5679_v22 }
 0x2f1   :  { %2183 = vmatmul.mubr.bf16.vlgmr.msra.gmra.mrb[16].mxu1 %v6565_v44  ;;  %v5692_v44 = vld [vmem:[#allocation10 + $0x400] ss:$24 sps:$4 sm:$0xff]  }
 0x2f2   :  { %2192 = vmatpush1.bf16.msra.mxu1 %v5677_v23  ;;  %2223 = vmatprep.mubr.bf16.mxu1 %v6336_v1  ;;  %v5755_v1 = vld [vmem:[#allocation11 + $0x150] ss:$12 sps:$4 sm:$0xff]  }
 0x2f3   :  { %2193 = vmatprep.subr.bf16.mxu1 %v5682_v24  ;;  %3256 = vmatpush1.bf16.msra.mxu0 %v5755_v1  ;;  %v5765_v24 = vld [vmem:[#allocation11 + $0x180] ss:$12 sps:$4 sm:$0xff]  }
 0x2f4   :  { %3257 = vmatprep.subr.bf16.mxu0 %v5762_v37  ;;  %v5782_v1 = vld [vmem:[#allocation11 + $0x1cc] ss:$12 sps:$4 sm:$0xff]   ;;  %v5784_v37 = vld [vmem:[#allocation11 + $0x1d0] ss:$12 sps:$4 sm:$0xff]  }
 0x2f6   :  { %2194 = vmatpush1.bf16.msra.mxu1 %v5680_v25  ;;  %v5769_v25 = vld [vmem:[#allocation11 + $0x188] ss:$12 sps:$4 sm:$0xff]  }
 0x2f7   :  { %2195 = vmatprep.subr.bf16.mxu1 %v5685_v26  ;;  %3258 = vmatpush1.bf16.msra.mxu0 %v5760_v38  ;;  %v5787_v38 = vld [vmem:[#allocation11 + $0x1e4] ss:$12 sps:$4 sm:$0xff]  }
 0x2f8   :  { %3268 = vmatprep.subr.bf16.mxu0 %v5767_v41  ;;  %v5789_v41 = vld [vmem:[#allocation11 + $0x1e8] ss:$12 sps:$4 sm:$0xff]  }
 0x2fa   :  { %2196 = vmatpush1.bf16.msra.mxu1 %v5683_v27  ;;  %v5772_v27 = vld [vmem:[#allocation11 + $0x19c] ss:$12 sps:$4 sm:$0xff]  }
 0x2fb   :  { %2197 = vmatprep.subr.bf16.mxu1 %v5688_v28  ;;  %v5773_v28 = vld [vmem:[#allocation11 + $0x260] ss:$12 sps:$4 sm:$0xff]  }
 0x2fe   :  { %2198 = vmatpush1.bf16.msra.mxu1 %v5686_v29 }
 0x2ff   :  { %2199 = vmatprep.subr.bf16.mxu1 %v5691_v30  ;;  %v5770_v30 = vld [vmem:[#allocation11 + $0x198] ss:$12 sps:$4 sm:$0xff]  }
 0x302   :  { %2200 = vmatpush1.bf16.msra.mxu1 %v5689_v31  ;;  %v5774_v31 = vld [vmem:[#allocation11 + $0x1a0] ss:$12 sps:$4 sm:$0xff]  }
 0x303   :  { %2201 = vmatprep.subr.bf16.mxu1 %v5694_v32  ;;  %v5777_v32 = vld [vmem:[#allocation11 + $0x1b4] ss:$12 sps:$4 sm:$0xff]  }
 0x306   :  { %2202 = vmatpush1.bf16.msra.mxu1 %v5692_v44  ;;  %v5778_v44 = vld [vmem:[#allocation11 + $0x278] ss:$12 sps:$4 sm:$0xff]  }
 0x307   :  { %2203 = vmatprep.subr.bf16.mxu1 %v5697_v33  ;;  %v5775_v33 = vld [vmem:[#allocation11 + $0x1b0] ss:$12 sps:$4 sm:$0xff]  }
 0x30a   :  { %2204 = vmatpush1.bf16.msra.mxu1 %v5695_v35  ;;  %v5783_v35 = vld [vmem:[#allocation11 + $0x290] ss:$12 sps:$4 sm:$0xff]  }
 0x30b   :  { %2205 = vmatprep.subr.bf16.mxu1 %v5700_v36  ;;  %v5780_v36 = vld [vmem:[#allocation11 + $0x1c8] ss:$12 sps:$4 sm:$0xff]  }
 0x30e   :  { %2206 = vmatpush1.bf16.msra.mxu1 %v5698_v39  ;;  %v5788_v39 = vld [vmem:[#allocation11 + $0x2a8] ss:$12 sps:$4 sm:$0xff]  }
 0x30f   :  { %5156 = vmatprep.subr.bf16.mxu1 %v5728_v40  ;;  %v5785_v40 = vld [vmem:[#allocation11 + $0x1e0] ss:$12 sps:$4 sm:$0xff]  }
 0x311   :  { %2224 = vmatmul.mubr.bf16.vlgmr.msra.gmra.mrb[16].mxu1 %v6575_v20  ;;  %v5758_v20 = vld [vmem:[#allocation11 + $0x158] ss:$12 sps:$4 sm:$0xff]  }
 0x312   :  { %5157 = vmatpush3.bf16.msra.mxu1 %v5729_v42  ;;  %v1247_v42 = vrot.slane %v6586_v59, %v6547_v50 }
 0x313   :  { %5158 = vmatprep.subr.bf16.mxu1 %v5733_v43  ;;  %v5792_v43 = vld [vmem:[#allocation11 + $0x1fc] ss:$12 sps:$4 sm:$0xff]  }
 0x316   :  { %5159 = vmatpush3.bf16.msra.mxu1 %v5734_v45  ;;  %v5793_v45 = vld [vmem:[#allocation11 + $0x2c0] ss:$12 sps:$4 sm:$0xff]  }
 0x317   :  { %5160 = vmatprep.subr.bf16.mxu1 %v5738_v46  ;;  %v5790_v46 = vld [vmem:[#allocation11 + $0x1f8] ss:$12 sps:$4 sm:$0xff]  }
 0x31a   :  { %5161 = vmatpush3.bf16.msra.mxu1 %v5739_v47  ;;  %v5794_v47 = vld [vmem:[#allocation11 + $0x200] ss:$12 sps:$4 sm:$0xff]  }
 0x31b   :  { %5162 = vmatprep.subr.bf16.mxu1 %v5743_v48 }
 0x31e   :  { %5163 = vmatpush3.bf16.msra.mxu1 %v5744_v49  ;;  %v5797_v49 = vld [vmem:[#allocation11 + $0x214] ss:$12 sps:$4 sm:$0xff]  }
 0x31f   :  { %5164 = vmatprep.subr.bf16.mxu1 %v5748_v51  ;;  %v5798_v51 = vld [vmem:[#allocation11 + $0x2d8] ss:$12 sps:$4 sm:$0xff]  }
 0x322   :  { %5165 = vmatpush3.bf16.msra.mxu1 %v5749_v52  ;;  %v5795_v52 = vld [vmem:[#allocation11 + $0x210] ss:$12 sps:$4 sm:$0xff]  }
 0x323   :  { %5166 = vmatprep.subr.bf16.mxu1 %v5753_v53  ;;  %v5799_v53 = vld [vmem:[#allocation11 + $0x218] ss:$12 sps:$4 sm:$0xff]  }
 0x326   :  { %5167 = vmatpush3.bf16.msra.mxu1 %v5754_v54 }
 0x327   :  { %5168 = vmatprep.subr.bf16.mxu1 %v5758_v20  ;;  %v5802_v20 = vld [vmem:[#allocation11 + $0x22c] ss:$12 sps:$4 sm:$0xff]  }
 0x32a   :  { %5169 = vmatpush3.bf16.msra.mxu1 %v5759_v55  ;;  %v5803_v55 = vld [vmem:[#allocation11 + $0x2f0] ss:$12 sps:$4 sm:$0xff]  }
 0x32b   :  { %5170 = vmatprep.subr.bf16.mxu1 %v5763_v56  ;;  %v5800_v56 = vld [vmem:[#allocation11 + $0x228] ss:$12 sps:$4 sm:$0xff]  }
 0x32e   :  { %5171 = vmatpush3.bf16.msra.mxu1 %v5764_v57  ;;  %v5804_v57 = vld [vmem:[#allocation11 + $0x230] ss:$12 sps:$4 sm:$0xff]  }
 0x32f   :  { %5178 = vmatprep.subr.bf16.mxu1 %v5768_v58 }
 0x384   :  { %v2061_v2 = vpop.f32.mrb[12].mxu1  ;;  %v6596_v3 = vpop.f32.mrb[8].mxu0 }
 0x385   :  { %v5293_v4 = vadd.f32 %v2061_v2, %v1239_v61  ;;  %v2063_v5 = vpop.f32.mrb[13].mxu1  ;;  %v2145_v6 = vpop.f32.mrb[9].mxu0  ;;  %v5295_v48 = vadd.f32 %v6596_v3, %v1247_v42  ;;  %v5807_v61 = vld [vmem:[#allocation11 + $0x244] ss:$12 sps:$4 sm:$0xff]   ;;  %v5833_v2 = vld [vmem:[#allocation11 + $0x308] ss:$12 sps:$4 sm:$0xff]  }
 0x386   :  { %v5294_v7 = vadd.f32 %v2063_v5, %v1243_v62  ;;  %v5296_v8 = vadd.f32 %v2145_v6, %v1251_v63  ;;  %v2065_v9 = vpop.f32.mrb[14].mxu1  ;;  %v2147_v10 = vpop.f32.mrb[10].mxu0  ;;  %v5832_v62 = vld [vmem:[#allocation11 + $0x3c8] ss:$12 sps:$4 sm:$0xff]   ;;  %v5805_v63 = vld [vmem:[#allocation11 + $0x240] ss:$12 sps:$4 sm:$0xff]  }
 0x387   :  { %v2232_v11 = vmul.f32 0.1, %v5293_v4  ;;  %v2066_v12 = vpop.f32.mrb[15].mxu1  ;;  %v2148_v13 = vpop.f32.mrb[11].mxu0  ;;  %v2234_v54 = vmul.f32 0.1, %v5295_v48 }
 0x388   :  { %v2233_v14 = vmul.f32 0.1, %v5294_v7  ;;  %v2235_v15 = vmul.f32 0.1, %v5296_v8  ;;  %v5837_v5 = vld [vmem:[#allocation11 + $0x3e0] ss:$12 sps:$4 sm:$0xff]  }
 0x389   :  { %v2238_v17 = vmax.f32 %v5293_v4, %v2232_v11  ;;  %v2240_v58 = vmax.f32 %v5295_v48, %v2234_v54  ;;  %v5810_v4 = vld [vmem:[#allocation11 + $0x25c] ss:$12 sps:$4 sm:$0xff]   ;;  %v5808_v6 = vld [vmem:[#allocation11 + $0x258] ss:$12 sps:$4 sm:$0xff]  }
 0x38a   :  { %v2239_v21 = vmax.f32 %v5294_v7, %v2233_v14  ;;  %v2241_v22 = vmax.f32 %v5296_v8, %v2235_v15  ;;  %v5838_v7 = vld [vmem:[#allocation11 + $0x320] ss:$12 sps:$4 sm:$0xff]   ;;  %v5842_v9 = vld [vmem:[#allocation11 + $0x3f8] ss:$12 sps:$4 sm:$0xff]   ;;  %v5811_v10 = vld [vmem:[#allocation11 + $0x270] ss:$12 sps:$4 sm:$0xff]  }
 0x38b   :  { %v2244_v26 = vpack.c.bf16 %v2238_v17, %v2238_v17  ;;  %v6601_v3 = vpack.c.bf16 %v2240_v58, %v2240_v58  ;;  %v5813_v8 = vld [vmem:[#allocation11 + $0x274] ss:$12 sps:$4 sm:$0xff]   ;;  %v5843_v11 = vld [vmem:[#allocation11 + $0x338] ss:$12 sps:$4 sm:$0xff]   ;;  %v5847_v13 = vld [vmem:[#allocation11 + $0x410] ss:$12 sps:$4 sm:$0xff]  }
 0x38c   :  { %v2245_v23 = vpack.c.bf16 %v2239_v21, %v2239_v21  ;;  %v2247_v29 = vpack.c.bf16 %v2241_v22, %v2241_v22  ;;  %v5816_v12 = vld [vmem:[#allocation11 + $0x28c] ss:$12 sps:$4 sm:$0xff]   ;;  %v5814_v14 = vld [vmem:[#allocation11 + $0x288] ss:$12 sps:$4 sm:$0xff]   ;;  %v5848_v15 = vld [vmem:[#allocation11 + $0x350] ss:$12 sps:$4 sm:$0xff]  }
 0x38d   :  { %v5819_v17 = vld [vmem:[#allocation11 + $0x2a4] ss:$12 sps:$4 sm:$0xff]   ;;  %v5852_v21 = vld [vmem:[#allocation11 + $0x428] ss:$12 sps:$4 sm:$0xff]   ;;  %v5817_v22 = vld [vmem:[#allocation11 + $0x2a0] ss:$12 sps:$4 sm:$0xff]  }
 0x38e   :  { %3259 = vmatprep.mubr.bf16.mxu0 %v2245_v23  ;;  %3382 = vmatprep.mubr.bf16.mxu1 %v2245_v23  ;;  %v5853_v23 = vld [vmem:[#allocation11 + $0x368] ss:$12 sps:$4 sm:$0xff]   ;;  %v5851_v42 = vld [vmem:[#allocation11 + $0x364] ss:$12 sps:$4 sm:$0xff]  }
 0x38f   :  { %3260 = vmatmul.mubr.bf16.vlgmr.msra.gmra.mrb[12].mxu0 %v2244_v26  ;;  %3383 = vmatmul.mubr.bf16.vlgmr.msra.gmra.mrb[20].mxu1 %v2244_v26  ;;  %v5820_v26 = vld [vmem:[#allocation11 + $0x2b8] ss:$12 sps:$4 sm:$0xff]   ;;  %v5859_v54 = vld [vmem:[#allocation11 + $0x390] ss:$12 sps:$4 sm:$0xff]  }
 0x390   :  { %3269 = vmatpush1.bf16.msra.mxu0 %v5765_v24  ;;  %5179 = vmatpush3.bf16.msra.mxu1 %v5769_v25  ;;  %v5822_v24 = vld [vmem:[#allocation11 + $0x2bc] ss:$12 sps:$4 sm:$0xff]   ;;  %v5857_v25 = vld [vmem:[#allocation11 + $0x440] ss:$12 sps:$4 sm:$0xff]   ;;  %v5854_v48 = vld [vmem:[#allocation11 + $0x378] ss:$12 sps:$4 sm:$0xff]  }
 0x391   :  { %3300 = vmatprep.mubr.bf16.mxu0 %v2247_v29  ;;  %3422 = vmatprep.mubr.bf16.mxu1 %v2247_v29  ;;  %v5862_v29 = vld [vmem:[#allocation11 + $0x458] ss:$12 sps:$4 sm:$0xff]  }
 0x392   :  { %3270 = vmatprep.subr.bf16.mxu0 %v5772_v27  ;;  %5180 = vmatprep.subr.bf16.mxu1 %v5773_v28  ;;  %v5858_v27 = vld [vmem:[#allocation11 + $0x380] ss:$12 sps:$4 sm:$0xff]  }
 0x393   :  { %v5825_v28 = vld [vmem:[#allocation11 + $0x2d4] ss:$12 sps:$4 sm:$0xff]  }
 0x394   :  { %3271 = vmatpush1.bf16.msra.mxu0 %v5770_v30  ;;  %5181 = vmatpush3.bf16.msra.mxu1 %v5774_v31  ;;  %v5823_v30 = vld [vmem:[#allocation11 + $0x2d0] ss:$12 sps:$4 sm:$0xff]   ;;  %v5863_v31 = vld [vmem:[#allocation11 + $0x398] ss:$12 sps:$4 sm:$0xff]  }
 0x395   :  { %3272 = vmatprep.subr.bf16.mxu0 %v5777_v32  ;;  %5182 = vmatprep.subr.bf16.mxu1 %v5778_v44  ;;  %v5828_v32 = vld [vmem:[#allocation11 + $0x2ec] ss:$12 sps:$4 sm:$0xff]   ;;  %v5867_v44 = vld [vmem:[#allocation11 + $0x470] ss:$12 sps:$4 sm:$0xff]  }
 0x398   :  { %3273 = vmatpush1.bf16.msra.mxu0 %v5775_v33  ;;  %5183 = vmatpush3.bf16.msra.mxu1 %v5779_v34  ;;  %v5826_v33 = vld [vmem:[#allocation11 + $0x2e8] ss:$12 sps:$4 sm:$0xff]   ;;  %v5868_v34 = vld [vmem:[#allocation11 + $0x3b0] ss:$12 sps:$4 sm:$0xff]  }
 0x399   :  { %3274 = vmatprep.subr.bf16.mxu0 %v5782_v1  ;;  %5184 = vmatprep.subr.bf16.mxu1 %v5783_v35  ;;  %v5831_v1 = vld [vmem:[#allocation11 + $0x304] ss:$12 sps:$4 sm:$0xff]   ;;  %v5829_v35 = vld [vmem:[#allocation11 + $0x300] ss:$12 sps:$4 sm:$0xff]  }
 0x39c   :  { %3275 = vmatpush1.bf16.msra.mxu0 %v5780_v36  ;;  %5185 = vmatpush3.bf16.msra.mxu1 %v5784_v37  ;;  %v5836_v36 = vld [vmem:[#allocation11 + $0x31c] ss:$12 sps:$4 sm:$0xff]   ;;  %v5834_v37 = vld [vmem:[#allocation11 + $0x318] ss:$12 sps:$4 sm:$0xff]  }
 0x39d   :  { %3276 = vmatprep.subr.bf16.mxu0 %v5787_v38  ;;  %5186 = vmatprep.subr.bf16.mxu1 %v5788_v39  ;;  %v5841_v38 = vld [vmem:[#allocation11 + $0x334] ss:$12 sps:$4 sm:$0xff]   ;;  %v5839_v39 = vld [vmem:[#allocation11 + $0x330] ss:$12 sps:$4 sm:$0xff]  }
 0x3a0   :  { %3277 = vmatpush1.bf16.msra.mxu0 %v5785_v40  ;;  %5187 = vmatpush3.bf16.msra.mxu1 %v5789_v41  ;;  %v5846_v40 = vld [vmem:[#allocation11 + $0x34c] ss:$12 sps:$4 sm:$0xff]   ;;  %v5844_v41 = vld [vmem:[#allocation11 + $0x348] ss:$12 sps:$4 sm:$0xff]  }
 0x3a1   :  { %3278 = vmatprep.subr.bf16.mxu0 %v5792_v43  ;;  %5188 = vmatprep.subr.bf16.mxu1 %v5793_v45  ;;  %v5849_v43 = vld [vmem:[#allocation11 + $0x360] ss:$12 sps:$4 sm:$0xff]   ;;  %v5856_v45 = vld [vmem:[#allocation11 + $0x37c] ss:$12 sps:$4 sm:$0xff]  }
 0x3a4   :  { %3279 = vmatpush1.bf16.msra.mxu0 %v5790_v46  ;;  %5189 = vmatpush3.bf16.msra.mxu1 %v5794_v47  ;;  %v1254_v46 = vsub.s32 4, %v6526_v16  ;;  %v1258_v47 = vsub.s32 5, %v6526_v16 }
 0x3a5   :  { %3280 = vmatprep.subr.bf16.mxu0 %v5797_v49  ;;  %5190 = vmatprep.subr.bf16.mxu1 %v5798_v51  ;;  %v5861_v51 = vld [vmem:[#allocation11 + $0x394] ss:$12 sps:$4 sm:$0xff]  }
 0x3a6   :  { %v1255_v49 = vrot.slane %v6586_v59, %v1254_v46  ;;  %v5920_v46 = vld [vmem:[#allocation13 + $0x88] ss:$16 sps:$4 sm:$0xff]  }
 0x3a8   :  { %3281 = vmatpush1.bf16.msra.mxu0 %v5795_v52  ;;  %5191 = vmatpush3.bf16.msra.mxu1 %v5799_v53  ;;  %v1259_v52 = vrot.slane %v6586_v59, %v1258_v47  ;;  %v5869_v59 = vld [vmem:[#allocation11 + $0x3c0] ss:$12 sps:$4 sm:$0xff]  }
 0x3a9   :  { %3282 = vmatprep.subr.bf16.mxu0 %v5802_v20  ;;  %5192 = vmatprep.subr.bf16.mxu1 %v5803_v55  ;;  %v5928_v47 = vld [vmem:[#allocation13 + $0xac] ss:$16 sps:$4 sm:$0xff]  }
 0x3ac   :  { %3283 = vmatpush1.bf16.msra.mxu0 %v5800_v56  ;;  %5193 = vmatpush3.bf16.msra.mxu1 %v5804_v57  ;;  %v5866_v56 = vld [vmem:[#allocation11 + $0x3ac] ss:$12 sps:$4 sm:$0xff]  }
 0x3ad   :  { %3284 = vmatprep.subr.bf16.mxu0 %v5807_v61  ;;  %5200 = vmatprep.subr.bf16.mxu1 %v5832_v62 }
 0x3af   :  { %3423 = vmatmul.mubr.bf16.vlgmr.msra.gmra.mrb[24].mxu1 %v6601_v3 }
 0x3b0   :  { %3285 = vmatpush1.bf16.msra.mxu0 %v5805_v63  ;;  %5201 = vmatpush3.bf16.msra.mxu1 %v5833_v2  ;;  %v5864_v2 = vld [vmem:[#allocation11 + $0x3a8] ss:$12 sps:$4 sm:$0xff]  }
 0x3b1   :  { %3286 = vmatprep.subr.bf16.mxu0 %v5810_v4  ;;  %5202 = vmatprep.subr.bf16.mxu1 %v5837_v5  ;;  %v5871_v4 = vld [vmem:[#allocation11 + $0x3c4] ss:$12 sps:$4 sm:$0xff]  }
 0x3b4   :  { %3287 = vmatpush1.bf16.msra.mxu0 %v5808_v6  ;;  %5203 = vmatpush3.bf16.msra.mxu1 %v5838_v7 }
 0x3b5   :  { %3288 = vmatprep.subr.bf16.mxu0 %v5813_v8  ;;  %5204 = vmatprep.subr.bf16.mxu1 %v5842_v9  ;;  %v5874_v8 = vld [vmem:[#allocation11 + $0x3dc] ss:$12 sps:$4 sm:$0xff]   ;;  %v5872_v9 = vld [vmem:[#allocation11 + $0x3d8] ss:$12 sps:$4 sm:$0xff]  }
 0x3b8   :  { %3289 = vmatpush1.bf16.msra.mxu0 %v5811_v10  ;;  %5205 = vmatpush3.bf16.msra.mxu1 %v5843_v11  ;;  %v5877_v10 = vld [vmem:[#allocation11 + $0x3f4] ss:$12 sps:$4 sm:$0xff]   ;;  %v5875_v11 = vld [vmem:[#allocation11 + $0x3f0] ss:$12 sps:$4 sm:$0xff]  }
 0x3b9   :  { %3290 = vmatprep.subr.bf16.mxu0 %v5816_v12  ;;  %5206 = vmatprep.subr.bf16.mxu1 %v5847_v13  ;;  %v5880_v12 = vld [vmem:[#allocation11 + $0x40c] ss:$12 sps:$4 sm:$0xff]   ;;  %v5878_v13 = vld [vmem:[#allocation11 + $0x408] ss:$12 sps:$4 sm:$0xff]  }
 0x3bc   :  { %3291 = vmatpush1.bf16.msra.mxu0 %v5814_v14  ;;  %5207 = vmatpush3.bf16.msra.mxu1 %v5848_v15  ;;  %v5883_v14 = vld [vmem:[#allocation11 + $0x424] ss:$12 sps:$4 sm:$0xff]   ;;  %v5881_v15 = vld [vmem:[#allocation11 + $0x420] ss:$12 sps:$4 sm:$0xff]  }
 0x3bd   :  { %3292 = vmatprep.subr.bf16.mxu0 %v5819_v17  ;;  %5208 = vmatprep.subr.bf16.mxu1 %v5852_v21  ;;  %v5886_v17 = vld [vmem:[#allocation11 + $0x43c] ss:$12 sps:$4 sm:$0xff]   ;;  %v5884_v21 = vld [vmem:[#allocation11 + $0x438] ss:$12 sps:$4 sm:$0xff]  }
 0x3c0   :  { %3293 = vmatpush1.bf16.msra.mxu0 %v5817_v22  ;;  %5209 = vmatpush3.bf16.msra.mxu1 %v5853_v23  ;;  %v5889_v22 = vld [vmem:[#allocation11 + $0x454] ss:$12 sps:$4 sm:$0xff]   ;;  %v5887_v23 = vld [vmem:[#allocation11 + $0x450] ss:$12 sps:$4 sm:$0xff]  }
 0x3c1   :  { %3294 = vmatprep.subr.bf16.mxu0 %v5822_v24  ;;  %5210 = vmatprep.subr.bf16.mxu1 %v5857_v25  ;;  %v5892_v24 = vld [vmem:[#allocation11 + $0x46c] ss:$12 sps:$4 sm:$0xff]   ;;  %v5893_v25 = vld [vmem:[#allocation13] ss:$16 sps:$4 sm:$0xff]  }
 0x3c4   :  { %3295 = vmatpush1.bf16.msra.mxu0 %v5820_v26  ;;  %5211 = vmatpush3.bf16.msra.mxu1 %v5858_v27  ;;  %v5895_v26 = vld [vmem:[#allocation13 + $0x4] ss:$16 sps:$4 sm:$0xff]  }
 0x3c5   :  { %3296 = vmatprep.subr.bf16.mxu0 %v5825_v28  ;;  %5212 = vmatprep.subr.bf16.mxu1 %v5862_v29  ;;  %v5901_v27 = vld [vmem:[#allocation13 + $0x24] ss:$16 sps:$4 sm:$0xff]   ;;  %v5898_v29 = vld [vmem:[#allocation13 + $0xc] ss:$16 sps:$4 sm:$0xff]  }
 0x3c6   :  { %v5890_v28 = vld [vmem:[#allocation11 + $0x468] ss:$12 sps:$4 sm:$0xff]  }
 0x3c8   :  { %3297 = vmatpush1.bf16.msra.mxu0 %v5823_v30  ;;  %5213 = vmatpush3.bf16.msra.mxu1 %v5863_v31  ;;  %v5899_v30 = vld [vmem:[#allocation13 + $0x20] ss:$16 sps:$4 sm:$0xff]   ;;  %v5907_v31 = vld [vmem:[#allocation13 + $0x44] ss:$16 sps:$4 sm:$0xff]  }
 0x3c9   :  { %3298 = vmatprep.subr.bf16.mxu0 %v5828_v32  ;;  %5214 = vmatprep.subr.bf16.mxu1 %v5867_v44  ;;  %v5896_v32 = vld [vmem:[#allocation13 + $0x8] ss:$16 sps:$4 sm:$0xff]   ;;  %v5904_v44 = vld [vmem:[#allocation13 + $0x2c] ss:$16 sps:$4 sm:$0xff]  }
 0x3cc   :  { %3299 = vmatpush1.bf16.msra.mxu0 %v5826_v33  ;;  %5215 = vmatpush3.bf16.msra.mxu1 %v5868_v34  ;;  %v5905_v33 = vld [vmem:[#allocation13 + $0x40] ss:$16 sps:$4 sm:$0xff]   ;;  %v5913_v34 = vld [vmem:[#allocation13 + $0x64] ss:$16 sps:$4 sm:$0xff]  }
 0x3cd   :  { %3309 = vmatprep.subr.bf16.mxu0 %v5831_v1  ;;  %4270 = vmatprep.subr.bf16.mxu1 %v5895_v26  ;;  %v5902_v1 = vld [vmem:[#allocation13 + $0x28] ss:$16 sps:$4 sm:$0xff]   ;;  %v5982_v26 = vld [vmem:[#allocation13 + $0x1cc] ss:$16 sps:$4 sm:$0xff]  }
 0x3cf   :  { %3301 = vmatmul.mubr.bf16.vlgmr.msra.gmra.mrb[12].mxu0 %v6601_v3 }
 0x3d0   :  { %3310 = vmatpush1.bf16.msra.mxu0 %v5829_v35  ;;  %v5910_v35 = vld [vmem:[#allocation13 + $0x4c] ss:$16 sps:$4 sm:$0xff]  }
 0x3d1   :  { %3311 = vmatprep.subr.bf16.mxu0 %v5836_v36  ;;  %v5911_v36 = vld [vmem:[#allocation13 + $0x60] ss:$16 sps:$4 sm:$0xff]  }
 0x3d4   :  { %3312 = vmatpush1.bf16.msra.mxu0 %v5834_v37  ;;  %v5919_v37 = vld [vmem:[#allocation13 + $0x84] ss:$16 sps:$4 sm:$0xff]  }
 0x3d5   :  { %3313 = vmatprep.subr.bf16.mxu0 %v5841_v38  ;;  %v5908_v38 = vld [vmem:[#allocation13 + $0x48] ss:$16 sps:$4 sm:$0xff]  }
 0x3d8   :  { %3314 = vmatpush1.bf16.msra.mxu0 %v5839_v39  ;;  %v5916_v39 = vld [vmem:[#allocation13 + $0x6c] ss:$16 sps:$4 sm:$0xff]  }
 0x3d9   :  { %3315 = vmatprep.subr.bf16.mxu0 %v5846_v40  ;;  %v5917_v40 = vld [vmem:[#allocation13 + $0x80] ss:$16 sps:$4 sm:$0xff]  }
 0x3dc   :  { %3316 = vmatpush1.bf16.msra.mxu0 %v5844_v41  ;;  %v5925_v41 = vld [vmem:[#allocation13 + $0xa4] ss:$16 sps:$4 sm:$0xff]  }
 0x3dd   :  { %3317 = vmatprep.subr.bf16.mxu0 %v5851_v42  ;;  %v5914_v42 = vld [vmem:[#allocation13 + $0x68] ss:$16 sps:$4 sm:$0xff]  }
 0x3e0   :  { %3318 = vmatpush1.bf16.msra.mxu0 %v5849_v43  ;;  %v5922_v43 = vld [vmem:[#allocation13 + $0x8c] ss:$16 sps:$4 sm:$0xff]  }
 0x3e1   :  { %3319 = vmatprep.subr.bf16.mxu0 %v5856_v45  ;;  %v5923_v45 = vld [vmem:[#allocation13 + $0xa0] ss:$16 sps:$4 sm:$0xff]  }
 0x3e4   :  { %3320 = vmatpush1.bf16.msra.mxu0 %v5854_v48  ;;  %v2225_v53 = vpop.f32.mrb[16].mxu1  ;;  %v5926_v48 = vld [vmem:[#allocation13 + $0xa8] ss:$16 sps:$4 sm:$0xff]  }
 0x3e5   :  { %v5297_v20 = vadd.f32 %v2225_v53, %v1255_v49  ;;  %v2227_v55 = vpop.f32.mrb[17].mxu1  ;;  %3321 = vmatprep.subr.bf16.mxu0 %v5861_v51  ;;  %v5931_v49 = vld [vmem:[#allocation13 + $0xc4] ss:$16 sps:$4 sm:$0xff]   ;;  %v5934_v51 = vld [vmem:[#allocation13 + $0xcc] ss:$16 sps:$4 sm:$0xff]  }
 0x3e6   :  { %v5298_v57 = vadd.f32 %v2227_v55, %v1259_v52  ;;  %v2229_v58 = vpop.f32.mrb[18].mxu1  ;;  %v5929_v52 = vld [vmem:[#allocation13 + $0xc0] ss:$16 sps:$4 sm:$0xff]   ;;  %v5932_v53 = vld [vmem:[#allocation13 + $0xc8] ss:$16 sps:$4 sm:$0xff]  }
 0x3e7   :  { %v2236_v61 = vmul.f32 0.1, %v5297_v20  ;;  %v2230_v62 = vpop.f32.mrb[19].mxu1  ;;  %v5935_v55 = vld [vmem:[#allocation13 + $0xe0] ss:$16 sps:$4 sm:$0xff]  }
 0x3e8   :  { %v2237_v63 = vmul.f32 0.1, %v5298_v57  ;;  %3322 = vmatpush1.bf16.msra.mxu0 %v5859_v54  ;;  %v5937_v54 = vld [vmem:[#allocation13 + $0xe4] ss:$16 sps:$4 sm:$0xff]   ;;  %v5946_v58 = vld [vmem:[#allocation13 + $0x10c] ss:$16 sps:$4 sm:$0xff]  }
 0x3e9   :  { %v2242_v3 = vmax.f32 %v5297_v20, %v2236_v61  ;;  %3323 = vmatprep.subr.bf16.mxu0 %v5866_v56  ;;  %v5940_v20 = vld [vmem:[#allocation13 + $0xec] ss:$16 sps:$4 sm:$0xff]   ;;  %v5938_v56 = vld [vmem:[#allocation13 + $0xe8] ss:$16 sps:$4 sm:$0xff]   ;;  %v5941_v61 = vld [vmem:[#allocation13 + $0x100] ss:$16 sps:$4 sm:$0xff]  }
 0x3ea   :  { %v2243_v5 = vmax.f32 %v5298_v57, %v2237_v63  ;;  %v5943_v57 = vld [vmem:[#allocation13 + $0x104] ss:$16 sps:$4 sm:$0xff]   ;;  %v5944_v62 = vld [vmem:[#allocation13 + $0x108] ss:$16 sps:$4 sm:$0xff]  }
 0x3eb   :  { %v2248_v7 = vpack.c.bf16 %v2242_v3, %v2242_v3  ;;  %v5949_v63 = vld [vmem:[#allocation13 + $0x124] ss:$16 sps:$4 sm:$0xff]   ;;  %v5950_v3 = vld [vmem:[#allocation13 + $0x128] ss:$16 sps:$4 sm:$0xff]  }
 0x3ec   :  { %v2249_v6 = vpack.c.bf16 %v2243_v5, %v2243_v5  ;;  %3324 = vmatpush1.bf16.msra.mxu0 %v5864_v2  ;;  %v5947_v2 = vld [vmem:[#allocation13 + $0x120] ss:$16 sps:$4 sm:$0xff]   ;;  %v5955_v5 = vld [vmem:[#allocation13 + $0x144] ss:$16 sps:$4 sm:$0xff]  }
 0x3ed   :  { %3325 = vmatprep.subr.bf16.mxu0 %v5871_v4  ;;  %v5952_v4 = vld [vmem:[#allocation13 + $0x12c] ss:$16 sps:$4 sm:$0xff]  }
 0x3ee   :  { %3341 = vmatprep.mubr.bf16.mxu0 %v2249_v6  ;;  %3462 = vmatprep.mubr.bf16.mxu1 %v2249_v6  ;;  %v5958_v6 = vld [vmem:[#allocation13 + $0x14c] ss:$16 sps:$4 sm:$0xff]  }
 0x3ef   :  { %3463 = vmatmul.mubr.bf16.vlgmr.msra.gmra.mrb[28].mxu1 %v2248_v7 }
 0x3f0   :  { %3326 = vmatpush1.bf16.msra.mxu0 %v5869_v59  ;;  %4271 = vmatpush1.bf16.msra.mxu1 %v5893_v25  ;;  %v5953_v59 = vld [vmem:[#allocation13 + $0x140] ss:$16 sps:$4 sm:$0xff]   ;;  %v5979_v25 = vld [vmem:[#allocation13 + $0x1c4] ss:$16 sps:$4 sm:$0xff]  }
 0x3f1   :  { %3327 = vmatprep.subr.bf16.mxu0 %v5874_v8  ;;  %4272 = vmatprep.subr.bf16.mxu1 %v5901_v27  ;;  %v5961_v8 = vld [vmem:[#allocation13 + $0x164] ss:$16 sps:$4 sm:$0xff]  }
 0x3f4   :  { %3328 = vmatpush1.bf16.msra.mxu0 %v5872_v9  ;;  %4273 = vmatpush1.bf16.msra.mxu1 %v5899_v30  ;;  %v5964_v9 = vld [vmem:[#allocation13 + $0x16c] ss:$16 sps:$4 sm:$0xff]  }
 0x3f5   :  { %3329 = vmatprep.subr.bf16.mxu0 %v5877_v10  ;;  %4274 = vmatprep.subr.bf16.mxu1 %v5907_v31  ;;  %v5959_v10 = vld [vmem:[#allocation13 + $0x160] ss:$16 sps:$4 sm:$0xff]  }
 0x3f8   :  { %3330 = vmatpush1.bf16.msra.mxu0 %v5875_v11  ;;  %4275 = vmatpush1.bf16.msra.mxu1 %v5905_v33  ;;  %v5962_v11 = vld [vmem:[#allocation13 + $0x168] ss:$16 sps:$4 sm:$0xff]   ;;  %v5988_v33 = vld [vmem:[#allocation13 + $0x1ec] ss:$16 sps:$4 sm:$0xff]  }
 0x3f9   :  { %3331 = vmatprep.subr.bf16.mxu0 %v5880_v12  ;;  %4276 = vmatprep.subr.bf16.mxu1 %v5913_v34  ;;  %v5967_v12 = vld [vmem:[#allocation13 + $0x184] ss:$16 sps:$4 sm:$0xff]   ;;  %v5983_v34 = vld [vmem:[#allocation13 + $0x1e0] ss:$16 sps:$4 sm:$0xff]  }
 0x3fc   :  { %3332 = vmatpush1.bf16.msra.mxu0 %v5878_v13  ;;  %4277 = vmatpush1.bf16.msra.mxu1 %v5911_v36  ;;  %v5970_v13 = vld [vmem:[#allocation13 + $0x18c] ss:$16 sps:$4 sm:$0xff]  }
 0x3fd   :  { %3333 = vmatprep.subr.bf16.mxu0 %v5883_v14  ;;  %4278 = vmatprep.subr.bf16.mxu1 %v5919_v37  ;;  %v5965_v14 = vld [vmem:[#allocation13 + $0x180] ss:$16 sps:$4 sm:$0xff]   ;;  %v5994_v36 = vld [vmem:[#allocation13 + $0x20c] ss:$16 sps:$4 sm:$0xff]   ;;  %v2442_v37 = vld [vmem:[%s6660_s8] sm:$0x7] }
 0x400   :  { %3334 = vmatpush1.bf16.msra.mxu0 %v5881_v15  ;;  %4279 = vmatpush1.bf16.msra.mxu1 %v5917_v40  ;;  %v5968_v15 = vld [vmem:[#allocation13 + $0x188] ss:$16 sps:$4 sm:$0xff]  }
 0x401   :  { %3335 = vmatprep.subr.bf16.mxu0 %v5886_v17  ;;  %4280 = vmatprep.subr.bf16.mxu1 %v5925_v41  ;;  %v5973_v17 = vld [vmem:[#allocation13 + $0x1a4] ss:$16 sps:$4 sm:$0xff]  }
 0x404   :  { %3336 = vmatpush1.bf16.msra.mxu0 %v5884_v21  ;;  %4281 = vmatpush1.bf16.msra.mxu1 %v5923_v45  ;;  %v5976_v21 = vld [vmem:[#allocation13 + $0x1ac] ss:$16 sps:$4 sm:$0xff]  }
 0x405   :  { %3337 = vmatprep.subr.bf16.mxu0 %v5889_v22  ;;  %4282 = vmatprep.subr.bf16.mxu1 %v5931_v49  ;;  %v5971_v22 = vld [vmem:[#allocation13 + $0x1a0] ss:$16 sps:$4 sm:$0xff]  }
 0x408   :  { %3338 = vmatpush1.bf16.msra.mxu0 %v5887_v23  ;;  %4283 = vmatpush1.bf16.msra.mxu1 %v5929_v52  ;;  %v5974_v23 = vld [vmem:[#allocation13 + $0x1a8] ss:$16 sps:$4 sm:$0xff]  }
 0x409   :  { %3339 = vmatprep.subr.bf16.mxu0 %v5892_v24  ;;  %4284 = vmatprep.subr.bf16.mxu1 %v5937_v54  ;;  %v2447_v54 = vrot.slane %v2442_v37, %v6531_v18 }
 0x40c   :  { %3340 = vmatpush1.bf16.msra.mxu0 %v5890_v28  ;;  %4285 = vmatpush1.bf16.msra.mxu1 %v5935_v55  ;;  %v5977_v28 = vld [vmem:[#allocation13 + $0x1c0] ss:$16 sps:$4 sm:$0xff]  }
 0x40d   :  { %4352 = vmatprep.subr.bf16.mxu0 %v5898_v29  ;;  %4286 = vmatprep.subr.bf16.mxu1 %v5943_v57  ;;  %v5980_v29 = vld [vmem:[#allocation13 + $0x1c8] ss:$16 sps:$4 sm:$0xff]  }
 0x40f   :  { %3342 = vmatmul.mubr.bf16.vlgmr.msra.gmra.mrb[12].mxu0 %v2248_v7  ;;  %v5956_v7 = vld [vmem:[#allocation13 + $0x148] ss:$16 sps:$4 sm:$0xff]  }
 0x410   :  { %4353 = vmatpush1.bf16.msra.mxu0 %v5896_v32  ;;  %4287 = vmatpush1.bf16.msra.mxu1 %v5941_v61 }
 0x411   :  { %4354 = vmatprep.subr.bf16.mxu0 %v5904_v44  ;;  %4288 = vmatprep.subr.bf16.mxu1 %v5949_v63  ;;  %v5985_v44 = vld [vmem:[#allocation13 + $0x1e4] ss:$16 sps:$4 sm:$0xff]  }
 0x414   :  { %4355 = vmatpush1.bf16.msra.mxu0 %v5902_v1  ;;  %4289 = vmatpush1.bf16.msra.mxu1 %v5947_v2  ;;  %v5986_v1 = vld [vmem:[#allocation13 + $0x1e8] ss:$16 sps:$4 sm:$0xff]  }
 0x415   :  { %4356 = vmatprep.subr.bf16.mxu0 %v5910_v35  ;;  %4290 = vmatprep.subr.bf16.mxu1 %v5955_v5  ;;  %v5991_v35 = vld [vmem:[#allocation13 + $0x204] ss:$16 sps:$4 sm:$0xff]  }
 0x416   :  { %v151_v5 = vld [vmem:[#allocation2] sm:$0xff] }
 0x418   :  { %4357 = vmatpush1.bf16.msra.mxu0 %v5908_v38  ;;  %4291 = vmatpush1.bf16.msra.mxu1 %v5953_v59  ;;  %v2455_v38 = vrot.slane %v2442_v37, %v6547_v50  ;;  %v5989_v59 = vld [vmem:[#allocation13 + $0x200] ss:$16 sps:$4 sm:$0xff]  }
 0x419   :  { %4358 = vmatprep.subr.bf16.mxu0 %v5916_v39  ;;  %4292 = vmatprep.subr.bf16.mxu1 %v5961_v8 }
 0x41c   :  { %4359 = vmatpush1.bf16.msra.mxu0 %v5914_v42  ;;  %4293 = vmatpush1.bf16.msra.mxu1 %v5959_v10  ;;  %v6000_v10 = vld [vmem:[#allocation13 + $0x22c] ss:$16 sps:$4 sm:$0xff]  }
 0x41d   :  { %4360 = vmatprep.subr.bf16.mxu0 %v5922_v43  ;;  %4294 = vmatprep.subr.bf16.mxu1 %v5967_v12  ;;  %v5995_v12 = vld [vmem:[#allocation13 + $0x220] ss:$16 sps:$4 sm:$0xff]  }
 0x420   :  { %4361 = vmatpush1.bf16.msra.mxu0 %v5920_v46  ;;  %4295 = vmatpush1.bf16.msra.mxu1 %v5965_v14  ;;  %v6003_v14 = vld [vmem:[#allocation13 + $0x244] ss:$16 sps:$4 sm:$0xff]  }
 0x421   :  { %4362 = vmatprep.subr.bf16.mxu0 %v5928_v47  ;;  %4296 = vmatprep.subr.bf16.mxu1 %v5973_v17  ;;  %v6001_v17 = vld [vmem:[#allocation13 + $0x240] ss:$16 sps:$4 sm:$0xff]  }
 0x424   :  { %4363 = vmatpush1.bf16.msra.mxu0 %v5926_v48  ;;  %4297 = vmatpush1.bf16.msra.mxu1 %v5971_v22  ;;  %v6009_v22 = vld [vmem:[#allocation13 + $0x264] ss:$16 sps:$4 sm:$0xff]  }
 0x425   :  { %4364 = vmatprep.subr.bf16.mxu0 %v5934_v51  ;;  %4298 = vmatprep.subr.bf16.mxu1 %v5979_v25  ;;  %v6010_v25 = vld [vmem:[#allocation13 + $0x268] ss:$16 sps:$4 sm:$0xff]  }
 0x428   :  { %4365 = vmatpush1.bf16.msra.mxu0 %v5932_v53  ;;  %4299 = vmatpush1.bf16.msra.mxu1 %v5977_v28  ;;  %v6013_v28 = vld [vmem:[#allocation13 + $0x280] ss:$16 sps:$4 sm:$0xff]  }
 0x429   :  { %4366 = vmatprep.subr.bf16.mxu0 %v5940_v20  ;;  %4300 = vmatprep.subr.bf16.mxu1 %v5985_v44  ;;  %v2451_v20 = vrot.slane %v2442_v37, %v6534_v19  ;;  %v6022_v44 = vld [vmem:[#allocation13 + $0x2a8] ss:$16 sps:$4 sm:$0xff]   ;;  %v6036_v37 = vld [vmem:[#allocation13 + $0x2ec] ss:$16 sps:$4 sm:$0xff]  }
 0x42c   :  { %4367 = vmatpush1.bf16.msra.mxu0 %v5938_v56  ;;  %4301 = vmatpush1.bf16.msra.mxu1 %v5983_v34  ;;  %v6030_v34 = vld [vmem:[#allocation13 + $0x2cc] ss:$16 sps:$4 sm:$0xff]  }
 0x42d   :  { %4368 = vmatprep.subr.bf16.mxu0 %v5946_v58  ;;  %4311 = vmatprep.subr.bf16.mxu1 %v5991_v35  ;;  %v6028_v35 = vld [vmem:[#allocation13 + $0x2c8] ss:$16 sps:$4 sm:$0xff]  }
 0x430   :  { %4369 = vmatpush1.bf16.msra.mxu0 %v5944_v62 }
 0x431   :  { %4370 = vmatprep.subr.bf16.mxu0 %v5952_v4 }
 0x434   :  { %4371 = vmatpush1.bf16.msra.mxu0 %v5950_v3 }
 0x435   :  { %4372 = vmatprep.subr.bf16.mxu0 %v5958_v6 }
 0x438   :  { %4373 = vmatpush1.bf16.msra.mxu0 %v5956_v7  ;;  %v5992_v7 = vld [vmem:[#allocation13 + $0x208] ss:$16 sps:$4 sm:$0xff]  }
 0x439   :  { %4374 = vmatprep.subr.bf16.mxu0 %v5964_v9  ;;  %v5997_v9 = vld [vmem:[#allocation13 + $0x224] ss:$16 sps:$4 sm:$0xff]  }
 0x43c   :  { %4375 = vmatpush1.bf16.msra.mxu0 %v5962_v11  ;;  %v3479_v11 = vpack.c.bf16 %v151_v5, %v151_v5  ;;  %v6070_v5 = vld [vmem:[#allocation13 + $0x3a8] ss:$16 sps:$4 sm:$0xff]  }
 0x43d   :  { %4376 = vmatprep.subr.bf16.mxu0 %v5970_v13  ;;  %v5998_v13 = vld [vmem:[#allocation13 + $0x228] ss:$16 sps:$4 sm:$0xff]  }
 0x440   :  { %4377 = vmatpush1.bf16.msra.mxu0 %v5968_v15  ;;  %v6006_v15 = vld [vmem:[#allocation13 + $0x24c] ss:$16 sps:$4 sm:$0xff]  }
 0x441   :  { %4378 = vmatprep.subr.bf16.mxu0 %v5976_v21  ;;  %v6004_v21 = vld [vmem:[#allocation13 + $0x248] ss:$16 sps:$4 sm:$0xff]  }
 0x444   :  { %4379 = vmatpush1.bf16.msra.mxu0 %v5974_v23  ;;  %v6012_v23 = vld [vmem:[#allocation13 + $0x26c] ss:$16 sps:$4 sm:$0xff]  }
 0x445   :  { %4380 = vmatprep.subr.bf16.mxu0 %v5982_v26  ;;  %v6015_v26 = vld [vmem:[#allocation13 + $0x284] ss:$16 sps:$4 sm:$0xff]  }
 0x448   :  { %4381 = vmatpush1.bf16.msra.mxu0 %v5980_v29  ;;  %v6016_v29 = vld [vmem:[#allocation13 + $0x288] ss:$16 sps:$4 sm:$0xff]  }
 0x449   :  { %4382 = vmatprep.subr.bf16.mxu0 %v5988_v33  ;;  %v6027_v33 = vld [vmem:[#allocation13 + $0x2c4] ss:$16 sps:$4 sm:$0xff]  }
 0x44c   :  { %4383 = vmatpush1.bf16.msra.mxu0 %v5986_v1  ;;  %v6025_v1 = vld [vmem:[#allocation13 + $0x2c0] ss:$16 sps:$4 sm:$0xff]  }
 0x44d   :  { %4393 = vmatprep.subr.bf16.mxu0 %v5994_v36  ;;  %v6033_v36 = vld [vmem:[#allocation13 + $0x2e4] ss:$16 sps:$4 sm:$0xff]  }
 0x462   :  { %v5172_v24 = vpop.f32.mrb[20].mxu1 }
 0x463   :  { %v5173_v27 = vpop.f32.mrb[21].mxu1 }
 0x464   :  { %v5174_v30 = vadd.f32 %v5173_v27, %v5172_v24  ;;  %v5175_v31 = vpop.f32.mrb[22].mxu1  ;;  %v6007_v24 = vld [vmem:[#allocation13 + $0x260] ss:$16 sps:$4 sm:$0xff]   ;;  %v6018_v27 = vld [vmem:[#allocation13 + $0x28c] ss:$16 sps:$4 sm:$0xff]  }
 0x465   :  { %v5176_v32 = vpop.f32.mrb[23].mxu1  ;;  %v6024_v31 = vld [vmem:[#allocation13 + $0x2ac] ss:$16 sps:$4 sm:$0xff]  }
 0x466   :  { %v3385_v41 = vadd.f32 %v5174_v30, %v2455_v38  ;;  %v6021_v30 = vld [vmem:[#allocation13 + $0x2a4] ss:$16 sps:$4 sm:$0xff]   ;;  %v6019_v32 = vld [vmem:[#allocation13 + $0x2a0] ss:$16 sps:$4 sm:$0xff]  }
 0x467   :  { %v6031_v38 = vld [vmem:[#allocation13 + $0x2e0] ss:$16 sps:$4 sm:$0xff]  }
 0x482   :  { %v5194_v39 = vpop.f32.mrb[24].mxu1 }
 0x483   :  { %v5195_v40 = vpop.f32.mrb[25].mxu1 }
 0x484   :  { %v5196_v42 = vadd.f32 %v5195_v40, %v5194_v39  ;;  %v5197_v43 = vpop.f32.mrb[26].mxu1  ;;  %v6034_v39 = vld [vmem:[#allocation13 + $0x2e8] ss:$16 sps:$4 sm:$0xff]   ;;  %v6039_v40 = vld [vmem:[#allocation13 + $0x304] ss:$16 sps:$4 sm:$0xff]  }
 0x485   :  { %v5198_v45 = vpop.f32.mrb[27].mxu1  ;;  %v6040_v43 = vld [vmem:[#allocation13 + $0x308] ss:$16 sps:$4 sm:$0xff]  }
 0x486   :  { %v3425_v46 = vadd.f32 %v5196_v42, %v3385_v41  ;;  %v6042_v41 = vld [vmem:[#allocation13 + $0x30c] ss:$16 sps:$4 sm:$0xff]   ;;  %v6037_v42 = vld [vmem:[#allocation13 + $0x300] ss:$16 sps:$4 sm:$0xff]   ;;  %v6045_v45 = vld [vmem:[#allocation13 + $0x324] ss:$16 sps:$4 sm:$0xff]  }
 0x4c2   :  { %v5216_v47 = vpop.f32.mrb[28].mxu1 }
 0x4c3   :  { %v5217_v48 = vpop.f32.mrb[29].mxu1 }
 0x4c4   :  { %v5218_v49 = vadd.f32 %v5217_v48, %v5216_v47  ;;  %v5219_v51 = vpop.f32.mrb[30].mxu1  ;;  %v6043_v47 = vld [vmem:[#allocation13 + $0x320] ss:$16 sps:$4 sm:$0xff]   ;;  %v6046_v48 = vld [vmem:[#allocation13 + $0x328] ss:$16 sps:$4 sm:$0xff]  }
 0x4c5   :  { %v5220_v52 = vpop.f32.mrb[31].mxu1  ;;  %v6054_v51 = vld [vmem:[#allocation13 + $0x34c] ss:$16 sps:$4 sm:$0xff]  }
 0x4c6   :  { %v6613_v53 = vadd.f32 %v5218_v49, %v3425_v46  ;;  %v6048_v46 = vld [vmem:[#allocation13 + $0x32c] ss:$16 sps:$4 sm:$0xff]   ;;  %v6051_v49 = vld [vmem:[#allocation13 + $0x344] ss:$16 sps:$4 sm:$0xff]   ;;  %v6049_v52 = vld [vmem:[#allocation13 + $0x340] ss:$16 sps:$4 sm:$0xff]  }
 0x4e2   :  { %v3343_v55 = vpop.f32.mrb[12].mxu0 }
 0x4e3   :  { %v5299_v56 = vadd.f32 %v3343_v55, %v2447_v54  ;;  %v3345_v57 = vpop.f32.mrb[13].mxu0  ;;  %v6052_v54 = vld [vmem:[#allocation13 + $0x348] ss:$16 sps:$4 sm:$0xff]   ;;  %v6060_v55 = vld [vmem:[#allocation13 + $0x36c] ss:$16 sps:$4 sm:$0xff]  }
 0x4e4   :  { %v5300_v58 = vadd.f32 %v3345_v57, %v2451_v20  ;;  %v3347_v61 = vpop.f32.mrb[14].mxu0  ;;  %v6057_v20 = vld [vmem:[#allocation13 + $0x364] ss:$16 sps:$4 sm:$0xff]   ;;  %v6058_v57 = vld [vmem:[#allocation13 + $0x368] ss:$16 sps:$4 sm:$0xff]  }
 0x4e5   :  { %v3470_v62 = vmul.f32 0.1, %v5299_v56  ;;  %v3348_v63 = vpop.f32.mrb[15].mxu0  ;;  %v6066_v61 = vld [vmem:[#allocation13 + $0x38c] ss:$16 sps:$4 sm:$0xff]  }
 0x4e6   :  { %v3471_v2 = vmul.f32 0.1, %v5300_v58  ;;  %v6064_v63 = vld [vmem:[#allocation13 + $0x388] ss:$16 sps:$4 sm:$0xff]  }
 0x4e7   :  { %v3473_v3 = vmax.f32 %v5299_v56, %v3470_v62  ;;  %v6055_v56 = vld [vmem:[#allocation13 + $0x360] ss:$16 sps:$4 sm:$0xff]  }
 0x4e8   :  { %v3474_v4 = vmax.f32 %v5300_v58, %v3471_v2  ;;  %v6063_v58 = vld [vmem:[#allocation13 + $0x384] ss:$16 sps:$4 sm:$0xff]   ;;  %v6061_v62 = vld [vmem:[#allocation13 + $0x380] ss:$16 sps:$4 sm:$0xff]  }
 0x4e9   :  { %v3476_v8 = vpack.c.bf16 %v3473_v3, %v3473_v3  ;;  %v6069_v2 = vld [vmem:[#allocation13 + $0x3a4] ss:$16 sps:$4 sm:$0xff]   ;;  %v6072_v3 = vld [vmem:[#allocation13 + $0x3ac] ss:$16 sps:$4 sm:$0xff]  }
 0x4ea   :  { %v3477_v6 = vpack.c.bf16 %v3474_v4, %v3474_v4  ;;  %v6067_v4 = vld [vmem:[#allocation13 + $0x3a0] ss:$16 sps:$4 sm:$0xff]  }
 0x4ec   :  { %4302 = vmatprep.mubr.bf16.mxu1 %v3477_v6  ;;  %4384 = vmatprep.mubr.bf16.mxu0 %v3477_v6  ;;  %v6075_v6 = vld [vmem:[#allocation13 + $0x3c4] ss:$16 sps:$4 sm:$0xff]  }
 0x4ed   :  { %4303 = vmatmul.mubr.bf16.vlgmr.msra.gmra.mrb[32].mxu1 %v3476_v8  ;;  %4385 = vmatmul.mubr.bf16.vlgmr.msra.gmra.mrb[16].mxu0 %v3476_v8  ;;  %v6076_v8 = vld [vmem:[#allocation13 + $0x3c8] ss:$16 sps:$4 sm:$0xff]  }
 0x4ee   :  { %4312 = vmatpush1.bf16.msra.mxu1 %v5989_v59  ;;  %4394 = vmatpush1.bf16.msra.mxu0 %v5992_v7  ;;  %v6078_v59 = vld [vmem:[#allocation13 + $0x3cc] ss:$16 sps:$4 sm:$0xff]   ;;  %v6073_v7 = vld [vmem:[#allocation13 + $0x3c0] ss:$16 sps:$4 sm:$0xff]  }
 0x4ef   :  { %4313 = vmatprep.subr.bf16.mxu1 %v5997_v9  ;;  %4395 = vmatprep.subr.bf16.mxu0 %v6000_v10  ;;  %v3472_v9 = vmul.f32 0.1, %v6613_v53  ;;  %v6081_v10 = vld [vmem:[#allocation13 + $0x3e4] ss:$16 sps:$4 sm:$0xff]  }
 0x4f0   :  { %4343 = vmatprep.mubr.bf16.mxu1 %v3479_v11  ;;  %4425 = vmatprep.mubr.bf16.mxu0 %v3479_v11  ;;  %v6084_v11 = vld [vmem:[#allocation13 + $0x3ec] ss:$16 sps:$4 sm:$0xff]  }
 0x4f2   :  { %4314 = vmatpush1.bf16.msra.mxu1 %v5995_v12  ;;  %4396 = vmatpush1.bf16.msra.mxu0 %v5998_v13  ;;  %v6079_v12 = vld [vmem:[#allocation13 + $0x3e0] ss:$16 sps:$4 sm:$0xff]   ;;  %v6082_v13 = vld [vmem:[#allocation13 + $0x3e8] ss:$16 sps:$4 sm:$0xff]  }
 0x4f3   :  { %4315 = vmatprep.subr.bf16.mxu1 %v6003_v14  ;;  %4397 = vmatprep.subr.bf16.mxu0 %v6006_v15  ;;  %v3475_v14 = vmax.f32 %v6613_v53, %v3472_v9  ;;  %v6087_v53 = vld [vmem:[#allocation14 + $0x10] sm:$0xff]  }
 0x4f5   :  { %v3478_v15 = vpack.c.bf16 %v3475_v14, %v3475_v14 }
 0x4f6   :  { %4316 = vmatpush1.bf16.msra.mxu1 %v6001_v17  ;;  %4398 = vmatpush1.bf16.msra.mxu0 %v6004_v21  ;;  %v6085_v17 = vld [vmem:[#allocation14] sm:$0xff]   ;;  %v6086_v21 = vld [vmem:[#allocation14 + $0x8] sm:$0xff]  }
 0x4f7   :  { %4317 = vmatprep.subr.bf16.mxu1 %v6009_v22  ;;  %4399 = vmatprep.subr.bf16.mxu0 %v6012_v23  ;;  %v6088_v22 = vld [vmem:[#allocation14 + $0x18] sm:$0xff]   ;;  %v6089_v23 = vld [vmem:[#allocation14 + $0x20] sm:$0xff]  }
 0x4fa   :  { %4318 = vmatpush1.bf16.msra.mxu1 %v6007_v24  ;;  %4400 = vmatpush1.bf16.msra.mxu0 %v6010_v25  ;;  %v6090_v24 = vld [vmem:[#allocation14 + $0x28] sm:$0xff]   ;;  %v6091_v25 = vld [vmem:[#allocation14 + $0x30] sm:$0xff]  }
 0x4fb   :  { %4319 = vmatprep.subr.bf16.mxu1 %v6015_v26  ;;  %4401 = vmatprep.subr.bf16.mxu0 %v6018_v27  ;;  %v6092_v26 = vld [vmem:[#allocation14 + $0x38] sm:$0xff]   ;;  %v3608_v27 = vld [vmem:[%s6662_s10] sm:$0xf] }
 0x4fe   :  { %4320 = vmatpush1.bf16.msra.mxu1 %v6013_v28  ;;  %4402 = vmatpush1.bf16.msra.mxu0 %v6016_v29  ;;  %v3613_v28 = vrot.slane %v3608_v27, %v6531_v18  ;;  %v3617_v29 = vrot.slane %v3608_v27, %v6534_v19  ;;  %v3621_v19 = vrot.slane %v3608_v27, %v6547_v50 }
 0x4ff   :  { %4321 = vmatprep.subr.bf16.mxu1 %v6021_v30  ;;  %4403 = vmatprep.subr.bf16.mxu0 %v6024_v31 }
 0x502   :  { %4322 = vmatpush1.bf16.msra.mxu1 %v6019_v32  ;;  %4404 = vmatpush1.bf16.msra.mxu0 %v6022_v44 }
 0x503   :  { %4323 = vmatprep.subr.bf16.mxu1 %v6027_v33  ;;  %4405 = vmatprep.subr.bf16.mxu0 %v6030_v34 }
 0x506   :  { %4324 = vmatpush1.bf16.msra.mxu1 %v6025_v1  ;;  %4406 = vmatpush1.bf16.msra.mxu0 %v6028_v35 }
 0x507   :  { %4325 = vmatprep.subr.bf16.mxu1 %v6033_v36  ;;  %4407 = vmatprep.subr.bf16.mxu0 %v6036_v37 }
 0x50a   :  { %4326 = vmatpush1.bf16.msra.mxu1 %v6031_v38  ;;  %4408 = vmatpush1.bf16.msra.mxu0 %v6034_v39  ;;  %v3625_v39 = vrot.slane %v3608_v27, %v1250_v60 }
 0x50b   :  { %4327 = vmatprep.subr.bf16.mxu1 %v6039_v40  ;;  %4409 = vmatprep.subr.bf16.mxu0 %v6042_v41 }
 0x50e   :  { %4328 = vmatpush1.bf16.msra.mxu1 %v6037_v42  ;;  %4410 = vmatpush1.bf16.msra.mxu0 %v6040_v43 }
 0x50f   :  { %4329 = vmatprep.subr.bf16.mxu1 %v6045_v45  ;;  %4411 = vmatprep.subr.bf16.mxu0 %v6048_v46 }
 0x512   :  { %4330 = vmatpush1.bf16.msra.mxu1 %v6043_v47  ;;  %4412 = vmatpush1.bf16.msra.mxu0 %v6046_v48 }
 0x513   :  { %4331 = vmatprep.subr.bf16.mxu1 %v6051_v49  ;;  %4413 = vmatprep.subr.bf16.mxu0 %v6054_v51  ;;  %v152_v49 = vld [vmem:[#allocation2 + $0x8] sm:$0xff] }
 0x516   :  { %4332 = vmatpush1.bf16.msra.mxu1 %v6049_v52  ;;  %4414 = vmatpush1.bf16.msra.mxu0 %v6052_v54 }
 0x517   :  { %4333 = vmatprep.subr.bf16.mxu1 %v6057_v20  ;;  %4415 = vmatprep.subr.bf16.mxu0 %v6060_v55 }
 0x51a   :  { %4334 = vmatpush1.bf16.msra.mxu1 %v6055_v56  ;;  %4416 = vmatpush1.bf16.msra.mxu0 %v6058_v57 }
 0x51b   :  { %4335 = vmatprep.subr.bf16.mxu1 %v6063_v58  ;;  %4417 = vmatprep.subr.bf16.mxu0 %v6066_v61  ;;  %v5107_v58 = vld [vmem:[%s6664_s12] ss:$0 sm:$0xff] }
 0x51e   :  { %4336 = vmatpush1.bf16.msra.mxu1 %v6061_v62  ;;  %4418 = vmatpush1.bf16.msra.mxu0 %v6064_v63 }
 0x51f   :  { %4337 = vmatprep.subr.bf16.mxu1 %v6069_v2  ;;  %4419 = vmatprep.subr.bf16.mxu0 %v6072_v3 }
 0x522   :  { %4338 = vmatpush1.bf16.msra.mxu1 %v6067_v4  ;;  %4420 = vmatpush1.bf16.msra.mxu0 %v6070_v5 }
 0x523   :  { %4339 = vmatprep.subr.bf16.mxu1 %v6075_v6  ;;  %4421 = vmatprep.subr.bf16.mxu0 %v6078_v59 }
 0x526   :  { %4340 = vmatpush1.bf16.msra.mxu1 %v6073_v7  ;;  %4422 = vmatpush1.bf16.msra.mxu0 %v6076_v8 }
 0x527   :  { %4341 = vmatprep.subr.bf16.mxu1 %v6081_v10  ;;  %4423 = vmatprep.subr.bf16.mxu0 %v6084_v11 }
 0x52a   :  { %4342 = vmatpush1.bf16.msra.mxu1 %v6079_v12  ;;  %4424 = vmatpush1.bf16.msra.mxu0 %v6082_v13 }
 0x52b   :  { %5271 = vmatprep.subr.bf16.mxu1 %v6335_v0 }
 0x52d   :  { %4344 = vmatmul.mubr.bf16.vlgmr.msra.gmra.mrb[32].mxu1 %v3478_v15  ;;  %4426 = vmatmul.mubr.bf16.vlgmr.msra.gmra.mrb[16].mxu0 %v3478_v15 }
 0x52e   :  { %5287 = vmatprep.mubr.msk.bf16.mxu1 %vm6337_vm0, %v6335_v0  ;;  %5272 = vmatpush3.bf16.msra.mxu1 %v6085_v17 }
 0x52f   :  { %5273 = vmatprep.subr.bf16.mxu1 %v6335_v0 }
 0x532   :  { %5274 = vmatpush3.bf16.msra.mxu1 %v6086_v21 }
 0x533   :  { %5275 = vmatprep.subr.bf16.mxu1 %v6335_v0 }
 0x536   :  { %5276 = vmatpush3.bf16.msra.mxu1 %v6087_v53 }
 0x537   :  { %5277 = vmatprep.subr.bf16.mxu1 %v6335_v0 }
 0x53a   :  { %5278 = vmatpush3.bf16.msra.mxu1 %v6088_v22 }
 0x53b   :  { %5279 = vmatprep.subr.bf16.mxu1 %v6335_v0 }
 0x53e   :  { %5280 = vmatpush3.bf16.msra.mxu1 %v6089_v23 }
 0x53f   :  { %5281 = vmatprep.subr.bf16.mxu1 %v6335_v0 }
 0x542   :  { %5282 = vmatpush3.bf16.msra.mxu1 %v6090_v24 }
 0x543   :  { %5283 = vmatprep.subr.bf16.mxu1 %v6335_v0 }
 0x546   :  { %5284 = vmatpush3.bf16.msra.mxu1 %v6091_v25 }
 0x547   :  { %5285 = vmatprep.subr.bf16.mxu1 %v6335_v0 }
 0x54a   :  { %5286 = vmatpush3.bf16.msra.mxu1 %v6092_v26 }
 0x600   :  { %v4345_v30 = vpop.f32.mrb[32].mxu1  ;;  %v4427_v31 = vpop.f32.mrb[16].mxu0 }
 0x601   :  { %v5301_v32 = vadd.f32 %v4345_v30, %v3613_v28  ;;  %v4347_v44 = vpop.f32.mrb[33].mxu1  ;;  %v4429_v33 = vpop.f32.mrb[17].mxu0  ;;  %v5303_v41 = vadd.f32 %v4427_v31, %v3621_v19 }
 0x602   :  { %v5302_v34 = vadd.f32 %v4347_v44, %v3617_v29  ;;  %v4349_v1 = vpop.f32.mrb[34].mxu1  ;;  %v4431_v35 = vpop.f32.mrb[18].mxu0  ;;  %v5304_v18 = vadd.f32 %v4429_v33, %v3625_v39 }
 0x603   :  { %v5104_v36 = vmul.f32 -1.442695, %v5301_v32  ;;  %v4350_v37 = vpop.f32.mrb[35].mxu1  ;;  %v4432_v0 = vpop.f32.mrb[19].mxu0 }
 0x604   :  { %v5105_v38 = vmul.f32 -1.442695, %v5302_v34  ;;  %v5106_v40 = vmul.f32 -1.442695, %v5304_v18 }
 0x605   :  { %6093 = vpow2.f32 %v5104_v36 }
 0x606   :  { %6095 = vpow2.f32 %v5105_v38 }
 0x607   :  { %6097 = vpow2.f32 %v5106_v40 }
 0x608   :  { %6099 = vtanh.f32 %v5303_v41 }
 0x60f   :  { %v6094_v42 = vpop.eup %6093 }
 0x610   :  { %v6096_v43 = vpop.eup %6095  ;;  %v4437_v45 = vadd.f32 1.0, %v6094_v42 }
 0x611   :  { %v4443_v46 = vadd.f32 1.0, %v6096_v43  ;;  %v6098_v47 = vpop.eup %6097 }
 0x612   :  { %6101 = vrcp.f32 %v4437_v45  ;;  %v6100_v48 = vpop.eup %6099  ;;  %v4450_v52 = vadd.f32 1.0, %v6098_v47 }
 0x613   :  { %6103 = vrcp.f32 %v4443_v46 }
 0x614   :  { %6105 = vrcp.f32 %v4450_v52 }
 0x61c   :  { %v6102_v16 = vpop.eup %6101 }
 0x61d   :  { %v6104_v60 = vpop.eup %6103  ;;  %v4454_v51 = vmul.f32 %v6102_v16, %v6100_v48 }
 0x61e   :  { %v4453_v54 = vmul.f32 %v6104_v60, %v152_v49  ;;  %v6106_v50 = vpop.eup %6105 }
 0x620   :  { %v4455_v20 = vadd.f32 %v4454_v51, %v4453_v54 }
 0x622   :  { %6107 = vtanh.f32 %v4455_v20  ;;  %4572 = vst [vmem:[#allocation16 + $0x10] sm:$0xff] %v4455_v20 }
 0x62c   :  { %v6108_v55 = vpop.eup %6107 }
 0x62d   :  { %v4457_v56 = vmul.f32 %v6108_v55, %v6106_v50 }
 0x62f   :  { %v4458_v57 = vpack.c.bf16 %v4457_v56, %v4457_v56  ;;  %4571 = vst [vmem:[#allocation16 + $0x8] sm:$0xff] %v4457_v56 }
 0x631   :  { %5288 = vmatmul.mubr.bf16.vlgmr.msra.gmra.mrb[36].mxu1 %v4458_v57 }
 0x704   :  { %v4564_v61 = vpop.f32.mrb[36].mxu1 }
 0x705   :  { %v4565_v62 = vadd.f32 %v5107_v58, %v4564_v61  ;;  %v5289_v63 = vpop.f32.mrb[37].mxu1 }
 0x706   :  { %v4567_v2 = vpop.f32.mrb[38].mxu1 }
 0x707   :  { %4570 = vst [vmem:[#allocation16] sm:$0xff] %v4565_v62  ;;  %v5290_v3 = vpop.f32.mrb[39].mxu1 }
 0x708   :  { %6296 = shalt.err (!%p6293_p12)
}
 0x709   :  { %s6297_s12 = scalar_lea.hbm %s6665_s13, 384 }
 0x70a   :  { %p6298_p13 = scmp.ne.s32.totalorder %s6665_s13, %s6297_s12  ;;  %p6301_p0 = scmp.lt.u32.totalorder %s6297_s12, %s6665_s13 }
 0x70c   :  { %p6303_p1 = pnand %p6301_p0, %p6298_p13 }
 0x70e   :  { %6306 = shalt.err (!%p6303_p1)
}
 0x70f   :  { %4582 = dma.vmem_to_hbm [thread:$0]  %s4580_s5, 384, %s6665_s13, [#allocation4]  }
 0x710   :  { %6317 = dma.done.wait [#allocation4], 384  }
 0x711   :  { %6318 = vsyncadd [#allocation4], 4294966912 }
 0x712   :  { %4586 = vsyncpa [#allocation3], 1 }
 0x713   :  { %4587 = vsyncpa [#allocation6], 1 }
 0x714   :  { %4588 = vsyncpa [#allocation9], 1 }
 0x715   :  { %4589 = vsyncpa [#allocation12], 1 }
 0x716   :  { %4590 = vsyncpa [#allocation15], 1 }
 0x717   :  { %4591 = vsyncpa [#allocation4], 1 }

</bundles_post_ra>
